<compile_context>
chip_gen: v7x
topology: tpu7x:2x2x1
jax: 0.10.0
libtpu: 0.0.40
codegen_flags: <defaults>
</compile_context>

<pallas_src>
import functools

import jax
import jax.numpy as jnp
from jax.experimental import pallas as pl
from jax.experimental.pallas import tpu as pltpu


def _round_up(x, m):
    return (x + m - 1) // m * m


# -----------------------------------------------------------------------------
# Pointwise (1x1) conv + folded BN + optional SiLU, with optional fused SE scale
# (pre-multiply) and fused residual add (post-add).  bf16 MXU matmul, f32 acc.
# -----------------------------------------------------------------------------
def _pw_kernel(*refs, with_act, with_se, with_res):
    x_ref, w_ref, scale_ref, bias_ref = refs[0], refs[1], refs[2], refs[3]
    i = 4
    se_ref = res_ref = None
    if with_se:
        se_ref = refs[i]; i += 1
    if with_res:
        res_ref = refs[i]; i += 1
    o_ref = refs[i]

    x = x_ref[0].astype(jnp.float32)                       # (tile_hw, Cin)
    if with_se:
        x = x * se_ref[0]                                  # fused SE channel scale
    acc = jnp.dot(x.astype(jnp.bfloat16), w_ref[...],      # bf16 x bf16 -> f32 on MXU
                  preferred_element_type=jnp.float32)      # (tile_hw, tile_n)
    y = acc * scale_ref[...] + bias_ref[...]               # conv bias + BN(eval) folded
    if with_act:
        y = y * pl.reciprocal(1.0 + jnp.exp(-y), approx=True)   # SiLU (EUP exp + vrcp)
    if with_res:
        y = y + res_ref[0].astype(jnp.float32)             # fused skip connection
    o_ref[0] = y.astype(o_ref.dtype)


def pointwise_conv_bn_act(x, weight, conv_bias, gamma, beta, run_mean, run_var, *,
                          with_act, se_scale=None, residual=None, eps=1e-5,
                          tile_hw=512, tile_n=128,
                          vmem_limit_bytes=32 * 1024 * 1024):
    """1x1 conv + BN(eval) + optional SiLU on NHWC activations.

    x: (N, H, W, Cin).  weight: (Cout, Cin, 1, 1) (PyTorch OIHW).
    se_scale: optional (N, Cin) per-(image, channel) scale fused before the matmul.
    residual: optional (N, H, W, Cout) tensor added after BN (skip connection).
    """
    N, H, W, Cin = x.shape
    Cout = weight.shape[0]
    HW = H * W

    cout_p = _round_up(Cout, tile_n)                 # lane-dense output (multiple of 128)
    tile_hw = min(tile_hw, _round_up(HW, 8))
    hw_p = _round_up(HW, tile_hw)

    w_mat = weight.reshape(Cout, Cin).T              # (Cin, Cout)
    w_mat = jnp.pad(w_mat, ((0, 0), (0, cout_p - Cout))).astype(jnp.bfloat16)

    inv = gamma / jnp.sqrt(run_var + eps)            # fold conv bias + BN (eval)
    scale = jnp.pad(inv, (0, cout_p - Cout)).reshape(1, cout_p).astype(jnp.float32)
    bias = jnp.pad(beta + (conv_bias - run_mean) * inv,
                   (0, cout_p - Cout)).reshape(1, cout_p).astype(jnp.float32)

    a = x.reshape(N, HW, Cin)
    if hw_p != HW:
        a = jnp.pad(a, ((0, 0), (0, hw_p - HW), (0, 0)))

    operands = [a, w_mat, scale, bias]
    in_specs = [
        pl.BlockSpec((1, tile_hw, Cin), lambda n, m, j: (n, m, 0)),
        pl.BlockSpec((Cin, tile_n), lambda n, m, j: (0, j)),
        pl.BlockSpec((1, tile_n), lambda n, m, j: (0, j)),
        pl.BlockSpec((1, tile_n), lambda n, m, j: (0, j)),
    ]
    with_se = se_scale is not None
    if with_se:
        operands.append(se_scale.reshape(N, 1, Cin).astype(jnp.float32))
        in_specs.append(pl.BlockSpec((1, 1, Cin), lambda n, m, j: (n, 0, 0)))
    with_res = residual is not None
    if with_res:
        r = residual.reshape(N, HW, Cout)
        r = jnp.pad(r, ((0, 0), (0, hw_p - HW), (0, cout_p - Cout)))
        operands.append(r)
        in_specs.append(pl.BlockSpec((1, tile_hw, tile_n), lambda n, m, j: (n, m, j)))

    out = pl.pallas_call(
        functools.partial(_pw_kernel, with_act=with_act,
                          with_se=with_se, with_res=with_res),
        out_shape=jax.ShapeDtypeStruct((N, hw_p, cout_p), x.dtype),
        grid=(N, hw_p // tile_hw, cout_p // tile_n),
        in_specs=in_specs,
        out_specs=pl.BlockSpec((1, tile_hw, tile_n), lambda n, m, j: (n, m, j)),
        compiler_params=pltpu.CompilerParams(
            dimension_semantics=("parallel", "parallel", "parallel"),
            vmem_limit_bytes=vmem_limit_bytes),
    )(*operands)

    return out[:, :HW, :Cout].reshape(N, H, W, Cout)


# -----------------------------------------------------------------------------
# Depthwise kxk conv + folded BN + SiLU, with the SE squeeze (global average
# pool) fused into the epilogue.  Halo tile in VMEM, taps slid in-kernel (VPU).
# -----------------------------------------------------------------------------
def _dw_kernel(xp_ref, w_ref, scale_ref, bias_ref, o_ref, pool_ref, *,
               k, stride, hout, wout):
    xp = xp_ref[0].astype(jnp.float32)               # (Hp, Wp, C) padded halo tile
    w = w_ref[...].astype(jnp.float32)               # (k, k, C)
    c = xp.shape[-1]
    acc = jnp.zeros((hout, wout, c), jnp.float32)
    for di in range(k):                              # slide the k*k taps in-kernel
        for dj in range(k):
            if stride == 1:
                win = xp[di:di + hout, dj:dj + wout, :]
            else:
                # TODO(synk): strided (stride > 1) tap path is not exercised by the test.
                win = jax.lax.slice(
                    xp, (di, dj, 0),
                    (di + stride * (hout - 1) + 1, dj + stride * (wout - 1) + 1, c),
                    (stride, stride, 1))
            acc = acc + win * w[di:di + 1, dj:dj + 1, :]
    y = acc * scale_ref[...] + bias_ref[...]                       # bias + BN folded
    y = y * pl.reciprocal(1.0 + jnp.exp(-y), approx=True)          # SiLU
    o_ref[0] = y.astype(o_ref.dtype)
    pool_ref[...] = jnp.mean(y, axis=(0, 1), keepdims=True)        # fused SE squeeze


def depthwise_conv_bn_silu(x, weight, conv_bias, gamma, beta, run_mean, run_var, *,
                           kernel_size, stride, padding, eps=1e-5,
                           vmem_limit_bytes=32 * 1024 * 1024):
    """Depthwise conv (groups=C) + BN(eval) + SiLU on NHWC activations.

    x: (N, H, W, C).  weight: (C, 1, k, k) (PyTorch depthwise OIHW).
    Returns (out NHWC, pooled (N, C)) where pooled is the SE squeeze of out.
    """
    N, H, W, C = x.shape
    k = kernel_size
    Hout = (H + 2 * padding - k) // stride + 1
    Wout = (W + 2 * padding - k) // stride + 1
    xp = jnp.pad(x, ((0, 0), (padding, padding), (padding, padding), (0, 0)))
    Hp, Wp = H + 2 * padding, W + 2 * padding

    w_kkc = weight.reshape(C, k, k).transpose(1, 2, 0).astype(jnp.float32)  # (k, k, C)
    inv = gamma / jnp.sqrt(run_var + eps)
    scale = inv.reshape(1, 1, C).astype(jnp.float32)
    bias = (beta + (conv_bias - run_mean) * inv).reshape(1, 1, C).astype(jnp.float32)

    out, pooled = pl.pallas_call(
        functools.partial(_dw_kernel, k=k, stride=stride, hout=Hout, wout=Wout),
        out_shape=(jax.ShapeDtypeStruct((N, Hout, Wout, C), x.dtype),
                   jax.ShapeDtypeStruct((N, 1, C), jnp.float32)),
        grid=(N,),
        in_specs=[
            pl.BlockSpec((1, Hp, Wp, C), lambda n: (n, 0, 0, 0)),
            pl.BlockSpec((k, k, C), lambda n: (0, 0, 0)),
            pl.BlockSpec((1, 1, C), lambda n: (0, 0, 0)),
            pl.BlockSpec((1, 1, C), lambda n: (0, 0, 0)),
        ],
        out_specs=(pl.BlockSpec((1, Hout, Wout, C), lambda n: (n, 0, 0, 0)),
                   pl.BlockSpec((1, 1, C), lambda n: (n, 0, 0))),
        compiler_params=pltpu.CompilerParams(
            dimension_semantics=("parallel",),
            vmem_limit_bytes=vmem_limit_bytes),
    )(xp, w_kkc, scale, bias)

    return out, pooled[:, 0, :]


# -----------------------------------------------------------------------------
# SE excitation: two tiny (N, C) dense layers + SiLU + sigmoid.  O(N*C^2/r) work
# (a few hundred flops here) -> left to XLA; the expensive broadcast multiply is
# fused into the projection kernel.
# -----------------------------------------------------------------------------
def se_excitation(pooled, w1, b1, w2, b2):
    cr, c = w1.shape[0], w1.shape[1]
    h = pooled @ w1.reshape(cr, c).T + b1
    h = h * jax.nn.sigmoid(h)                        # SiLU
    s = h @ w2.reshape(c, cr).T + b2
    return jax.nn.sigmoid(s)                         # (N, C)


# -----------------------------------------------------------------------------
# Full MBConv forward (eval mode).
# -----------------------------------------------------------------------------
def mbconv_forward(x_nchw, params, *, kernel_size=3, stride=1, expansion=1,
                   padding=1, eps=1e-5):
    N, in_chan, H, W = x_nchw.shape
    out_chan = params["project"]["weight"].shape[0]
    skip_conn = (in_chan == out_chan) and stride == 1

    # Single layout change at the block boundary (keep NHWC upstream to drop it).
    x = jnp.transpose(x_nchw, (0, 2, 3, 1))
    residual = x if skip_conn else None

    h = x
    if expansion > 1:
        p = params["expand"]
        h = pointwise_conv_bn_act(h, p["weight"], p["bias"], p["gamma"], p["beta"],
                                  p["mean"], p["var"], with_act=True, eps=eps)

    p = params["dw"]
    h, pooled = depthwise_conv_bn_silu(h, p["weight"], p["bias"], p["gamma"],
                                       p["beta"], p["mean"], p["var"],
                                       kernel_size=kernel_size, stride=stride,
                                       padding=padding, eps=eps)

    p = params["se"]
    se_scale = se_excitation(pooled, p["w1"], p["b1"], p["w2"], p["b2"])

    p = params["project"]
    out = pointwise_conv_bn_act(h, p["weight"], p["bias"], p["gamma"], p["beta"],
                                p["mean"], p["var"], with_act=False, eps=eps,
                                se_scale=se_scale, residual=residual)
    # TODO(synk): StochasticDepth only applies in training mode; eval mode is identity.
    return jnp.transpose(out, (0, 3, 1, 2))          # back to NCHW


# -----------------------------------------------------------------------------
# Pure-JAX reference (PyTorch eval-mode semantics, all f32).
# -----------------------------------------------------------------------------
def _conv_ref(x, w, b, stride, padding, groups=1):
    y = jax.lax.conv_general_dilated(
        x, w, window_strides=(stride, stride),
        padding=((padding, padding), (padding, padding)),
        dimension_numbers=("NCHW", "OIHW", "NCHW"),
        feature_group_count=groups)
    return y + b[None, :, None, None]


def _bn_ref(x, gamma, beta, mean, var, eps=1e-5):
    return ((x - mean[None, :, None, None]) / jnp.sqrt(var + eps)[None, :, None, None]
            * gamma[None, :, None, None] + beta[None, :, None, None])


def _silu(x):
    return x * jax.nn.sigmoid(x)


def _conv_bn_act_ref(x, p, *, stride, padding, groups=1, with_act=True, eps=1e-5):
    y = _conv_ref(x, p["weight"], p["bias"], stride, padding, groups)
    y = _bn_ref(y, p["gamma"], p["beta"], p["mean"], p["var"], eps)
    return _silu(y) if with_act else y


def _se_ref(x, p):
    s = jnp.mean(x, axis=(2, 3), keepdims=True)
    h = _conv_ref(s, p["w1"], p["b1"], 1, 0)
    h = _silu(h)
    h = _conv_ref(h, p["w2"], p["b2"], 1, 0)
    return x * jax.nn.sigmoid(h)


def mbconv_reference(x, params, *, kernel_size=3, stride=1, expansion=1,
                     padding=1, eps=1e-5):
    in_chan = x.shape[1]
    out_chan = params["project"]["weight"].shape[0]
    skip = (in_chan == out_chan) and stride == 1
    h = x
    if expansion > 1:
        h = _conv_bn_act_ref(h, params["expand"], stride=1, padding=0, eps=eps)
    h = _conv_bn_act_ref(h, params["dw"], stride=stride, padding=padding,
                         groups=h.shape[1], eps=eps)
    h = _se_ref(h, params["se"])
    h = _conv_bn_act_ref(h, params["project"], stride=1, padding=0,
                         with_act=False, eps=eps)
    if skip:
        h = h + x
    return h


# -----------------------------------------------------------------------------
# Deterministic parameter builders + test.
# -----------------------------------------------------------------------------
def _make_conv_params(key, cin, cout, k):
    k1, k2, k3, k4, k5, k6 = jax.random.split(key, 6)
    return dict(
        weight=jax.random.normal(k1, (cout, cin, k, k), jnp.float32) * 0.1,
        bias=jax.random.normal(k2, (cout,), jnp.float32) * 0.1,
        gamma=jax.random.uniform(k3, (cout,), jnp.float32, 0.5, 1.5),
        beta=jax.random.normal(k4, (cout,), jnp.float32) * 0.1,
        mean=jax.random.normal(k5, (cout,), jnp.float32) * 0.1,
        var=jax.random.uniform(k6, (cout,), jnp.float32, 0.5, 1.5),
    )


def _make_se_params(key, c, r=4):
    cr = max(1, int(c // r))
    k1, k2, k3, k4 = jax.random.split(key, 4)
    return dict(
        w1=jax.random.normal(k1, (cr, c, 1, 1), jnp.float32) * 0.1,
        b1=jax.random.normal(k2, (cr,), jnp.float32) * 0.1,
        w2=jax.random.normal(k3, (c, cr, 1, 1), jnp.float32) * 0.1,
        b2=jax.random.normal(k4, (c,), jnp.float32) * 0.1,
    )


if __name__ == "__main__":
    key = jax.random.PRNGKey(0)
    k_x, k_e, k_d, k_s, k_p, k_x2, k_d2, k_s2, k_p2 = jax.random.split(key, 9)

    N, in_chan, H, W = 2, 4, 16, 16
    out_chan, ksize, stride, padding = 4, 3, 1, 1

    # ---- MBConv, expansion > 1 (expand -> depthwise -> SE -> project, skip conn) ----
    expansion = 4
    exp_chan = in_chan * expansion
    x = jax.random.normal(k_x, (N, in_chan, H, W), jnp.float32)
    params = dict(
        expand=_make_conv_params(k_e, in_chan, exp_chan, 1),
        dw=_make_conv_params(k_d, 1, exp_chan, ksize),
        se=_make_se_params(k_s, exp_chan, 4),
        project=_make_conv_params(k_p, exp_chan, out_chan, 1),
    )
    fwd = jax.jit(functools.partial(mbconv_forward, kernel_size=ksize, stride=stride,
                                    expansion=expansion, padding=padding))
    out = jax.block_until_ready(fwd(x, params))
    ref = mbconv_reference(x, params, kernel_size=ksize, stride=stride,
                           expansion=expansion, padding=padding)
    assert out.shape == (N, out_chan, H, W), out.shape
    assert jnp.allclose(out, ref, atol=5e-2, rtol=5e-2), \
        float(jnp.max(jnp.abs(out - ref)))

    # ---- MBConv, expansion == 1 (depthwise -> SE -> project, skip conn) ----
    params1 = dict(
        dw=_make_conv_params(k_d2, 1, in_chan, ksize),
        se=_make_se_params(k_s2, in_chan, 4),
        project=_make_conv_params(k_p2, in_chan, out_chan, 1),
    )
    x1 = jax.random.normal(k_x2, (N, in_chan, H, W), jnp.float32)
    fwd1 = jax.jit(functools.partial(mbconv_forward, kernel_size=ksize, stride=stride,
                                     expansion=1, padding=padding))
    out1 = jax.block_until_ready(fwd1(x1, params1))
    ref1 = mbconv_reference(x1, params1, kernel_size=ksize, stride=stride,
                            expansion=1, padding=padding)
    assert out1.shape == (N, out_chan, H, W), out1.shape
    assert jnp.allclose(out1, ref1, atol=5e-2, rtol=5e-2), \
        float(jnp.max(jnp.abs(out1 - ref1)))

    print("KERNEL_OK")
</pallas_src>

<mosaic_0001>
module attributes {stable_mosaic.version = 11 : i64} {
  func.func @_pw_kernel(%arg0: i32, %arg1: i32, %arg2: i32, %arg3: memref<1x256x4xf32, #tpu.memory_space<vmem>>, %arg4: memref<4x128xbf16, #tpu.memory_space<vmem>>, %arg5: memref<1x128xf32, #tpu.memory_space<vmem>>, %arg6: memref<1x128xf32, #tpu.memory_space<vmem>>, %arg7: memref<1x256x128xf32, #tpu.memory_space<vmem>>) attributes {dimension_semantics = [#tpu.dimension_semantics<parallel>, #tpu.dimension_semantics<parallel>, #tpu.dimension_semantics<parallel>], iteration_bounds = array<i64: 2, 1, 1>, scalar_prefetch = 0 : i64, scratch_operands = 0 : i64, tpu.core_type = #tpu.core_type<tc>, window_params = [{transform_indices = @transform_0, window_bounds = array<i64: 1, 256, 4>}, {transform_indices = @transform_1, window_bounds = array<i64: 4, 128>}, {transform_indices = @transform_2, window_bounds = array<i64: 1, 128>}, {transform_indices = @transform_3, window_bounds = array<i64: 1, 128>}, {transform_indices = @transform_4, window_bounds = array<i64: 1, 256, 128>}]} {
    %c0 = arith.constant 0 : index
    %c0_0 = arith.constant 0 : index
    %c0_1 = arith.constant 0 : index
    %0 = vector.load %arg3[%c0, %c0_0, %c0_1] : memref<1x256x4xf32, #tpu.memory_space<vmem>>, vector<1x256x4xf32>
    %1 = vector.shape_cast %0 : vector<1x256x4xf32> to vector<256x4xf32>
    %2 = arith.truncf %1 : vector<256x4xf32> to vector<256x4xbf16>
    %c0_2 = arith.constant 0 : index
    %c0_3 = arith.constant 0 : index
    %3 = vector.load %arg4[%c0_2, %c0_3] : memref<4x128xbf16, #tpu.memory_space<vmem>>, vector<4x128xbf16>
    %cst = arith.constant dense<0.000000e+00> : vector<256x128xf32>
    %4 = tpu.matmul %2, %3, %cst {dimension_numbers = #tpu.dot_dimension_numbers<[1], [0], [0], [1], [0, 0, 1, 1], [], []>} : vector<256x4xbf16>, vector<4x128xbf16>, vector<256x128xf32> -> vector<256x128xf32>
    %c0_4 = arith.constant 0 : index
    %c0_5 = arith.constant 0 : index
    %5 = vector.load %arg5[%c0_4, %c0_5] : memref<1x128xf32, #tpu.memory_space<vmem>>, vector<1x128xf32>
    %6 = vector.broadcast %5 : vector<1x128xf32> to vector<256x128xf32>
    %7 = arith.mulf %4, %6 : vector<256x128xf32>
    %c0_6 = arith.constant 0 : index
    %c0_7 = arith.constant 0 : index
    %8 = vector.load %arg6[%c0_6, %c0_7] : memref<1x128xf32, #tpu.memory_space<vmem>>, vector<1x128xf32>
    %9 = vector.broadcast %8 : vector<1x128xf32> to vector<256x128xf32>
    %10 = arith.addf %7, %9 : vector<256x128xf32>
    %cst_8 = arith.constant 0.000000e+00 : f32
    %11 = vector.broadcast %cst_8 : f32 to vector<256x128xf32>
    %12 = arith.subf %11, %10 : vector<256x128xf32>
    %13 = math.exp %12 : vector<256x128xf32>
    %cst_9 = arith.constant 1.000000e+00 : f32
    %14 = vector.broadcast %cst_9 : f32 to vector<256x128xf32>
    %15 = arith.addf %14, %13 : vector<256x128xf32>
    %16 = tpu.reciprocal %15 {approx = true} : vector<256x128xf32> -> vector<256x128xf32>
    %17 = arith.mulf %10, %16 : vector<256x128xf32>
    %c0_10 = arith.constant 0 : index
    %c0_11 = arith.constant 0 : index
    %c0_12 = arith.constant 0 : index
    %18 = vector.load %arg7[%c0_10, %c0_11, %c0_12] : memref<1x256x128xf32, #tpu.memory_space<vmem>>, vector<1x256x128xf32>
    %19 = vector.shape_cast %18 : vector<1x256x128xf32> to vector<256x128xf32>
    %20 = vector.shape_cast %17 : vector<256x128xf32> to vector<1x256x128xf32>
    tpu.vector_store %arg7[%c0_10, %c0_11, %c0_12], %20 {strides = array<i32>} : memref<1x256x128xf32, #tpu.memory_space<vmem>>, vector<1x256x128xf32>,
    return
  }
  func.func @transform_0(%arg0: i32, %arg1: i32, %arg2: i32) -> (i32, i32, i32) {
    %c0_i32 = arith.constant 0 : i32
    %c0_i32_0 = arith.constant 0 : i32
    return %arg0, %arg1, %c0_i32 : i32, i32, i32
  }
  func.func @transform_1(%arg0: i32, %arg1: i32, %arg2: i32) -> (i32, i32) {
    %c0_i32 = arith.constant 0 : i32
    %c0_i32_0 = arith.constant 0 : i32
    return %c0_i32, %arg2 : i32, i32
  }
  func.func @transform_2(%arg0: i32, %arg1: i32, %arg2: i32) -> (i32, i32) {
    %c0_i32 = arith.constant 0 : i32
    %c0_i32_0 = arith.constant 0 : i32
    return %c0_i32, %arg2 : i32, i32
  }
  func.func @transform_3(%arg0: i32, %arg1: i32, %arg2: i32) -> (i32, i32) {
    %c0_i32 = arith.constant 0 : i32
    %c0_i32_0 = arith.constant 0 : i32
    return %c0_i32, %arg2 : i32, i32
  }
  func.func @transform_4(%arg0: i32, %arg1: i32, %arg2: i32) -> (i32, i32, i32) {
    %c0_i32 = arith.constant 0 : i32
    return %arg0, %arg1, %arg2 : i32, i32, i32
  }
}

module attributes {stable_mosaic.version = 11 : i64} {
  func.func @_dw_kernel(%arg0: i32, %arg1: memref<1x18x18x16xf32, #tpu.memory_space<vmem>>, %arg2: memref<3x3x16xf32, #tpu.memory_space<vmem>>, %arg3: memref<1x1x16xf32, #tpu.memory_space<vmem>>, %arg4: memref<1x1x16xf32, #tpu.memory_space<vmem>>, %arg5: memref<1x16x16x16xf32, #tpu.memory_space<vmem>>, %arg6: memref<1x1x16xf32, #tpu.memory_space<vmem>>) attributes {dimension_semantics = [#tpu.dimension_semantics<parallel>], iteration_bounds = array<i64: 2>, scalar_prefetch = 0 : i64, scratch_operands = 0 : i64, tpu.core_type = #tpu.core_type<tc>, window_params = [{transform_indices = @transform_0, window_bounds = array<i64: 1, 18, 18, 16>}, {pipeline_mode = #tpu.pipeline_mode<synchronous>, transform_indices = @transform_1, window_bounds = array<i64: 3, 3, 16>}, {pipeline_mode = #tpu.pipeline_mode<synchronous>, transform_indices = @transform_2, window_bounds = array<i64: 1, 1, 16>}, {pipeline_mode = #tpu.pipeline_mode<synchronous>, transform_indices = @transform_3, window_bounds = array<i64: 1, 1, 16>}, {transform_indices = @transform_4, window_bounds = array<i64: 1, 16, 16, 16>}, {transform_indices = @transform_5, window_bounds = array<i64: 1, 1, 16>}]} {
    %c0 = arith.constant 0 : index
    %c0_0 = arith.constant 0 : index
    %c0_1 = arith.constant 0 : index
    %c0_2 = arith.constant 0 : index
    %0 = vector.load %arg1[%c0, %c0_0, %c0_1, %c0_2] : memref<1x18x18x16xf32, #tpu.memory_space<vmem>>, vector<1x18x18x16xf32>
    %1 = vector.shape_cast %0 : vector<1x18x18x16xf32> to vector<18x18x16xf32>
    %c0_3 = arith.constant 0 : index
    %c0_4 = arith.constant 0 : index
    %c0_5 = arith.constant 0 : index
    %2 = vector.load %arg2[%c0_3, %c0_4, %c0_5] : memref<3x3x16xf32, #tpu.memory_space<vmem>>, vector<3x3x16xf32>
    %cst = arith.constant 0.000000e+00 : f32
    %3 = vector.broadcast %cst : f32 to vector<16x16x16xf32>
    %4 = vector.extract_strided_slice %1 {offsets = [0, 0, 0], sizes = [16, 16, 16], strides = [1, 1, 1]} : vector<18x18x16xf32> to vector<16x16x16xf32>
    %5 = vector.extract_strided_slice %2 {offsets = [0, 0, 0], sizes = [1, 1, 16], strides = [1, 1, 1]} : vector<3x3x16xf32> to vector<1x1x16xf32>
    %6 = vector.broadcast %5 : vector<1x1x16xf32> to vector<16x16x16xf32>
    %7 = arith.mulf %4, %6 : vector<16x16x16xf32>
    %8 = arith.addf %3, %7 : vector<16x16x16xf32>
    %9 = vector.extract_strided_slice %1 {offsets = [0, 1, 0], sizes = [16, 16, 16], strides = [1, 1, 1]} : vector<18x18x16xf32> to vector<16x16x16xf32>
    %10 = vector.extract_strided_slice %2 {offsets = [0, 1, 0], sizes = [1, 1, 16], strides = [1, 1, 1]} : vector<3x3x16xf32> to vector<1x1x16xf32>
    %11 = vector.broadcast %10 : vector<1x1x16xf32> to vector<16x16x16xf32>
    %12 = arith.mulf %9, %11 : vector<16x16x16xf32>
    %13 = arith.addf %8, %12 : vector<16x16x16xf32>
    %14 = vector.extract_strided_slice %1 {offsets = [0, 2, 0], sizes = [16, 16, 16], strides = [1, 1, 1]} : vector<18x18x16xf32> to vector<16x16x16xf32>
    %15 = vector.extract_strided_slice %2 {offsets = [0, 2, 0], sizes = [1, 1, 16], strides = [1, 1, 1]} : vector<3x3x16xf32> to vector<1x1x16xf32>
    %16 = vector.broadcast %15 : vector<1x1x16xf32> to vector<16x16x16xf32>
    %17 = arith.mulf %14, %16 : vector<16x16x16xf32>
    %18 = arith.addf %13, %17 : vector<16x16x16xf32>
    %19 = vector.extract_strided_slice %1 {offsets = [1, 0, 0], sizes = [16, 16, 16], strides = [1, 1, 1]} : vector<18x18x16xf32> to vector<16x16x16xf32>
    %20 = vector.extract_strided_slice %2 {offsets = [1, 0, 0], sizes = [1, 1, 16], strides = [1, 1, 1]} : vector<3x3x16xf32> to vector<1x1x16xf32>
    %21 = vector.broadcast %20 : vector<1x1x16xf32> to vector<16x16x16xf32>
    %22 = arith.mulf %19, %21 : vector<16x16x16xf32>
    %23 = arith.addf %18, %22 : vector<16x16x16xf32>
    %24 = vector.extract_strided_slice %1 {offsets = [1, 1, 0], sizes = [16, 16, 16], strides = [1, 1, 1]} : vector<18x18x16xf32> to vector<16x16x16xf32>
    %25 = vector.extract_strided_slice %2 {offsets = [1, 1, 0], sizes = [1, 1, 16], strides = [1, 1, 1]} : vector<3x3x16xf32> to vector<1x1x16xf32>
    %26 = vector.broadcast %25 : vector<1x1x16xf32> to vector<16x16x16xf32>
    %27 = arith.mulf %24, %26 : vector<16x16x16xf32>
    %28 = arith.addf %23, %27 : vector<16x16x16xf32>
    %29 = vector.extract_strided_slice %1 {offsets = [1, 2, 0], sizes = [16, 16, 16], strides = [1, 1, 1]} : vector<18x18x16xf32> to vector<16x16x16xf32>
    %30 = vector.extract_strided_slice %2 {offsets = [1, 2, 0], sizes = [1, 1, 16], strides = [1, 1, 1]} : vector<3x3x16xf32> to vector<1x1x16xf32>
    %31 = vector.broadcast %30 : vector<1x1x16xf32> to vector<16x16x16xf32>
    %32 = arith.mulf %29, %31 : vector<16x16x16xf32>
    %33 = arith.addf %28, %32 : vector<16x16x16xf32>
    %34 = vector.extract_strided_slice %1 {offsets = [2, 0, 0], sizes = [16, 16, 16], strides = [1, 1, 1]} : vector<18x18x16xf32> to vector<16x16x16xf32>
    %35 = vector.extract_strided_slice %2 {offsets = [2, 0, 0], sizes = [1, 1, 16], strides = [1, 1, 1]} : vector<3x3x16xf32> to vector<1x1x16xf32>
    %36 = vector.broadcast %35 : vector<1x1x16xf32> to vector<16x16x16xf32>
    %37 = arith.mulf %34, %36 : vector<16x16x16xf32>
    %38 = arith.addf %33, %37 : vector<16x16x16xf32>
    %39 = vector.extract_strided_slice %1 {offsets = [2, 1, 0], sizes = [16, 16, 16], strides = [1, 1, 1]} : vector<18x18x16xf32> to vector<16x16x16xf32>
    %40 = vector.extract_strided_slice %2 {offsets = [2, 1, 0], sizes = [1, 1, 16], strides = [1, 1, 1]} : vector<3x3x16xf32> to vector<1x1x16xf32>
    %41 = vector.broadcast %40 : vector<1x1x16xf32> to vector<16x16x16xf32>
    %42 = arith.mulf %39, %41 : vector<16x16x16xf32>
    %43 = arith.addf %38, %42 : vector<16x16x16xf32>
    %44 = vector.extract_strided_slice %1 {offsets = [2, 2, 0], sizes = [16, 16, 16], strides = [1, 1, 1]} : vector<18x18x16xf32> to vector<16x16x16xf32>
    %45 = vector.extract_strided_slice %2 {offsets = [2, 2, 0], sizes = [1, 1, 16], strides = [1, 1, 1]} : vector<3x3x16xf32> to vector<1x1x16xf32>
    %46 = vector.broadcast %45 : vector<1x1x16xf32> to vector<16x16x16xf32>
    %47 = arith.mulf %44, %46 : vector<16x16x16xf32>
    %48 = arith.addf %43, %47 : vector<16x16x16xf32>
    %c0_6 = arith.constant 0 : index
    %c0_7 = arith.constant 0 : index
    %c0_8 = arith.constant 0 : index
    %49 = vector.load %arg3[%c0_6, %c0_7, %c0_8] : memref<1x1x16xf32, #tpu.memory_space<vmem>>, vector<1x1x16xf32>
    %50 = vector.broadcast %49 : vector<1x1x16xf32> to vector<16x16x16xf32>
    %51 = arith.mulf %48, %50 : vector<16x16x16xf32>
    %c0_9 = arith.constant 0 : index
    %c0_10 = arith.constant 0 : index
    %c0_11 = arith.constant 0 : index
    %52 = vector.load %arg4[%c0_9, %c0_10, %c0_11] : memref<1x1x16xf32, #tpu.memory_space<vmem>>, vector<1x1x16xf32>
    %53 = vector.broadcast %52 : vector<1x1x16xf32> to vector<16x16x16xf32>
    %54 = arith.addf %51, %53 : vector<16x16x16xf32>
    %cst_12 = arith.constant 0.000000e+00 : f32
    %55 = vector.broadcast %cst_12 : f32 to vector<16x16x16xf32>
    %56 = arith.subf %55, %54 : vector<16x16x16xf32>
    %57 = math.exp %56 : vector<16x16x16xf32>
    %cst_13 = arith.constant 1.000000e+00 : f32
    %58 = vector.broadcast %cst_13 : f32 to vector<16x16x16xf32>
    %59 = arith.addf %58, %57 : vector<16x16x16xf32>
    %60 = tpu.reciprocal %59 {approx = true} : vector<16x16x16xf32> -> vector<16x16x16xf32>
    %61 = arith.mulf %54, %60 : vector<16x16x16xf32>
    %c0_14 = arith.constant 0 : index
    %c0_15 = arith.constant 0 : index
    %c0_16 = arith.constant 0 : index
    %c0_17 = arith.constant 0 : index
    %62 = vector.load %arg5[%c0_14, %c0_15, %c0_16, %c0_17] : memref<1x16x16x16xf32, #tpu.memory_space<vmem>>, vector<1x16x16x16xf32>
    %63 = vector.shape_cast %62 : vector<1x16x16x16xf32> to vector<16x16x16xf32>
    %64 = vector.shape_cast %61 : vector<16x16x16xf32> to vector<1x16x16x16xf32>
    tpu.vector_store %arg5[%c0_14, %c0_15, %c0_16, %c0_17], %64 {strides = array<i32>} : memref<1x16x16x16xf32, #tpu.memory_space<vmem>>, vector<1x16x16x16xf32>,
    %cst_18 = arith.constant dense<0.000000e+00> : vector<16xf32>
    %65 = vector.multi_reduction <add>, %61, %cst_18 [0, 1] : vector<16x16x16xf32> to vector<16xf32>
    %66 = vector.shape_cast %65 : vector<16xf32> to vector<1x1x16xf32>
    %cst_19 = arith.constant 2.560000e+02 : f32
    %67 = vector.broadcast %cst_19 : f32 to vector<1x1x16xf32>
    %68 = arith.divf %66, %67 : vector<1x1x16xf32>
    %c0_20 = arith.constant 0 : index
    %c0_21 = arith.constant 0 : index
    %c0_22 = arith.constant 0 : index
    %69 = vector.load %arg6[%c0_20, %c0_21, %c0_22] : memref<1x1x16xf32, #tpu.memory_space<vmem>>, vector<1x1x16xf32>
    tpu.vector_store %arg6[%c0_20, %c0_21, %c0_22], %68 {strides = array<i32>} : memref<1x1x16xf32, #tpu.memory_space<vmem>>, vector<1x1x16xf32>,
    return
  }
  func.func @transform_0(%arg0: i32) -> (i32, i32, i32, i32) {
    %c0_i32 = arith.constant 0 : i32
    %c0_i32_0 = arith.constant 0 : i32
    %c0_i32_1 = arith.constant 0 : i32
    %c0_i32_2 = arith.constant 0 : i32
    return %arg0, %c0_i32, %c0_i32_0, %c0_i32_1 : i32, i32, i32, i32
  }
  func.func @transform_1(%arg0: i32) -> (i32, i32, i32) {
    %c0_i32 = arith.constant 0 : i32
    %c0_i32_0 = arith.constant 0 : i32
    %c0_i32_1 = arith.constant 0 : i32
    %c0_i32_2 = arith.constant 0 : i32
    return %c0_i32, %c0_i32_0, %c0_i32_1 : i32, i32, i32
  }
  func.func @transform_2(%arg0: i32) -> (i32, i32, i32) {
    %c0_i32 = arith.constant 0 : i32
    %c0_i32_0 = arith.constant 0 : i32
    %c0_i32_1 = arith.constant 0 : i32
    %c0_i32_2 = arith.constant 0 : i32
    return %c0_i32, %c0_i32_0, %c0_i32_1 : i32, i32, i32
  }
  func.func @transform_3(%arg0: i32) -> (i32, i32, i32) {
    %c0_i32 = arith.constant 0 : i32
    %c0_i32_0 = arith.constant 0 : i32
    %c0_i32_1 = arith.constant 0 : i32
    %c0_i32_2 = arith.constant 0 : i32
    return %c0_i32, %c0_i32_0, %c0_i32_1 : i32, i32, i32
  }
  func.func @transform_4(%arg0: i32) -> (i32, i32, i32, i32) {
    %c0_i32 = arith.constant 0 : i32
    %c0_i32_0 = arith.constant 0 : i32
    %c0_i32_1 = arith.constant 0 : i32
    %c0_i32_2 = arith.constant 0 : i32
    return %arg0, %c0_i32, %c0_i32_0, %c0_i32_1 : i32, i32, i32, i32
  }
  func.func @transform_5(%arg0: i32) -> (i32, i32, i32) {
    %c0_i32 = arith.constant 0 : i32
    %c0_i32_0 = arith.constant 0 : i32
    %c0_i32_1 = arith.constant 0 : i32
    return %arg0, %c0_i32, %c0_i32_0 : i32, i32, i32
  }
}

module attributes {stable_mosaic.version = 11 : i64} {
  func.func @_pw_kernel(%arg0: i32, %arg1: i32, %arg2: i32, %arg3: memref<1x256x16xf32, #tpu.memory_space<vmem>>, %arg4: memref<16x128xbf16, #tpu.memory_space<vmem>>, %arg5: memref<1x128xf32, #tpu.memory_space<vmem>>, %arg6: memref<1x128xf32, #tpu.memory_space<vmem>>, %arg7: memref<1x1x16xf32, #tpu.memory_space<vmem>>, %arg8: memref<1x256x128xf32, #tpu.memory_space<vmem>>, %arg9: memref<1x256x128xf32, #tpu.memory_space<vmem>>) attributes {dimension_semantics = [#tpu.dimension_semantics<parallel>, #tpu.dimension_semantics<parallel>, #tpu.dimension_semantics<parallel>], iteration_bounds = array<i64: 2, 1, 1>, scalar_prefetch = 0 : i64, scratch_operands = 0 : i64, tpu.core_type = #tpu.core_type<tc>, window_params = [{transform_indices = @transform_0, window_bounds = array<i64: 1, 256, 16>}, {transform_indices = @transform_1, window_bounds = array<i64: 16, 128>}, {transform_indices = @transform_2, window_bounds = array<i64: 1, 128>}, {transform_indices = @transform_3, window_bounds = array<i64: 1, 128>}, {transform_indices = @transform_4, window_bounds = array<i64: 1, 1, 16>}, {transform_indices = @transform_5, window_bounds = array<i64: 1, 256, 128>}, {transform_indices = @transform_6, window_bounds = array<i64: 1, 256, 128>}]} {
    %c0 = arith.constant 0 : index
    %c0_0 = arith.constant 0 : index
    %c0_1 = arith.constant 0 : index
    %0 = vector.load %arg3[%c0, %c0_0, %c0_1] : memref<1x256x16xf32, #tpu.memory_space<vmem>>, vector<1x256x16xf32>
    %1 = vector.shape_cast %0 : vector<1x256x16xf32> to vector<256x16xf32>
    %c0_2 = arith.constant 0 : index
    %c0_3 = arith.constant 0 : index
    %c0_4 = arith.constant 0 : index
    %2 = vector.load %arg7[%c0_2, %c0_3, %c0_4] : memref<1x1x16xf32, #tpu.memory_space<vmem>>, vector<1x1x16xf32>
    %3 = vector.shape_cast %2 : vector<1x1x16xf32> to vector<1x16xf32>
    %4 = vector.broadcast %3 : vector<1x16xf32> to vector<256x16xf32>
    %5 = arith.mulf %1, %4 : vector<256x16xf32>
    %6 = arith.truncf %5 : vector<256x16xf32> to vector<256x16xbf16>
    %c0_5 = arith.constant 0 : index
    %c0_6 = arith.constant 0 : index
    %7 = vector.load %arg4[%c0_5, %c0_6] : memref<16x128xbf16, #tpu.memory_space<vmem>>, vector<16x128xbf16>
    %cst = arith.constant dense<0.000000e+00> : vector<256x128xf32>
    %8 = tpu.matmul %6, %7, %cst {dimension_numbers = #tpu.dot_dimension_numbers<[1], [0], [0], [1], [0, 0, 1, 1], [], []>} : vector<256x16xbf16>, vector<16x128xbf16>, vector<256x128xf32> -> vector<256x128xf32>
    %c0_7 = arith.constant 0 : index
    %c0_8 = arith.constant 0 : index
    %9 = vector.load %arg5[%c0_7, %c0_8] : memref<1x128xf32, #tpu.memory_space<vmem>>, vector<1x128xf32>
    %10 = vector.broadcast %9 : vector<1x128xf32> to vector<256x128xf32>
    %11 = arith.mulf %8, %10 : vector<256x128xf32>
    %c0_9 = arith.constant 0 : index
    %c0_10 = arith.constant 0 : index
    %12 = vector.load %arg6[%c0_9, %c0_10] : memref<1x128xf32, #tpu.memory_space<vmem>>, vector<1x128xf32>
    %13 = vector.broadcast %12 : vector<1x128xf32> to vector<256x128xf32>
    %14 = arith.addf %11, %13 : vector<256x128xf32>
    %c0_11 = arith.constant 0 : index
    %c0_12 = arith.constant 0 : index
    %c0_13 = arith.constant 0 : index
    %15 = vector.load %arg8[%c0_11, %c0_12, %c0_13] : memref<1x256x128xf32, #tpu.memory_space<vmem>>, vector<1x256x128xf32>
    %16 = vector.shape_cast %15 : vector<1x256x128xf32> to vector<256x128xf32>
    %17 = arith.addf %14, %16 : vector<256x128xf32>
    %c0_14 = arith.constant 0 : index
    %c0_15 = arith.constant 0 : index
    %c0_16 = arith.constant 0 : index
    %18 = vector.load %arg9[%c0_14, %c0_15, %c0_16] : memref<1x256x128xf32, #tpu.memory_space<vmem>>, vector<1x256x128xf32>
    %19 = vector.shape_cast %18 : vector<1x256x128xf32> to vector<256x128xf32>
    %20 = vector.shape_cast %17 : vector<256x128xf32> to vector<1x256x128xf32>
    tpu.vector_store %arg9[%c0_14, %c0_15, %c0_16], %20 {strides = array<i32>} : memref<1x256x128xf32, #tpu.memory_space<vmem>>, vector<1x256x128xf32>,
    return
  }
  func.func @transform_0(%arg0: i32, %arg1: i32, %arg2: i32) -> (i32, i32, i32) {
    %c0_i32 = arith.constant 0 : i32
    %c0_i32_0 = arith.constant 0 : i32
    return %arg0, %arg1, %c0_i32 : i32, i32, i32
  }
  func.func @transform_1(%arg0: i32, %arg1: i32, %arg2: i32) -> (i32, i32) {
    %c0_i32 = arith.constant 0 : i32
    %c0_i32_0 = arith.constant 0 : i32
    return %c0_i32, %arg2 : i32, i32
  }
  func.func @transform_2(%arg0: i32, %arg1: i32, %arg2: i32) -> (i32, i32) {
    %c0_i32 = arith.constant 0 : i32
    %c0_i32_0 = arith.constant 0 : i32
    return %c0_i32, %arg2 : i32, i32
  }
  func.func @transform_3(%arg0: i32, %arg1: i32, %arg2: i32) -> (i32, i32) {
    %c0_i32 = arith.constant 0 : i32
    %c0_i32_0 = arith.constant 0 : i32
    return %c0_i32, %arg2 : i32, i32
  }
  func.func @transform_4(%arg0: i32, %arg1: i32, %arg2: i32) -> (i32, i32, i32) {
    %c0_i32 = arith.constant 0 : i32
    %c0_i32_0 = arith.constant 0 : i32
    %c0_i32_1 = arith.constant 0 : i32
    return %arg0, %c0_i32, %c0_i32_0 : i32, i32, i32
  }
  func.func @transform_5(%arg0: i32, %arg1: i32, %arg2: i32) -> (i32, i32, i32) {
    %c0_i32 = arith.constant 0 : i32
    return %arg0, %arg1, %arg2 : i32, i32, i32
  }
  func.func @transform_6(%arg0: i32, %arg1: i32, %arg2: i32) -> (i32, i32, i32) {
    %c0_i32 = arith.constant 0 : i32
    return %arg0, %arg1, %arg2 : i32, i32, i32
  }
}

</mosaic_0001>

<bundles_post_ra>
// kernel: mbconv_forward.3
= control target key start
LH: loop header
LB: loop body
LE: loop exit
PB: predicated region body
PF: predicated region fallthrough
CT: control target
= control target key end

     0   :  { %s1292_s15 = smov 0   ;;  %s1294_s16 = smov 0   ;;  %s1654_s0 = inlined_call_operand.vmem [shape: f32[2,256,4], index: 0, kind: input, shape index: {}]   ;;  %s1655_s1 = inlined_call_operand.vmem [shape: bf16[4,128], index: 1, kind: input, shape index: {}]   ;;  %s1656_s2 = inlined_call_operand.vmem [shape: f32[1,128], index: 2, kind: input, shape index: {}]   ;;  %s1657_s3 = inlined_call_operand.vmem [shape: f32[1,128], index: 3, kind: input, shape index: {}]   ;;  %s1658_s4 = inlined_call_operand.vmem [shape: f32[2,256,128], index: 4, kind: output, shape index: {}]  }
   0x1   :  { %s1296_s17 = smov 0  }
   0x2 LB: > { %s33_s18 = sadd.s32 1, %s1261_s16  ;;  %p1009_p0 = scmp.ge.s32.totalorder %s1265_s17, 1  ;;  %s1265_s17 = sphi %s1296_s17, %s14_s17   ;;  %s1261_s16 = sphi %s1294_s16, %s1660_s16   ;;  %s1257_s15 = sphi %s1292_s15, %s1659_s15  }
   0x3   : > { %p35_p1 = scmp.ge.s32.totalorder %s33_s18, 2  ;;  %p217_p2 = scmp.lt.s32.totalorder %s1265_s17, 3 }
   0x5   : > { %s1662_s18 = smov (%p35_p1, %s33_s18), 0  ;;  %p218_p3 = pnand %p1009_p0, %p217_p2 }
   0x6   : > { %v346_v0 = vld [vmem:[%s1655_s1] sm:$0x3] (!%p218_p3)  ;;  %vm396_vm0 = vcmask (!%p218_p3), 1041408   ;;  %p265_p4 = scmp.lt.s32.totalorder (!%p218_p3), %s1257_s15, 1  ;;  %vm347_vm1 = vcmask (!%p218_p3), 31744  }
   0x7   : > { %221 = sbr.rel (%p218_p3) target bundleno = 326 (0x146), region = 36  ;;  %1089 = vmatprep.subr.msk.bf16.mxu0 (!%p218_p3), %vm396_vm0, %v346_v0  ;;  %1090 = vmatprep.subr.msk.bf16.mxu1 (!%p218_p3), %vm396_vm0, %v346_v0  ;;  %v398_v1 = vsel (!%p218_p3), %vm396_vm0, %v346_v0, 0  ;;  %v1374_v50 = vld [vmem:[%s1656_s2] ss:$0 sm:$0xff] (!%p218_p3) }
   0x8   : > { %1054 = vmatpush3.bf16.msra.mxu0 (!%p218_p3), %v398_v1  ;;  %1088 = vmatpush3.bf16.msra.mxu1 (!%p218_p3), %v398_v1  ;;  %v1379_v52 = vld [vmem:[%s1657_s3] ss:$0 sm:$0xff] (!%p218_p3) }
   0xe   : > { %s1664_s15 = smov (!%p265_p4, %s1257_s15), 1 }
   0xf   : > { %s1034_s21 = sshll.u32 %s1664_s15, 8 }
  0x10   : > { %s1321_s24 = scalar_lea.vmem %s1654_s0, %s1034_s21  ;;  %s1514_s5 = scalar_lea.vmem %s1658_s4, %s1034_s21 }
  0x11   : > { %v298_v2 = vld [vmem:[%s1321_s24] sm:$0xff]  ;;  %v299_v3 = vld [vmem:[%s1321_s24 + $0x8] sm:$0xff]  ;;  %v300_v7 = vld [vmem:[%s1321_s24 + $0x10] sm:$0xff] }
  0x12   : > { %v314_v4 = vld [vmem:[%s1321_s24 + $0x80] sm:$0xff]  ;;  %v330_v5 = vpack.c.bf16 %v299_v3, %v298_v2  ;;  %v315_v6 = vld [vmem:[%s1321_s24 + $0x88] sm:$0xff]  ;;  %v301_v8 = vld [vmem:[%s1321_s24 + $0x18] sm:$0xff] }
  0x13   : > { %v338_v9 = vpack.c.bf16 %v315_v6, %v314_v4  ;;  %v331_v10 = vpack.c.bf16 %v301_v8, %v300_v7  ;;  %v316_v11 = vld [vmem:[%s1321_s24 + $0x90] sm:$0xff]  ;;  %v317_v12 = vld [vmem:[%s1321_s24 + $0x98] sm:$0xff]  ;;  %v302_v13 = vld [vmem:[%s1321_s24 + $0x20] sm:$0xff] }
  0x14   : > { %1055 = vmatprep.mubr.msk.bf16.mxu0 %vm347_vm1, %v330_v5  ;;  %v339_v14 = vpack.c.bf16 %v317_v12, %v316_v11  ;;  %v303_v15 = vld [vmem:[%s1321_s24 + $0x28] sm:$0xff]  ;;  %v318_v16 = vld [vmem:[%s1321_s24 + $0xa0] sm:$0xff]  ;;  %v304_v20 = vld [vmem:[%s1321_s24 + $0x30] sm:$0xff] }
  0x15   : > { %v319_v17 = vld [vmem:[%s1321_s24 + $0xa8] sm:$0xff]  ;;  %1071 = vmatprep.mubr.msk.bf16.mxu1 %vm347_vm1, %v338_v9  ;;  %1056 = vmatmul.mubr.msk.bf16.vlgmr.msra.gmra.mrb[0].mxu0 %vm347_vm1, %v331_v10  ;;  %v332_v18 = vpack.c.bf16 %v303_v15, %v302_v13  ;;  %v305_v21 = vld [vmem:[%s1321_s24 + $0x38] sm:$0xff]  ;;  %v320_v22 = vld [vmem:[%s1321_s24 + $0xb0] sm:$0xff] }
  0x16   : > { %v340_v19 = vpack.c.bf16 %v319_v17, %v318_v16  ;;  %1072 = vmatmul.mubr.msk.bf16.vlgmr.msra.gmra.mrb[0].mxu1 %vm347_vm1, %v339_v14  ;;  %v321_v23 = vld [vmem:[%s1321_s24 + $0xb8] sm:$0xff]  ;;  %v306_v24 = vld [vmem:[%s1321_s24 + $0x40] sm:$0xff]  ;;  %v307_v25 = vld [vmem:[%s1321_s24 + $0x48] sm:$0xff]  ;;  %v333_v28 = vpack.c.bf16 %v305_v21, %v304_v20 }
  0x17   : > { %1059 = vmatprep.mubr.msk.bf16.mxu0 %vm347_vm1, %v332_v18  ;;  %v322_v26 = vld [vmem:[%s1321_s24 + $0xc0] sm:$0xff]  ;;  %v323_v27 = vld [vmem:[%s1321_s24 + $0xc8] sm:$0xff]  ;;  %v341_v29 = vpack.c.bf16 %v321_v23, %v320_v22  ;;  %v334_v30 = vpack.c.bf16 %v307_v25, %v306_v24  ;;  %v308_v32 = vld [vmem:[%s1321_s24 + $0x50] sm:$0xff] }
  0x18   : > { %1075 = vmatprep.mubr.msk.bf16.mxu1 %vm347_vm1, %v340_v19  ;;  %v342_v31 = vpack.c.bf16 %v323_v27, %v322_v26  ;;  %v309_v33 = vld [vmem:[%s1321_s24 + $0x58] sm:$0xff]  ;;  %v324_v34 = vld [vmem:[%s1321_s24 + $0xd0] sm:$0xff]  ;;  %v310_v36 = vld [vmem:[%s1321_s24 + $0x60] sm:$0xff] }
  0x19   : > { %v325_v35 = vld [vmem:[%s1321_s24 + $0xd8] sm:$0xff]  ;;  %v311_v37 = vld [vmem:[%s1321_s24 + $0x68] sm:$0xff]  ;;  %v326_v38 = vld [vmem:[%s1321_s24 + $0xe0] sm:$0xff]  ;;  %v335_v40 = vpack.c.bf16 %v309_v33, %v308_v32 }
  0x1a   : > { %v327_v39 = vld [vmem:[%s1321_s24 + $0xe8] sm:$0xff]  ;;  %v343_v41 = vpack.c.bf16 %v325_v35, %v324_v34  ;;  %v336_v42 = vpack.c.bf16 %v311_v37, %v310_v36  ;;  %v312_v44 = vld [vmem:[%s1321_s24 + $0x70] sm:$0xff]  ;;  %v313_v45 = vld [vmem:[%s1321_s24 + $0x78] sm:$0xff] }
  0x1b   : > { %v344_v43 = vpack.c.bf16 %v327_v39, %v326_v38  ;;  %v328_v46 = vld [vmem:[%s1321_s24 + $0xf0] sm:$0xff]  ;;  %v329_v47 = vld [vmem:[%s1321_s24 + $0xf8] sm:$0xff]  ;;  %v337_v48 = vpack.c.bf16 %v313_v45, %v312_v44 }
  0x1c   : > { %v345_v49 = vpack.c.bf16 %v329_v47, %v328_v46 }
  0x1d   : > { %1060 = vmatmul.mubr.msk.bf16.gmra.mrb[4].mxu0 %vm347_vm1, %v333_v28 }
  0x1e   : > { %1076 = vmatmul.mubr.msk.bf16.gmra.mrb[4].mxu1 %vm347_vm1, %v341_v29  ;;  %1063 = vmatprep.mubr.msk.bf16.mxu0 %vm347_vm1, %v334_v30 }
  0x1f   : > { %1079 = vmatprep.mubr.msk.bf16.mxu1 %vm347_vm1, %v342_v31 }
  0x25   : > { %1064 = vmatmul.mubr.msk.bf16.gmra.mrb[8].mxu0 %vm347_vm1, %v335_v40 }
  0x26   : > { %1080 = vmatmul.mubr.msk.bf16.gmra.mrb[8].mxu1 %vm347_vm1, %v343_v41  ;;  %1067 = vmatprep.mubr.msk.bf16.mxu0 %vm347_vm1, %v336_v42 }
  0x27   : > { %1083 = vmatprep.mubr.msk.bf16.mxu1 %vm347_vm1, %v344_v43 }
  0x2d   : > { %1068 = vmatmul.mubr.msk.bf16.gmra.mrb[12].mxu0 %vm347_vm1, %v337_v48 }
  0x2e   : > { %1084 = vmatmul.mubr.msk.bf16.gmra.mrb[12].mxu1 %vm347_vm1, %v345_v49 }
  0xe8   : > { %v1057_v51 = vpop.f32.mrb[0].mxu0 }
  0xe9   : > { %v570_v53 = vmul.f32 %v1057_v51, %v1374_v50  ;;  %v1073_v54 = vpop.f32.mrb[0].mxu1  ;;  %v434_v55 = vpop.f32.mrb[1].mxu0 }
  0xea   : > { %v586_v56 = vmul.f32 %v1073_v54, %v1374_v50  ;;  %v568_v57 = vmul.f32 %v1374_v50, %v434_v55  ;;  %v498_v58 = vpop.f32.mrb[1].mxu1  ;;  %v1058_v59 = vpop.f32.mrb[2].mxu0 }
  0xeb   : > { %v1385_v60 = vadd.f32 %v1379_v52, %v570_v53  ;;  %v584_v61 = vmul.f32 %v1374_v50, %v498_v58  ;;  %v571_v62 = vmul.f32 %v1058_v59, %v1374_v50  ;;  %v1074_v63 = vpop.f32.mrb[2].mxu1  ;;  %v437_v0 = vpop.f32.mrb[3].mxu0 }
  0xec   : > { %v1390_v1 = vadd.f32 %v1379_v52, %v586_v56  ;;  %v1393_v2 = vadd.f32 %v1379_v52, %v568_v57  ;;  %v587_v3 = vmul.f32 %v1074_v63, %v1374_v50  ;;  %v569_v4 = vmul.f32 %v1374_v50, %v437_v0  ;;  %v501_v5 = vpop.f32.mrb[3].mxu1 }
  0xed   : > { %v641_v6 = vsub.f32 0.0, %v1385_v60  ;;  %v1399_v7 = vadd.f32 %v1379_v52, %v584_v61  ;;  %v1402_v8 = vadd.f32 %v1379_v52, %v571_v62  ;;  %v585_v9 = vmul.f32 %v1374_v50, %v501_v5 }
  0xee   : > { %v657_v10 = vsub.f32 0.0, %v1390_v1  ;;  %v639_v11 = vsub.f32 0.0, %v1393_v2  ;;  %v1408_v12 = vadd.f32 %v1379_v52, %v587_v3  ;;  %v1411_v13 = vadd.f32 %v1379_v52, %v569_v4 }
  0xef   : > { %v675_v14 = vmul.f32 1.442695, %v641_v6  ;;  %v655_v15 = vsub.f32 0.0, %v1399_v7  ;;  %v642_v16 = vsub.f32 0.0, %v1402_v8  ;;  %v1416_v17 = vadd.f32 %v1379_v52, %v585_v9 }
  0xf0   : > { %v707_v18 = vmul.f32 1.442695, %v657_v10  ;;  %v671_v19 = vmul.f32 1.442695, %v639_v11  ;;  %v658_v20 = vsub.f32 0.0, %v1408_v12  ;;  %v640_v21 = vsub.f32 0.0, %v1411_v13 }
  0xf1   : > { %1115 = vpow2.f32 %v675_v14  ;;  %v703_v22 = vmul.f32 1.442695, %v655_v15  ;;  %v677_v23 = vmul.f32 1.442695, %v642_v16  ;;  %v656_v24 = vsub.f32 0.0, %v1416_v17  ;;  %v1061_v25 = vpop.f32.mrb[4].mxu0 }
  0xf2   : > { %1117 = vpow2.f32 %v707_v18  ;;  %v709_v26 = vmul.f32 1.442695, %v658_v20  ;;  %v673_v27 = vmul.f32 1.442695, %v640_v21  ;;  %v574_v28 = vmul.f32 %v1061_v25, %v1374_v50  ;;  %v1077_v29 = vpop.f32.mrb[4].mxu1  ;;  %v450_v30 = vpop.f32.mrb[5].mxu0 }
  0xf3   : > { %1119 = vpow2.f32 %v671_v19  ;;  %v705_v31 = vmul.f32 1.442695, %v656_v24  ;;  %v590_v32 = vmul.f32 %v1077_v29, %v1374_v50  ;;  %v572_v33 = vmul.f32 %v1374_v50, %v450_v30  ;;  %v514_v34 = vpop.f32.mrb[5].mxu1  ;;  %v1062_v35 = vpop.f32.mrb[6].mxu0 }
  0xf4   : > { %1121 = vpow2.f32 %v703_v22  ;;  %v1425_v36 = vadd.f32 %v1379_v52, %v574_v28  ;;  %v588_v37 = vmul.f32 %v1374_v50, %v514_v34  ;;  %v575_v38 = vmul.f32 %v1062_v35, %v1374_v50  ;;  %v1078_v39 = vpop.f32.mrb[6].mxu1  ;;  %v453_v40 = vpop.f32.mrb[7].mxu0 }
  0xf5   : > { %1123 = vpow2.f32 %v677_v23  ;;  %v1430_v41 = vadd.f32 %v1379_v52, %v590_v32  ;;  %v1433_v42 = vadd.f32 %v1379_v52, %v572_v33  ;;  %v591_v43 = vmul.f32 %v1078_v39, %v1374_v50  ;;  %v517_v44 = vpop.f32.mrb[7].mxu1 }
  0xf6   : > { %1125 = vpow2.f32 %v709_v26  ;;  %v645_v45 = vsub.f32 0.0, %v1425_v36  ;;  %v1438_v46 = vadd.f32 %v1379_v52, %v588_v37  ;;  %v1441_v47 = vadd.f32 %v1379_v52, %v575_v38 }
  0xf7   : > { %1127 = vpow2.f32 %v673_v27  ;;  %v661_v48 = vsub.f32 0.0, %v1430_v41  ;;  %v643_v49 = vsub.f32 0.0, %v1433_v42  ;;  %v1446_v51 = vadd.f32 %v1379_v52, %v591_v43 }
  0xf8   : > { %1129 = vpow2.f32 %v705_v31  ;;  %v683_v53 = vmul.f32 1.442695, %v645_v45  ;;  %v659_v54 = vsub.f32 0.0, %v1438_v46  ;;  %v1065_v55 = vpop.f32.mrb[8].mxu0  ;;  %v573_v58 = vmul.f32 %v1374_v50, %v453_v40 }
  0xf9   : > { %v715_v56 = vmul.f32 1.442695, %v661_v48  ;;  %v679_v57 = vmul.f32 1.442695, %v643_v49  ;;  %v1081_v59 = vpop.f32.mrb[8].mxu1  ;;  %v646_v62 = vsub.f32 0.0, %v1441_v47  ;;  %v589_v63 = vmul.f32 %v1374_v50, %v517_v44 }
  0xfa   : > { %1131 = vpow2.f32 %v683_v53  ;;  %v711_v61 = vmul.f32 1.442695, %v659_v54  ;;  %v466_v0 = vpop.f32.mrb[9].mxu0  ;;  %v530_v3 = vpop.f32.mrb[9].mxu1  ;;  %v662_v5 = vsub.f32 0.0, %v1446_v51  ;;  %v1454_v6 = vadd.f32 %v1379_v52, %v573_v58 }
  0xfb   : > { %v1116_v4 = vpop.eup %1115  ;;  %1133 = vpow2.f32 %v715_v56  ;;  %v578_v9 = vmul.f32 %v1065_v55, %v1374_v50  ;;  %v1066_v10 = vpop.f32.mrb[10].mxu0  ;;  %v1458_v16 = vadd.f32 %v1379_v52, %v589_v63  ;;  %v594_v18 = vmul.f32 %v1081_v59, %v1374_v50 }
  0xfc   : > { %v1082_v11 = vpop.f32.mrb[10].mxu1  ;;  %v1118_v14 = vpop.eup %1117  ;;  %v737_v15 = vadd.f32 1.0, %v1116_v4  ;;  %1135 = vpow2.f32 %v679_v57  ;;  %v644_v23 = vsub.f32 0.0, %v1454_v6  ;;  %v685_v29 = vmul.f32 1.442695, %v646_v62 }
  0xfd   : > { %v469_v19 = vpop.f32.mrb[11].mxu0  ;;  %v1461_v20 = vpop.f32.mrb[11].mxu1  ;;  %v753_v22 = vadd.f32 1.0, %v1118_v14  ;;  %1137 = vpow2.f32 %v711_v61  ;;  %v1465_v26 = vadd.f32 %v1379_v52, %v578_v9  ;;  %v1467_v30 = vmul.f32 1.442695, %v662_v5 }
  0xfe   : > { %v1120_v21 = vpop.eup %1119  ;;  %1139 = vrcp.f32 %v737_v15  ;;  %v660_v33 = vsub.f32 0.0, %v1458_v16  ;;  %v1471_v34 = vadd.f32 %v1379_v52, %v594_v18  ;;  %v1475_v39 = vmul.f32 1.442695, %v644_v23 }
  0xff   : > { %v1122_v24 = vpop.eup %1121  ;;  %v735_v25 = vadd.f32 1.0, %v1120_v21  ;;  %1141 = vrcp.f32 %v753_v22  ;;  %v576_v40 = vmul.f32 %v1374_v50, %v466_v0  ;;  %v649_v49 = vsub.f32 0.0, %v1465_v26 }
 0x100   : > { %v1124_v27 = vpop.eup %1123  ;;  %v751_v28 = vadd.f32 1.0, %v1122_v24  ;;  %v1473_v35 = vpop.f32.mrb[12].mxu0  ;;  %v592_v53 = vmul.f32 %v1374_v50, %v530_v3  ;;  %v579_v58 = vmul.f32 %v1066_v10, %v1374_v50  ;;  %v665_v63 = vsub.f32 0.0, %v1471_v34 }
 0x101   : > { %v1126_v31 = vpop.eup %1125  ;;  %1143 = vrcp.f32 %v735_v25  ;;  %v738_v32 = vadd.f32 1.0, %v1124_v27  ;;  %v1478_v43 = vpop.f32.mrb[12].mxu1  ;;  %v1489_v57 = vadd.f32 %v1379_v52, %v576_v40  ;;  %v595_v3 = vmul.f32 %v1082_v11, %v1374_v50 }
 0x102   : > { %v1128_v37 = vpop.eup %1127  ;;  %1145 = vrcp.f32 %v751_v28  ;;  %v754_v38 = vadd.f32 1.0, %v1126_v31  ;;  %v1480_v44 = vpop.f32.mrb[13].mxu0  ;;  %v1498_v0 = vadd.f32 %v1379_v52, %v592_v53  ;;  %v577_v14 = vmul.f32 %v1374_v50, %v469_v19 }
 0x103   : > { %v1130_v45 = vpop.eup %1129  ;;  %1147 = vrcp.f32 %v738_v32  ;;  %v736_v48 = vadd.f32 1.0, %v1128_v37  ;;  %v1484_v54 = vpop.f32.mrb[13].mxu1  ;;  %v647_v10 = vsub.f32 0.0, %v1489_v57  ;;  %v713_v21 = vmul.f32 1.442695, %v660_v33 }
 0x104   : > { %v1486_v55 = vpop.f32.mrb[14].mxu0  ;;  %1149 = vrcp.f32 %v754_v38  ;;  %v752_v56 = vadd.f32 1.0, %v1130_v45  ;;  %v1492_v59 = vpop.f32.mrb[14].mxu1  ;;  %v1506_v22 = vadd.f32 %v1379_v52, %v579_v58  ;;  %v691_v24 = vmul.f32 1.442695, %v649_v49 }
 0x105   : > { %v1494_v61 = vpop.f32.mrb[15].mxu0  ;;  %v1132_v62 = vpop.eup %1131  ;;  %1151 = vrcp.f32 %v736_v48  ;;  %v663_v25 = vsub.f32 0.0, %v1498_v0  ;;  %v723_v28 = vmul.f32 1.442695, %v665_v63  ;;  %v687_v33 = vmul.f32 1.442695, %v647_v10 }
 0x106   : > { %v1501_v4 = vpop.f32.mrb[15].mxu1  ;;  %v1134_v5 = vpop.eup %1133  ;;  %1153 = vrcp.f32 %v752_v56  ;;  %v741_v9 = vadd.f32 1.0, %v1132_v62  ;;  %v1521_v37 = vadd.f32 %v1379_v52, %v577_v14  ;;  %v650_v45 = vsub.f32 0.0, %v1506_v22 }
 0x107   : > { %v1136_v15 = vpop.eup %1135  ;;  %v757_v18 = vadd.f32 1.0, %v1134_v5  ;;  %1155 = vpow2.f32 %v685_v29  ;;  %v1517_v29 = vadd.f32 %v1379_v52, %v595_v3  ;;  %v593_v48 = vmul.f32 %v1374_v50, %v1461_v20 }
 0x108   : > { %v1138_v23 = vpop.eup %1137  ;;  %1157 = vrcp.f32 %v741_v9  ;;  %v739_v11 = vadd.f32 1.0, %v1136_v15  ;;  %v719_v53 = vmul.f32 1.442695, %v663_v25  ;;  %v582_v56 = vmul.f32 %v1473_v35, %v1374_v50 }
 0x109   : > { %v1140_v27 = vpop.eup %1139  ;;  %1159 = vrcp.f32 %v757_v18  ;;  %v755_v19 = vadd.f32 1.0, %v1138_v23  ;;  %v666_v20 = vsub.f32 0.0, %v1517_v29  ;;  %v1537_v62 = vadd.f32 %v1379_v52, %v593_v48 }
 0x10a   : > { %v1142_v31 = vpop.eup %1141  ;;  %v801_v32 = vmul.f32 %v1140_v27, %v1385_v60  ;;  %1161 = vrcp.f32 %v739_v11  ;;  %v648_v35 = vsub.f32 0.0, %v1521_v37  ;;  %v1543_v63 = vadd.f32 %v1379_v52, %v582_v56 }
 0x10b   : > { %v1144_v38 = vpop.eup %1143  ;;  %v817_v40 = vmul.f32 %v1142_v31, %v1390_v1  ;;  %1163 = vrcp.f32 %v755_v19  ;;  %v693_v3 = vmul.f32 1.442695, %v650_v45  ;;  %v664_v5 = vsub.f32 0.0, %v1537_v62 }
 0x10c   : > { %v1146_v49 = vpop.eup %1145  ;;  %833 = vst [vmem:[%s1514_s5 + $0x10] sm:$0xff] %v801_v32  ;;  %v799_v60 = vmul.f32 %v1144_v38, %v1393_v2  ;;  %1165 = vpow2.f32 %v1467_v30  ;;  %v653_v10 = vsub.f32 0.0, %v1543_v63  ;;  %v725_v18 = vmul.f32 1.442695, %v666_v20 }
 0x10d   : > { %v1148_v58 = vpop.eup %1147  ;;  %849 = vst [vmem:[%s1514_s5 + $0x90] sm:$0xff] %v817_v40  ;;  %v815_v1 = vmul.f32 %v1146_v49, %v1399_v7  ;;  %1167 = vpow2.f32 %v1475_v39  ;;  %v689_v11 = vmul.f32 1.442695, %v648_v35  ;;  %v721_v25 = vmul.f32 1.442695, %v664_v5 }
 0x10e   : > { %v1150_v2 = vpop.eup %1149  ;;  %831 = vst [vmem:[%s1514_s5] sm:$0xff] %v799_v60  ;;  %v802_v30 = vmul.f32 %v1148_v58, %v1402_v8  ;;  %1169 = vpow2.f32 %v713_v21  ;;  %v699_v19 = vmul.f32 1.442695, %v653_v10  ;;  %v596_v40 = vmul.f32 %v1374_v50, %v1484_v54 }
 0x10f   : > { %v1152_v7 = vpop.eup %1151  ;;  %847 = vst [vmem:[%s1514_s5 + $0x80] sm:$0xff] %v815_v1  ;;  %v818_v39 = vmul.f32 %v1150_v2, %v1408_v12  ;;  %1171 = vpow2.f32 %v691_v24  ;;  %v598_v12 = vmul.f32 %v1478_v43, %v1374_v50  ;;  %v583_v48 = vmul.f32 %v1486_v55, %v1374_v50 }
 0x110   : > { %v1154_v9 = vpop.eup %1153  ;;  %834 = vst [vmem:[%s1514_s5 + $0x18] sm:$0xff] %v802_v30  ;;  %v800_v8 = vmul.f32 %v1152_v7, %v1411_v13  ;;  %1173 = vpow2.f32 %v723_v28  ;;  %v581_v58 = vmul.f32 %v1374_v50, %v1494_v61  ;;  %v1583_v20 = vadd.f32 %v1379_v52, %v596_v40 }
 0x111   : > { %v1156_v14 = vpop.eup %1155  ;;  %850 = vst [vmem:[%s1514_s5 + $0x98] sm:$0xff] %v818_v39  ;;  %v816_v15 = vmul.f32 %v1154_v9, %v1416_v17  ;;  %1175 = vpow2.f32 %v687_v33  ;;  %v1562_v31 = vadd.f32 %v1379_v52, %v598_v12  ;;  %v580_v33 = vmul.f32 %v1374_v50, %v1480_v44 }
 0x112   : > { %v1158_v21 = vpop.eup %1157  ;;  %832 = vst [vmem:[%s1514_s5 + $0x8] sm:$0xff] %v800_v8  ;;  %v742_v23 = vadd.f32 1.0, %v1156_v14  ;;  %1177 = vpow2.f32 %v719_v53  ;;  %v599_v44 = vmul.f32 %v1492_v59, %v1374_v50  ;;  %v597_v2 = vmul.f32 %v1374_v50, %v1501_v4 }
 0x113   : > { %v1160_v13 = vpop.eup %1159  ;;  %848 = vst [vmem:[%s1514_s5 + $0x88] sm:$0xff] %v816_v15  ;;  %v805_v24 = vmul.f32 %v1158_v21, %v1425_v36  ;;  %1179 = vpow2.f32 %v693_v3  ;;  %v669_v60 = vsub.f32 0.0, %v1562_v31  ;;  %v1578_v54 = vadd.f32 %v1379_v52, %v580_v33 }
 0x114   : > { %v1162_v17 = vpop.eup %1161  ;;  %v821_v27 = vmul.f32 %v1160_v13, %v1430_v41  ;;  %1181 = vrcp.f32 %v742_v23  ;;  %v1588_v35 = vadd.f32 %v1379_v52, %v583_v48  ;;  %v1591_v61 = vadd.f32 %v1379_v52, %v599_v44 }
 0x115   : > { %v1164_v43 = vpop.eup %1163  ;;  %837 = vst [vmem:[%s1514_s5 + $0x30] sm:$0xff] %v805_v24  ;;  %v803_v28 = vmul.f32 %v1162_v17, %v1433_v42  ;;  %1183 = vpow2.f32 %v725_v18  ;;  %v731_v3 = vmul.f32 1.442695, %v669_v60  ;;  %v651_v8 = vsub.f32 0.0, %v1578_v54 }
 0x116   : > { %v1166_v32 = vpop.eup %1165  ;;  %853 = vst [vmem:[%s1514_s5 + $0xb0] sm:$0xff] %v821_v27  ;;  %v819_v36 = vmul.f32 %v1164_v43, %v1438_v46  ;;  %1185 = vpow2.f32 %v689_v11  ;;  %v1595_v50 = vadd.f32 %v1379_v52, %v581_v58  ;;  %v667_v14 = vsub.f32 0.0, %v1583_v20 }
 0x117   : > { %v1168_v41 = vpop.eup %1167  ;;  %835 = vst [vmem:[%s1514_s5 + $0x20] sm:$0xff] %v803_v28  ;;  %v758_v38 = vadd.f32 1.0, %v1166_v32  ;;  %1187 = vpow2.f32 %v721_v25  ;;  %v1600_v15 = vadd.f32 %v1379_v52, %v597_v2  ;;  %v654_v21 = vsub.f32 0.0, %v1588_v35 }
 0x118   : > { %v1170_v42 = vpop.eup %1169  ;;  %851 = vst [vmem:[%s1514_s5 + $0xa0] sm:$0xff] %v819_v36  ;;  %v740_v45 = vadd.f32 1.0, %v1168_v41  ;;  %1189 = vpow2.f32 %v699_v19  ;;  %v670_v13 = vsub.f32 0.0, %v1591_v61  ;;  %v695_v25 = vmul.f32 1.442695, %v651_v8 }
 0x119   : > { %v1172_v49 = vpop.eup %1171  ;;  %1191 = vrcp.f32 %v758_v38  ;;  %v756_v46 = vadd.f32 1.0, %v1170_v42  ;;  %v652_v17 = vsub.f32 0.0, %v1595_v50  ;;  %v727_v19 = vmul.f32 1.442695, %v667_v14 }
 0x11a   : > { %v1174_v53 = vpop.eup %1173  ;;  %1193 = vrcp.f32 %v740_v45  ;;  %v745_v56 = vadd.f32 1.0, %v1172_v49  ;;  %v668_v43 = vsub.f32 0.0, %v1600_v15  ;;  %v701_v36 = vmul.f32 1.442695, %v654_v21 }
 0x11b   : > { %v1176_v1 = vpop.eup %1175  ;;  %1195 = vrcp.f32 %v756_v46  ;;  %v761_v55 = vadd.f32 1.0, %v1174_v53  ;;  %v733_v38 = vmul.f32 1.442695, %v670_v13  ;;  %v697_v45 = vmul.f32 1.442695, %v652_v17 }
 0x11c   : > { %v1178_v30 = vpop.eup %1177  ;;  %1197 = vrcp.f32 %v745_v56  ;;  %v743_v59 = vadd.f32 1.0, %v1176_v1  ;;  %v729_v49 = vmul.f32 1.442695, %v668_v43 }
 0x11d   : > { %v1180_v7 = vpop.eup %1179  ;;  %1199 = vrcp.f32 %v761_v55  ;;  %v759_v39 = vadd.f32 1.0, %v1178_v30 }
 0x11e   : > { %v1182_v5 = vpop.eup %1181  ;;  %1201 = vrcp.f32 %v743_v59  ;;  %v746_v9 = vadd.f32 1.0, %v1180_v7 }
 0x11f   : > { %v1184_v4 = vpop.eup %1183  ;;  %v806_v10 = vmul.f32 %v1182_v5, %v1441_v47  ;;  %1203 = vrcp.f32 %v759_v39 }
 0x120   : > { %v1186_v18 = vpop.eup %1185  ;;  %1205 = vrcp.f32 %v746_v9  ;;  %v762_v12 = vadd.f32 1.0, %v1184_v4 }
 0x121   : > { %v1188_v23 = vpop.eup %1187  ;;  %838 = vst [vmem:[%s1514_s5 + $0x38] sm:$0xff] %v806_v10  ;;  %v744_v11 = vadd.f32 1.0, %v1186_v18  ;;  %1207 = vpow2.f32 %v731_v3 }
 0x122   : > { %v1190_v24 = vpop.eup %1189  ;;  %1209 = vrcp.f32 %v762_v12  ;;  %v760_v47 = vadd.f32 1.0, %v1188_v23 }
 0x123   : > { %v1192_v52 = vpop.eup %1191  ;;  %1211 = vrcp.f32 %v744_v11  ;;  %v749_v27 = vadd.f32 1.0, %v1190_v24 }
 0x124   : > { %v1194_v28 = vpop.eup %1193  ;;  %v822_v32 = vmul.f32 %v1192_v52, %v1446_v51  ;;  %1213 = vrcp.f32 %v760_v47 }
 0x125   : > { %v1196_v33 = vpop.eup %1195  ;;  %v804_v41 = vmul.f32 %v1194_v28, %v1454_v6  ;;  %1215 = vrcp.f32 %v749_v27 }
 0x126   : > { %v1198_v40 = vpop.eup %1197  ;;  %854 = vst [vmem:[%s1514_s5 + $0xb8] sm:$0xff] %v822_v32  ;;  %v820_v42 = vmul.f32 %v1196_v33, %v1458_v16  ;;  %1217 = vpow2.f32 %v695_v25 }
 0x127   : > { %v1200_v48 = vpop.eup %1199  ;;  %836 = vst [vmem:[%s1514_s5 + $0x28] sm:$0xff] %v804_v41  ;;  %v809_v51 = vmul.f32 %v1198_v40, %v1465_v26  ;;  %1219 = vpow2.f32 %v727_v19 }
 0x128   : > { %v1202_v46 = vpop.eup %1201  ;;  %852 = vst [vmem:[%s1514_s5 + $0xa8] sm:$0xff] %v820_v42  ;;  %v825_v6 = vmul.f32 %v1200_v48, %v1471_v34  ;;  %1221 = vpow2.f32 %v701_v36 }
 0x129   : > { %v1204_v60 = vpop.eup %1203  ;;  %841 = vst [vmem:[%s1514_s5 + $0x50] sm:$0xff] %v809_v51  ;;  %v807_v16 = vmul.f32 %v1202_v46, %v1489_v57  ;;  %1223 = vpow2.f32 %v733_v38 }
 0x12a   : > { %v1206_v44 = vpop.eup %1205  ;;  %857 = vst [vmem:[%s1514_s5 + $0xd0] sm:$0xff] %v825_v6  ;;  %v823_v53 = vmul.f32 %v1204_v60, %v1498_v0  ;;  %1225 = vpow2.f32 %v697_v45 }
 0x12b   : > { %v1208_v26 = vpop.eup %1207  ;;  %839 = vst [vmem:[%s1514_s5 + $0x40] sm:$0xff] %v807_v16  ;;  %v810_v56 = vmul.f32 %v1206_v44, %v1506_v22  ;;  %1227 = vpow2.f32 %v729_v49 }
 0x12c   : > { %v1210_v34 = vpop.eup %1209  ;;  %855 = vst [vmem:[%s1514_s5 + $0xc0] sm:$0xff] %v823_v53  ;;  %v765_v58 = vadd.f32 1.0, %v1208_v26 }
 0x12d   : > { %v1212_v1 = vpop.eup %1211  ;;  %842 = vst [vmem:[%s1514_s5 + $0x58] sm:$0xff] %v810_v56  ;;  %v826_v57 = vmul.f32 %v1210_v34, %v1517_v29 }
 0x12e   : > { %v1214_v55 = vpop.eup %1213  ;;  %v808_v0 = vmul.f32 %v1212_v1, %v1521_v37  ;;  %1229 = vrcp.f32 %v765_v58 }
 0x12f   : > { %v1216_v2 = vpop.eup %1215  ;;  %858 = vst [vmem:[%s1514_s5 + $0xd8] sm:$0xff] %v826_v57  ;;  %v824_v30 = vmul.f32 %v1214_v55, %v1537_v62 }
 0x130   : > { %v1218_v59 = vpop.eup %1217  ;;  %840 = vst [vmem:[%s1514_s5 + $0x48] sm:$0xff] %v808_v0  ;;  %v813_v22 = vmul.f32 %v1216_v2, %v1543_v63 }
 0x131   : > { %v1220_v7 = vpop.eup %1219  ;;  %856 = vst [vmem:[%s1514_s5 + $0xc8] sm:$0xff] %v824_v30  ;;  %v747_v39 = vadd.f32 1.0, %v1218_v59 }
 0x132   : > { %v1222_v3 = vpop.eup %1221  ;;  %845 = vst [vmem:[%s1514_s5 + $0x70] sm:$0xff] %v813_v22  ;;  %v763_v5 = vadd.f32 1.0, %v1220_v7 }
 0x133   : > { %v1224_v29 = vpop.eup %1223  ;;  %1231 = vrcp.f32 %v747_v39  ;;  %v750_v9 = vadd.f32 1.0, %v1222_v3 }
 0x134   : > { %v1226_v37 = vpop.eup %1225  ;;  %1233 = vrcp.f32 %v763_v5  ;;  %v766_v8 = vadd.f32 1.0, %v1224_v29 }
 0x135   : > { %v1228_v4 = vpop.eup %1227  ;;  %1235 = vrcp.f32 %v750_v9  ;;  %v748_v62 = vadd.f32 1.0, %v1226_v37 }
 0x136   : > { %1237 = vrcp.f32 %v766_v8  ;;  %v764_v63 = vadd.f32 1.0, %v1228_v4 }
 0x137   : > { %1239 = vrcp.f32 %v748_v62 }
 0x138   : > { %v1230_v10 = vpop.eup %1229  ;;  %1241 = vrcp.f32 %v764_v63 }
 0x139   : > { %v829_v14 = vmul.f32 %v1230_v10, %v1562_v31 }
 0x13b   : > { %861 = vst [vmem:[%s1514_s5 + $0xf0] sm:$0xff] %v829_v14 }
 0x13d   : > { %v1232_v18 = vpop.eup %1231 }
 0x13e   : > { %v1234_v12 = vpop.eup %1233  ;;  %v811_v21 = vmul.f32 %v1232_v18, %v1578_v54 }
 0x13f   : > { %v1236_v23 = vpop.eup %1235  ;;  %v827_v11 = vmul.f32 %v1234_v12, %v1583_v20 }
 0x140   : > { %v1238_v13 = vpop.eup %1237  ;;  %843 = vst [vmem:[%s1514_s5 + $0x60] sm:$0xff] %v811_v21  ;;  %v814_v24 = vmul.f32 %v1236_v23, %v1588_v35 }
 0x141   : > { %v1240_v47 = vpop.eup %1239  ;;  %859 = vst [vmem:[%s1514_s5 + $0xe0] sm:$0xff] %v827_v11  ;;  %v830_v25 = vmul.f32 %v1238_v13, %v1591_v61 }
 0x142   : > { %v1242_v31 = vpop.eup %1241  ;;  %846 = vst [vmem:[%s1514_s5 + $0x78] sm:$0xff] %v814_v24  ;;  %v812_v17 = vmul.f32 %v1240_v47, %v1595_v50 }
 0x143   : > { %862 = vst [vmem:[%s1514_s5 + $0xf8] sm:$0xff] %v830_v25  ;;  %v828_v52 = vmul.f32 %v1242_v31, %v1600_v15 }
 0x144   : > { %844 = vst [vmem:[%s1514_s5 + $0x68] sm:$0xff] %v812_v17 }
 0x145   : > { %860 = vst [vmem:[%s1514_s5 + $0xe8] sm:$0xff] %v828_v52 }
 0x146 PF: > { %s14_s17 = sadd.s32 1, %s1265_s17   ;;  %s1659_s15 = smov %s1261_s16 }
 0x147   : > { %p11_p5 = scmp.ge.s32.totalorder %s14_s17, 4   ;;  %s1660_s16 = smov %s1662_s18 }
 0x149   :  { %13 = sbr.rel (!%p11_p5) target bundleno = 2 (0x2), region = 75 }

// kernel: mbconv_forward.5
= control target key start
LH: loop header
LB: loop body
LE: loop exit
PB: predicated region body
PF: predicated region fallthrough
CT: control target
= control target key end

     0   :  { %s1237_s21 = smov 0   ;;  %s1239_s22 = smov 0   ;;  %s1510_s0 = inlined_call_operand.vmem [shape: f32[2,256,16], index: 0, kind: input, shape index: {}]   ;;  %s1511_s1 = inlined_call_operand.vmem [shape: bf16[16,128], index: 1, kind: input, shape index: {}]   ;;  %s1512_s2 = inlined_call_operand.vmem [shape: f32[1,128], index: 2, kind: input, shape index: {}]   ;;  %s1513_s3 = inlined_call_operand.vmem [shape: f32[1,128], index: 3, kind: input, shape index: {}]   ;;  %s1514_s4 = inlined_call_operand.vmem [shape: f32[2,1,16], index: 4, kind: input, shape index: {}]   ;;  %s1515_s5 = inlined_call_operand.vmem [shape: f32[2,256,128], index: 5, kind: input, shape index: {}]   ;;  %s1516_s6 = inlined_call_operand.vmem [shape: f32[2,256,128], index: 6, kind: output, shape index: {}]  }
   0x1   :  { %s1241_s23 = smov 0  }
   0x2 LB: > { %s35_s24 = sadd.s32 1, %s1196_s22  ;;  %p1068_p0 = scmp.ge.s32.totalorder %s1200_s23, 1  ;;  %s1200_s23 = sphi %s1241_s23, %s16_s23   ;;  %s1196_s22 = sphi %s1239_s22, %s1518_s22   ;;  %s1192_s21 = sphi %s1237_s21, %s1517_s21  }
   0x3   : > { %p37_p1 = scmp.ge.s32.totalorder %s35_s24, 2  ;;  %p297_p2 = scmp.lt.s32.totalorder %s1200_s23, 3 }
   0x5   : > { %s1520_s24 = smov (%p37_p1, %s35_s24), 0  ;;  %p298_p3 = pnand %p1068_p0, %p297_p2 }
   0x6   : > { %v1177_v0 = vld [vmem:[%s1511_s1] sm:$0xff] (!%p298_p3)   ;;  %p364_p4 = scmp.lt.s32.totalorder (!%p298_p3), %s1192_s21, 1  ;;  %vm508_vm0 = vcmask (!%p298_p3), 130048  }
   0x7   : > { %301 = sbr.rel (%p298_p3) target bundleno = 270 (0x10e), region = 44  ;;  %1117 = vmatprep.subr.bf16.mxu0 (!%p298_p3), %v1177_v0  ;;  %1151 = vmatprep.subr.bf16.mxu1 (!%p298_p3), %v1177_v0 }
   0x8   : > { %1118 = vmatpush3.bf16.msra.mxu0 (!%p298_p3), %v1177_v0  ;;  %1152 = vmatpush3.bf16.msra.mxu1 (!%p298_p3), %v1177_v0 }
   0xe   : > { %s1522_s21 = smov (!%p364_p4, %s1192_s21), 1 }
   0xf   : > { %s1258_s27 = sshll.u32 %s1522_s21, 8  ;;  %s385_s30 = scalar_lea.vmem %s1514_s4, %s1522_s21 }
  0x10   : > { %s1267_s9 = scalar_lea.vmem %s1510_s0, %s1258_s27  ;;  %v1269_v1 = vld [vmem:[%s385_s30] ss:$0 sm:$0xff]  ;;  %s1360_s14 = scalar_lea.vmem %s1515_s5, %s1258_s27 }
  0x11   : > { %v413_v2 = vld [vmem:[%s1267_s9] sm:$0xff]  ;;  %v414_v3 = vld [vmem:[%s1267_s9 + $0x8] sm:$0xff]  ;;  %v415_v9 = vld [vmem:[%s1267_s9 + $0x10] sm:$0xff]  ;;  %s1380_s19 = scalar_lea.vmem %s1516_s6, %s1258_s27 }
  0x12   : > { %v429_v4 = vld [vmem:[%s1267_s9 + $0x80] sm:$0xff]  ;;  %v452_v5 = vmul.f32 %v1269_v1, %v413_v2  ;;  %v453_v6 = vmul.f32 %v1269_v1, %v414_v3  ;;  %v430_v7 = vld [vmem:[%s1267_s9 + $0x88] sm:$0xff]  ;;  %v416_v10 = vld [vmem:[%s1267_s9 + $0x18] sm:$0xff]  ;;  %v454_v12 = vmul.f32 %v1269_v1, %v415_v9 }
  0x13   : > { %v468_v8 = vmul.f32 %v1269_v1, %v429_v4  ;;  %v469_v11 = vmul.f32 %v1269_v1, %v430_v7  ;;  %v455_v13 = vmul.f32 %v1269_v1, %v416_v10  ;;  %v431_v14 = vld [vmem:[%s1267_s9 + $0x90] sm:$0xff]  ;;  %v432_v15 = vld [vmem:[%s1267_s9 + $0x98] sm:$0xff]  ;;  %v417_v16 = vld [vmem:[%s1267_s9 + $0x20] sm:$0xff] }
  0x14   : > { %v484_v17 = vpack.c.bf16 %v453_v6, %v452_v5  ;;  %v470_v18 = vmul.f32 %v1269_v1, %v431_v14  ;;  %v471_v19 = vmul.f32 %v1269_v1, %v432_v15  ;;  %v418_v20 = vld [vmem:[%s1267_s9 + $0x28] sm:$0xff]  ;;  %v456_v21 = vmul.f32 %v1269_v1, %v417_v16  ;;  %v433_v22 = vld [vmem:[%s1267_s9 + $0xa0] sm:$0xff]  ;;  %v419_v28 = vld [vmem:[%s1267_s9 + $0x30] sm:$0xff] }
  0x15   : > { %v434_v23 = vld [vmem:[%s1267_s9 + $0xa8] sm:$0xff]  ;;  %v492_v24 = vpack.c.bf16 %v469_v11, %v468_v8  ;;  %v485_v25 = vpack.c.bf16 %v455_v13, %v454_v12  ;;  %v457_v26 = vmul.f32 %v1269_v1, %v418_v20  ;;  %v472_v27 = vmul.f32 %v1269_v1, %v433_v22  ;;  %v420_v29 = vld [vmem:[%s1267_s9 + $0x38] sm:$0xff]  ;;  %v435_v30 = vld [vmem:[%s1267_s9 + $0xb0] sm:$0xff] }
  0x16   : > { %1119 = vmatprep.mubr.msk.bf16.mxu0 %vm508_vm0, %v484_v17  ;;  %v493_v31 = vpack.c.bf16 %v471_v19, %v470_v18  ;;  %v473_v32 = vmul.f32 %v1269_v1, %v434_v23  ;;  %v458_v33 = vmul.f32 %v1269_v1, %v419_v28  ;;  %v436_v34 = vld [vmem:[%s1267_s9 + $0xb8] sm:$0xff]  ;;  %v421_v35 = vld [vmem:[%s1267_s9 + $0x40] sm:$0xff]  ;;  %v422_v36 = vld [vmem:[%s1267_s9 + $0x48] sm:$0xff]  ;;  %v459_v38 = vmul.f32 %v1269_v1, %v420_v29 }
  0x17   : > { %1135 = vmatprep.mubr.msk.bf16.mxu1 %vm508_vm0, %v492_v24  ;;  %1120 = vmatmul.mubr.msk.bf16.vlgmr.msra.gmra.mrb[0].mxu0 %vm508_vm0, %v485_v25  ;;  %v486_v37 = vpack.c.bf16 %v457_v26, %v456_v21  ;;  %v474_v39 = vmul.f32 %v1269_v1, %v435_v30  ;;  %v437_v40 = vld [vmem:[%s1267_s9 + $0xc0] sm:$0xff]  ;;  %v438_v41 = vld [vmem:[%s1267_s9 + $0xc8] sm:$0xff]  ;;  %v475_v43 = vmul.f32 %v1269_v1, %v436_v34  ;;  %v423_v51 = vld [vmem:[%s1267_s9 + $0x50] sm:$0xff] }
  0x18   : > { %1136 = vmatmul.mubr.msk.bf16.vlgmr.msra.gmra.mrb[0].mxu1 %vm508_vm0, %v493_v31  ;;  %v494_v42 = vpack.c.bf16 %v473_v32, %v472_v27  ;;  %v460_v44 = vmul.f32 %v1269_v1, %v421_v35  ;;  %v461_v45 = vmul.f32 %v1269_v1, %v422_v36  ;;  %v476_v46 = vmul.f32 %v1269_v1, %v437_v40  ;;  %v424_v52 = vld [vmem:[%s1267_s9 + $0x58] sm:$0xff]  ;;  %v439_v53 = vld [vmem:[%s1267_s9 + $0xd0] sm:$0xff]  ;;  %v425_v56 = vld [vmem:[%s1267_s9 + $0x60] sm:$0xff] }
  0x19   : > { %1123 = vmatprep.mubr.msk.bf16.mxu0 %vm508_vm0, %v486_v37  ;;  %v477_v47 = vmul.f32 %v1269_v1, %v438_v41  ;;  %v487_v48 = vpack.c.bf16 %v459_v38, %v458_v33  ;;  %v495_v49 = vpack.c.bf16 %v475_v43, %v474_v39  ;;  %v440_v55 = vld [vmem:[%s1267_s9 + $0xd8] sm:$0xff]  ;;  %v426_v57 = vld [vmem:[%s1267_s9 + $0x68] sm:$0xff]  ;;  %v441_v58 = vld [vmem:[%s1267_s9 + $0xe0] sm:$0xff]  ;;  %v462_v60 = vmul.f32 %v1269_v1, %v423_v51 }
  0x1a   : > { %1139 = vmatprep.mubr.msk.bf16.mxu1 %vm508_vm0, %v494_v42  ;;  %v488_v50 = vpack.c.bf16 %v461_v45, %v460_v44  ;;  %v442_v59 = vld [vmem:[%s1267_s9 + $0xe8] sm:$0xff]  ;;  %v463_v61 = vmul.f32 %v1269_v1, %v424_v52  ;;  %v478_v62 = vmul.f32 %v1269_v1, %v439_v53  ;;  %v479_v63 = vmul.f32 %v1269_v1, %v440_v55  ;;  %v427_v8 = vld [vmem:[%s1267_s9 + $0x70] sm:$0xff]  ;;  %v428_v9 = vld [vmem:[%s1267_s9 + $0x78] sm:$0xff] }
  0x1b   : > { %v496_v54 = vpack.c.bf16 %v477_v47, %v476_v46  ;;  %v464_v0 = vmul.f32 %v1269_v1, %v425_v56  ;;  %v465_v2 = vmul.f32 %v1269_v1, %v426_v57  ;;  %v480_v3 = vmul.f32 %v1269_v1, %v441_v58  ;;  %v443_v11 = vld [vmem:[%s1267_s9 + $0xf0] sm:$0xff]  ;;  %v444_v12 = vld [vmem:[%s1267_s9 + $0xf8] sm:$0xff]  ;;  %v1354_v19 = vld [vmem:[%s1512_s2] ss:$0 sm:$0xff] }
  0x1c   : > { %v481_v4 = vmul.f32 %v1269_v1, %v442_v59  ;;  %v489_v5 = vpack.c.bf16 %v463_v61, %v462_v60  ;;  %v497_v6 = vpack.c.bf16 %v479_v63, %v478_v62  ;;  %v466_v13 = vmul.f32 %v1269_v1, %v427_v8  ;;  %v1365_v20 = vld [vmem:[%s1513_s3] ss:$0 sm:$0xff]  ;;  %v798_v24 = vld [vmem:[%s1360_s14 + $0x10] sm:$0xff]  ;;  %v799_v39 = vld [vmem:[%s1360_s14 + $0x18] sm:$0xff] }
  0x1d   : > { %v490_v7 = vpack.c.bf16 %v465_v2, %v464_v0  ;;  %v467_v14 = vmul.f32 %v1269_v1, %v428_v9  ;;  %v482_v15 = vmul.f32 %v1269_v1, %v443_v11  ;;  %v483_v16 = vmul.f32 %v1269_v1, %v444_v12  ;;  %v814_v30 = vld [vmem:[%s1360_s14 + $0x90] sm:$0xff]  ;;  %v796_v31 = vld [vmem:[%s1360_s14] sm:$0xff]  ;;  %v815_v46 = vld [vmem:[%s1360_s14 + $0x98] sm:$0xff] }
  0x1e   : > { %v498_v10 = vpack.c.bf16 %v481_v4, %v480_v3  ;;  %v812_v38 = vld [vmem:[%s1360_s14 + $0x80] sm:$0xff]  ;;  %v797_v47 = vld [vmem:[%s1360_s14 + $0x8] sm:$0xff]  ;;  %v802_v0 = vld [vmem:[%s1360_s14 + $0x30] sm:$0xff] }
  0x1f   : > { %1124 = vmatmul.mubr.msk.bf16.gmra.mrb[4].mxu0 %vm508_vm0, %v487_v48  ;;  %v491_v17 = vpack.c.bf16 %v467_v14, %v466_v13  ;;  %v499_v18 = vpack.c.bf16 %v483_v16, %v482_v15  ;;  %v813_v53 = vld [vmem:[%s1360_s14 + $0x88] sm:$0xff]  ;;  %v800_v8 = vld [vmem:[%s1360_s14 + $0x20] sm:$0xff]  ;;  %v803_v16 = vld [vmem:[%s1360_s14 + $0x38] sm:$0xff] }
  0x20   : > { %1140 = vmatmul.mubr.msk.bf16.gmra.mrb[4].mxu1 %vm508_vm0, %v495_v49  ;;  %1127 = vmatprep.mubr.msk.bf16.mxu0 %vm508_vm0, %v488_v50  ;;  %v816_v15 = vld [vmem:[%s1360_s14 + $0xa0] sm:$0xff] }
  0x21   : > { %1143 = vmatprep.mubr.msk.bf16.mxu1 %vm508_vm0, %v496_v54 }
  0x27   : > { %1128 = vmatmul.mubr.msk.bf16.gmra.mrb[8].mxu0 %vm508_vm0, %v489_v5 }
  0x28   : > { %1144 = vmatmul.mubr.msk.bf16.gmra.mrb[8].mxu1 %vm508_vm0, %v497_v6  ;;  %1131 = vmatprep.mubr.msk.bf16.mxu0 %vm508_vm0, %v490_v7  ;;  %v818_v7 = vld [vmem:[%s1360_s14 + $0xb0] sm:$0xff] }
  0x29   : > { %1147 = vmatprep.mubr.msk.bf16.mxu1 %vm508_vm0, %v498_v10 }
  0x2f   : > { %1132 = vmatmul.mubr.msk.bf16.gmra.mrb[12].mxu0 %vm508_vm0, %v491_v17 }
  0x30   : > { %1148 = vmatmul.mubr.msk.bf16.gmra.mrb[12].mxu1 %vm508_vm0, %v499_v18 }
  0xea   : > { %v1121_v1 = vpop.f32.mrb[0].mxu0 }
  0xeb   : > { %v727_v21 = vmul.f32 %v1121_v1, %v1354_v19  ;;  %v1137_v22 = vpop.f32.mrb[0].mxu1  ;;  %v591_v23 = vpop.f32.mrb[1].mxu0 }
  0xec   : > { %v743_v25 = vmul.f32 %v1137_v22, %v1354_v19  ;;  %v725_v26 = vmul.f32 %v1354_v19, %v591_v23  ;;  %v655_v27 = vpop.f32.mrb[1].mxu1  ;;  %v1122_v28 = vpop.f32.mrb[2].mxu0 }
  0xed   : > { %v766_v29 = vadd.f32 %v1365_v20, %v727_v21  ;;  %v741_v32 = vmul.f32 %v1354_v19, %v655_v27  ;;  %v728_v33 = vmul.f32 %v1122_v28, %v1354_v19  ;;  %v1138_v34 = vpop.f32.mrb[2].mxu1  ;;  %v594_v35 = vpop.f32.mrb[3].mxu0 }
  0xee   : > { %v782_v36 = vadd.f32 %v1365_v20, %v743_v25  ;;  %v764_v37 = vadd.f32 %v1365_v20, %v725_v26  ;;  %v744_v40 = vmul.f32 %v1138_v34, %v1354_v19  ;;  %v726_v41 = vmul.f32 %v1354_v19, %v594_v35  ;;  %v658_v42 = vpop.f32.mrb[3].mxu1  ;;  %v801_v25 = vld [vmem:[%s1360_s14 + $0x28] sm:$0xff] }
  0xef   : > { %v830_v43 = vadd.f32 %v798_v24, %v766_v29  ;;  %v780_v44 = vadd.f32 %v1365_v20, %v741_v32  ;;  %v767_v45 = vadd.f32 %v1365_v20, %v728_v33  ;;  %v742_v48 = vmul.f32 %v1354_v19, %v658_v42  ;;  %v819_v24 = vld [vmem:[%s1360_s14 + $0xb8] sm:$0xff]  ;;  %v806_v42 = vld [vmem:[%s1360_s14 + $0x50] sm:$0xff] }
  0xf0   : > { %v846_v49 = vadd.f32 %v814_v30, %v782_v36  ;;  %v828_v50 = vadd.f32 %v796_v31, %v764_v37  ;;  %v783_v51 = vadd.f32 %v1365_v20, %v744_v40  ;;  %v765_v52 = vadd.f32 %v1365_v20, %v726_v41  ;;  %v817_v31 = vld [vmem:[%s1360_s14 + $0xa8] sm:$0xff] }
  0xf1   : > { %862 = vst [vmem:[%s1380_s19 + $0x10] sm:$0xff] %v830_v43  ;;  %v844_v54 = vadd.f32 %v812_v38, %v780_v44  ;;  %v831_v55 = vadd.f32 %v799_v39, %v767_v45  ;;  %v781_v56 = vadd.f32 %v1365_v20, %v742_v48  ;;  %v822_v48 = vld [vmem:[%s1360_s14 + $0xd0] sm:$0xff] }
  0xf2   : > { %878 = vst [vmem:[%s1380_s19 + $0x90] sm:$0xff] %v846_v49  ;;  %860 = vst [vmem:[%s1380_s19] sm:$0xff] %v828_v50  ;;  %v847_v57 = vadd.f32 %v815_v46, %v783_v51  ;;  %v829_v58 = vadd.f32 %v797_v47, %v765_v52  ;;  %v1125_v59 = vpop.f32.mrb[4].mxu0  ;;  %v804_v49 = vld [vmem:[%s1360_s14 + $0x40] sm:$0xff] }
  0xf3   : > { %876 = vst [vmem:[%s1380_s19 + $0x80] sm:$0xff] %v844_v54  ;;  %863 = vst [vmem:[%s1380_s19 + $0x18] sm:$0xff] %v831_v55  ;;  %v845_v60 = vadd.f32 %v813_v53, %v781_v56  ;;  %v731_v61 = vmul.f32 %v1125_v59, %v1354_v19  ;;  %v1141_v62 = vpop.f32.mrb[4].mxu1  ;;  %v607_v63 = vpop.f32.mrb[5].mxu0  ;;  %v820_v56 = vld [vmem:[%s1360_s14 + $0xc0] sm:$0xff] }
  0xf4   : > { %879 = vst [vmem:[%s1380_s19 + $0x98] sm:$0xff] %v847_v57  ;;  %861 = vst [vmem:[%s1380_s19 + $0x8] sm:$0xff] %v829_v58  ;;  %v747_v2 = vmul.f32 %v1141_v62, %v1354_v19  ;;  %v729_v3 = vmul.f32 %v1354_v19, %v607_v63  ;;  %v671_v4 = vpop.f32.mrb[5].mxu1  ;;  %v1126_v5 = vpop.f32.mrb[6].mxu0  ;;  %v807_v57 = vld [vmem:[%s1360_s14 + $0x58] sm:$0xff] }
  0xf5   : > { %877 = vst [vmem:[%s1380_s19 + $0x88] sm:$0xff] %v845_v60  ;;  %v770_v6 = vadd.f32 %v1365_v20, %v731_v61  ;;  %v745_v9 = vmul.f32 %v1354_v19, %v671_v4  ;;  %v732_v10 = vmul.f32 %v1126_v5, %v1354_v19  ;;  %v1142_v11 = vpop.f32.mrb[6].mxu1  ;;  %v610_v12 = vpop.f32.mrb[7].mxu0 }
  0xf6   : > { %v786_v13 = vadd.f32 %v1365_v20, %v747_v2  ;;  %v768_v14 = vadd.f32 %v1365_v20, %v729_v3  ;;  %v748_v17 = vmul.f32 %v1142_v11, %v1354_v19  ;;  %v730_v18 = vmul.f32 %v1354_v19, %v610_v12  ;;  %v674_v1 = vpop.f32.mrb[7].mxu1  ;;  %v805_v2 = vld [vmem:[%s1360_s14 + $0x48] sm:$0xff] }
  0xf7   : > { %v834_v21 = vadd.f32 %v802_v0, %v770_v6  ;;  %v784_v22 = vadd.f32 %v1365_v20, %v745_v9  ;;  %v771_v23 = vadd.f32 %v1365_v20, %v732_v10  ;;  %v746_v26 = vmul.f32 %v1354_v19, %v674_v1  ;;  %v823_v0 = vld [vmem:[%s1360_s14 + $0xd8] sm:$0xff]  ;;  %v810_v1 = vld [vmem:[%s1360_s14 + $0x70] sm:$0xff] }
  0xf8   : > { %v850_v27 = vadd.f32 %v818_v7, %v786_v13  ;;  %v832_v28 = vadd.f32 %v800_v8, %v768_v14  ;;  %v787_v29 = vadd.f32 %v1365_v20, %v748_v17  ;;  %v769_v30 = vadd.f32 %v1365_v20, %v730_v18  ;;  %v821_v8 = vld [vmem:[%s1360_s14 + $0xc8] sm:$0xff] }
  0xf9   : > { %866 = vst [vmem:[%s1380_s19 + $0x30] sm:$0xff] %v834_v21  ;;  %v848_v32 = vadd.f32 %v816_v15, %v784_v22  ;;  %v835_v33 = vadd.f32 %v803_v16, %v771_v23  ;;  %v785_v34 = vadd.f32 %v1365_v20, %v746_v26  ;;  %v826_v26 = vld [vmem:[%s1360_s14 + $0xf0] sm:$0xff] }
  0xfa   : > { %882 = vst [vmem:[%s1380_s19 + $0xb0] sm:$0xff] %v850_v27  ;;  %864 = vst [vmem:[%s1380_s19 + $0x20] sm:$0xff] %v832_v28  ;;  %v851_v35 = vadd.f32 %v819_v24, %v787_v29  ;;  %v833_v36 = vadd.f32 %v801_v25, %v769_v30  ;;  %v1129_v37 = vpop.f32.mrb[8].mxu0  ;;  %v808_v27 = vld [vmem:[%s1360_s14 + $0x60] sm:$0xff] }
  0xfb   : > { %880 = vst [vmem:[%s1380_s19 + $0xa0] sm:$0xff] %v848_v32  ;;  %867 = vst [vmem:[%s1380_s19 + $0x38] sm:$0xff] %v835_v33  ;;  %v849_v38 = vadd.f32 %v817_v31, %v785_v34  ;;  %v735_v39 = vmul.f32 %v1129_v37, %v1354_v19  ;;  %v1145_v40 = vpop.f32.mrb[8].mxu1  ;;  %v623_v41 = vpop.f32.mrb[9].mxu0  ;;  %v824_v34 = vld [vmem:[%s1360_s14 + $0xe0] sm:$0xff] }
  0xfc   : > { %883 = vst [vmem:[%s1380_s19 + $0xb8] sm:$0xff] %v851_v35  ;;  %865 = vst [vmem:[%s1380_s19 + $0x28] sm:$0xff] %v833_v36  ;;  %v751_v43 = vmul.f32 %v1145_v40, %v1354_v19  ;;  %v733_v44 = vmul.f32 %v1354_v19, %v623_v41  ;;  %v687_v45 = vpop.f32.mrb[9].mxu1  ;;  %v1130_v46 = vpop.f32.mrb[10].mxu0  ;;  %v811_v35 = vld [vmem:[%s1360_s14 + $0x78] sm:$0xff] }
  0xfd   : > { %881 = vst [vmem:[%s1380_s19 + $0xa8] sm:$0xff] %v849_v38  ;;  %v774_v47 = vadd.f32 %v1365_v20, %v735_v39  ;;  %v749_v50 = vmul.f32 %v1354_v19, %v687_v45  ;;  %v736_v51 = vmul.f32 %v1130_v46, %v1354_v19  ;;  %v1146_v52 = vpop.f32.mrb[10].mxu1  ;;  %v626_v53 = vpop.f32.mrb[11].mxu0 }
  0xfe   : > { %v790_v54 = vadd.f32 %v1365_v20, %v751_v43  ;;  %v772_v55 = vadd.f32 %v1365_v20, %v733_v44  ;;  %v752_v58 = vmul.f32 %v1146_v52, %v1354_v19  ;;  %v734_v59 = vmul.f32 %v1354_v19, %v626_v53  ;;  %v690_v60 = vpop.f32.mrb[11].mxu1  ;;  %v809_v43 = vld [vmem:[%s1360_s14 + $0x68] sm:$0xff] }
  0xff   : > { %v838_v61 = vadd.f32 %v806_v42, %v774_v47  ;;  %v788_v62 = vadd.f32 %v1365_v20, %v749_v50  ;;  %v775_v63 = vadd.f32 %v1365_v20, %v736_v51  ;;  %v750_v3 = vmul.f32 %v1354_v19, %v690_v60  ;;  %v827_v42 = vld [vmem:[%s1360_s14 + $0xf8] sm:$0xff] }
 0x100   : > { %v854_v4 = vadd.f32 %v822_v48, %v790_v54  ;;  %v836_v5 = vadd.f32 %v804_v49, %v772_v55  ;;  %v791_v6 = vadd.f32 %v1365_v20, %v752_v58  ;;  %v773_v7 = vadd.f32 %v1365_v20, %v734_v59  ;;  %v825_v49 = vld [vmem:[%s1360_s14 + $0xe8] sm:$0xff] }
 0x101   : > { %870 = vst [vmem:[%s1380_s19 + $0x50] sm:$0xff] %v838_v61  ;;  %v852_v9 = vadd.f32 %v820_v56, %v788_v62  ;;  %v839_v10 = vadd.f32 %v807_v57, %v775_v63  ;;  %v789_v11 = vadd.f32 %v1365_v20, %v750_v3 }
 0x102   : > { %886 = vst [vmem:[%s1380_s19 + $0xd0] sm:$0xff] %v854_v4  ;;  %868 = vst [vmem:[%s1380_s19 + $0x40] sm:$0xff] %v836_v5  ;;  %v855_v12 = vadd.f32 %v823_v0, %v791_v6  ;;  %v837_v13 = vadd.f32 %v805_v2, %v773_v7  ;;  %v1133_v14 = vpop.f32.mrb[12].mxu0 }
 0x103   : > { %884 = vst [vmem:[%s1380_s19 + $0xc0] sm:$0xff] %v852_v9  ;;  %871 = vst [vmem:[%s1380_s19 + $0x58] sm:$0xff] %v839_v10  ;;  %v853_v15 = vadd.f32 %v821_v8, %v789_v11  ;;  %v739_v16 = vmul.f32 %v1133_v14, %v1354_v19  ;;  %v1149_v17 = vpop.f32.mrb[12].mxu1  ;;  %v639_v18 = vpop.f32.mrb[13].mxu0 }
 0x104   : > { %887 = vst [vmem:[%s1380_s19 + $0xd8] sm:$0xff] %v855_v12  ;;  %869 = vst [vmem:[%s1380_s19 + $0x48] sm:$0xff] %v837_v13  ;;  %v755_v21 = vmul.f32 %v1149_v17, %v1354_v19  ;;  %v737_v22 = vmul.f32 %v1354_v19, %v639_v18  ;;  %v703_v23 = vpop.f32.mrb[13].mxu1  ;;  %v1134_v24 = vpop.f32.mrb[14].mxu0 }
 0x105   : > { %885 = vst [vmem:[%s1380_s19 + $0xc8] sm:$0xff] %v853_v15  ;;  %v778_v25 = vadd.f32 %v1365_v20, %v739_v16  ;;  %v753_v28 = vmul.f32 %v1354_v19, %v703_v23  ;;  %v740_v29 = vmul.f32 %v1134_v24, %v1354_v19  ;;  %v1150_v30 = vpop.f32.mrb[14].mxu1  ;;  %v642_v31 = vpop.f32.mrb[15].mxu0 }
 0x106   : > { %v794_v32 = vadd.f32 %v1365_v20, %v755_v21  ;;  %v776_v33 = vadd.f32 %v1365_v20, %v737_v22  ;;  %v756_v36 = vmul.f32 %v1150_v30, %v1354_v19  ;;  %v738_v37 = vmul.f32 %v1354_v19, %v642_v31  ;;  %v706_v38 = vpop.f32.mrb[15].mxu1 }
 0x107   : > { %v842_v39 = vadd.f32 %v810_v1, %v778_v25  ;;  %v792_v40 = vadd.f32 %v1365_v20, %v753_v28  ;;  %v779_v41 = vadd.f32 %v1365_v20, %v740_v29  ;;  %v754_v44 = vmul.f32 %v1354_v19, %v706_v38 }
 0x108   : > { %v858_v45 = vadd.f32 %v826_v26, %v794_v32  ;;  %v840_v46 = vadd.f32 %v808_v27, %v776_v33  ;;  %v795_v47 = vadd.f32 %v1365_v20, %v756_v36  ;;  %v777_v48 = vadd.f32 %v1365_v20, %v738_v37 }
 0x109   : > { %874 = vst [vmem:[%s1380_s19 + $0x70] sm:$0xff] %v842_v39  ;;  %v856_v50 = vadd.f32 %v824_v34, %v792_v40  ;;  %v843_v51 = vadd.f32 %v811_v35, %v779_v41  ;;  %v793_v52 = vadd.f32 %v1365_v20, %v754_v44 }
 0x10a   : > { %890 = vst [vmem:[%s1380_s19 + $0xf0] sm:$0xff] %v858_v45  ;;  %872 = vst [vmem:[%s1380_s19 + $0x60] sm:$0xff] %v840_v46  ;;  %v859_v53 = vadd.f32 %v827_v42, %v795_v47  ;;  %v841_v54 = vadd.f32 %v809_v43, %v777_v48 }
 0x10b   : > { %888 = vst [vmem:[%s1380_s19 + $0xe0] sm:$0xff] %v856_v50  ;;  %875 = vst [vmem:[%s1380_s19 + $0x78] sm:$0xff] %v843_v51  ;;  %v857_v19 = vadd.f32 %v825_v49, %v793_v52 }
 0x10c   : > { %891 = vst [vmem:[%s1380_s19 + $0xf8] sm:$0xff] %v859_v53  ;;  %873 = vst [vmem:[%s1380_s19 + $0x68] sm:$0xff] %v841_v54 }
 0x10d   : > { %889 = vst [vmem:[%s1380_s19 + $0xe8] sm:$0xff] %v857_v19 }
 0x10e PF: > { %s16_s23 = sadd.s32 1, %s1200_s23   ;;  %s1517_s21 = smov %s1196_s22 }
 0x10f   : > { %p13_p5 = scmp.ge.s32.totalorder %s16_s23, 4   ;;  %s1518_s22 = smov %s1520_s24 }
 0x111   :  { %15 = sbr.rel (!%p13_p5) target bundleno = 2 (0x2), region = 89 }

// kernel: mbconv_forward.4
= control target key start
LH: loop header
LB: loop body
LE: loop exit
PB: predicated region body
PF: predicated region fallthrough
CT: control target
= control target key end

     0   :  { %s2609_s18 = smov 0   ;;  %s4350_s0 = inlined_call_operand.vmem [shape: f32[2,18,18,16], index: 0, kind: input, shape index: {}]   ;;  %s4351_s1 = inlined_call_operand.vmem [shape: f32[3,3,16], index: 1, kind: input, shape index: {}]   ;;  %s4352_s2 = inlined_call_operand.vmem [shape: f32[1,1,16], index: 2, kind: input, shape index: {}]   ;;  %s4353_s3 = inlined_call_operand.vmem [shape: f32[1,1,16], index: 3, kind: input, shape index: {}]   ;;  %s4354_s4 = inlined_call_operand.vmem [shape: f32[2,16,16,16], index: 4, kind: output, shape index: {0}]   ;;  %s4355_s5 = inlined_call_operand.vmem [shape: f32[2,1,16], index: 5, kind: output, shape index: {1}]  }
   0x1 LB: > { %s2417_s19 = sadd.s32 4294967295, %s2577_s18   ;;  %p2421_p0 = scmp.ge.s32.totalorder %s2577_s18, 1  ;;  %s2577_s18 = sphi %s2609_s18, %s16_s18  }
   0x2   : > { %p190_p1 = scmp.lt.s32.totalorder %s2577_s18, 3 }
   0x4   : > { %p191_p2 = pnand %p2421_p0, %p190_p1 }
   0x5   : > { %p221_p3 = scmp.lt.s32.totalorder (!%p191_p2), %s2417_s19, 1  ;;  %v291_v0 = vlaneseq (!%p191_p2)  ;;  %v288_v2 = vld [vmem:[%s4351_s1] sm:$0x7] (!%p191_p2)  ;;  %v289_v3 = vld [vmem:[%s4351_s1 + $0x4] sm:$0x7] (!%p191_p2)  ;;  %vm459_vm0 = vcmask (!%p191_p2), 1046528  }
   0x6   : > { %194 = sbr.rel (%p191_p2) target bundleno = 433 (0x1b1), region = 36  ;;  %v290_v4 = vld [vmem:[%s4351_s1 + $0x8] sm:$0x7] (!%p191_p2)  ;;  %vm704_vm1 = vcmask (!%p191_p2), 1045504   ;;  %vm2231_vm2 = vcmask (!%p191_p2), 130048   ;;  %vm2335_vm3 = vcmask (!%p191_p2), 122880  }
   0x7   : > { %v292_v1 = vshrl.u32 (!%p191_p2), %v291_v0, 7 }
   0x9   : > { %v293_v5 = vsub.s32 (!%p191_p2), 0, %v292_v1  ;;  %v361_v6 = vsub.s32 (!%p191_p2), 1, %v292_v1  ;;  %v606_v7 = vsub.s32 (!%p191_p2), 2, %v292_v1 }
   0xb   : > { %v2634_v8 = vrot.slane (!%p191_p2), %v288_v2, %v293_v5  ;;  %v2636_v9 = vrot.slane (!%p191_p2), %v288_v2, %v361_v6  ;;  %v2638_v10 = vrot.slane (!%p191_p2), %v288_v2, %v606_v7  ;;  %v2640_v11 = vrot.slane (!%p191_p2), %v289_v3, %v293_v5 }
   0xc   : > { %v2644_v14 = vrot.slane (!%p191_p2), %v289_v3, %v361_v6  ;;  %v2646_v15 = vrot.slane (!%p191_p2), %v289_v3, %v606_v7  ;;  %v2648_v16 = vrot.slane (!%p191_p2), %v290_v4, %v293_v5  ;;  %v2650_v17 = vrot.slane (!%p191_p2), %v290_v4, %v361_v6 }
   0xd   : > { %s4357_s19 = smov (!%p221_p3, %s2417_s19), 1  ;;  %v2689_v49 = vrot.slane %v290_v4, %v606_v7 }
   0xe   : > { %s2430_s24 = smul.u32 432, %s4357_s19  ;;  %s2429_s9 = sshll.u32 %s4357_s19, 8 }
   0xf   : > { %s2912_s12 = scalar_lea.vmem %s4354_s4, %s2429_s9  ;;  %s233_s25 = scalar_lea.vmem %s4355_s5, %s4357_s19 }
  0x10   : > { %s2632_s29 = scalar_lea.vmem %s4350_s0, %s2430_s24 }
  0x11   : > { %v234_v12 = vld [vmem:[%s2632_s29] sm:$0xff]  ;;  %v235_v13 = vld [vmem:[%s2632_s29 + $0x8] sm:$0xff]  ;;  %v2653_v18 = vld [vmem:[%s2632_s29 + $0x18] sm:$0xff] }
  0x12   : > { %v2656_v19 = vld [vmem:[%s2632_s29 + $0x20] sm:$0xff]  ;;  %v295_v20 = vmul.f32 %v2634_v8, %v234_v12  ;;  %v363_v21 = vmul.f32 %v2636_v9, %v234_v12  ;;  %v364_v22 = vmul.f32 %v2636_v9, %v235_v13  ;;  %v608_v23 = vmul.f32 %v2638_v10, %v234_v12  ;;  %v2672_v32 = vld [vmem:[%s2632_s29 + $0x30] sm:$0xff]  ;;  %v2683_v42 = vld [vmem:[%s2632_s29 + $0x38] sm:$0xff] }
  0x13   : > { %v609_v24 = vmul.f32 %v2638_v10, %v235_v13  ;;  %v853_v25 = vmul.f32 %v2640_v11, %v2653_v18  ;;  %v921_v26 = vmul.f32 %v2644_v14, %v2653_v18  ;;  %v922_v27 = vmul.f32 %v2644_v14, %v2656_v19  ;;  %v236_v41 = vld [vmem:[%s2632_s29 + $0x10] sm:$0x3]  ;;  %v2700_v58 = vld [vmem:[%s2632_s29 + $0x28] sm:$0x3] }
  0x14   : > { %v460_v28 = vrot.slane %v363_v21, 1  ;;  %v461_v29 = vrot.slane %v364_v22, 1  ;;  %v705_v30 = vrot.slane %v608_v23, 2  ;;  %v1165_v31 = vmul.f32 %v2646_v15, %v2653_v18 }
  0x15   : > { %v706_v33 = vrot.slane %v609_v24, 2  ;;  %v1017_v34 = vrot.slane %v921_v26, 1  ;;  %v1018_v35 = vrot.slane %v922_v27, 1  ;;  %v1166_v36 = vmul.f32 %v2646_v15, %v2656_v19 }
  0x16   : > { %v462_v37 = vsel %vm459_vm0, %v460_v28, %v461_v29  ;;  %v1261_v38 = vrot.slane %v1165_v31, 2  ;;  %v1409_v39 = vmul.f32 %v2648_v16, %v2672_v32  ;;  %v1477_v40 = vmul.f32 %v2650_v17, %v2672_v32 }
  0x17   : > { %v572_v43 = vadd.f32 %v462_v37, %v295_v20  ;;  %v707_v44 = vsel %vm704_vm1, %v705_v30, %v706_v33  ;;  %v1019_v45 = vsel %vm459_vm0, %v1017_v34, %v1018_v35  ;;  %v1262_v46 = vrot.slane %v1166_v36, 2 }
  0x18   : > { %v1478_v47 = vmul.f32 %v2650_v17, %v2683_v42  ;;  %v1573_v48 = vrot.slane %v1477_v40, 1  ;;  %v296_v50 = vmul.f32 %v2634_v8, %v235_v13  ;;  %v365_v53 = vmul.f32 %v2636_v9, %v236_v41  ;;  %v2713_v13 = vld [vmem:[%s2632_s29 + $0x40] sm:$0x3] }
  0x19   : > { %v817_v51 = vadd.f32 %v707_v44, %v572_v43  ;;  %v1263_v52 = vsel %vm704_vm1, %v1261_v38, %v1262_v46  ;;  %v610_v54 = vmul.f32 %v2638_v10, %v236_v41  ;;  %v1721_v56 = vmul.f32 %v2689_v49, %v2672_v32 }
  0x1a   : > { %v1574_v55 = vrot.slane %v1478_v47, 1  ;;  %v1722_v57 = vmul.f32 %v2689_v49, %v2683_v42  ;;  %v854_v59 = vmul.f32 %v2640_v11, %v2656_v19  ;;  %v463_v61 = vrot.slane %v365_v53, 1 }
  0x1b   : > { %v885_v60 = vadd.f32 %v853_v25, %v817_v51  ;;  %v708_v62 = vrot.slane %v610_v54, 2  ;;  %v923_v63 = vmul.f32 %v2644_v14, %v2700_v58  ;;  %v1817_v1 = vrot.slane %v1721_v56, 2  ;;  %v2758_v54 = vld [vmem:[%s4353_s3] ss:$0 sm:$0xff] }
  0x1c   : > { %v1575_v0 = vsel %vm459_vm0, %v1573_v48, %v1574_v55  ;;  %v1818_v2 = vrot.slane %v1722_v57, 2  ;;  %v1167_v3 = vmul.f32 %v2646_v15, %v2700_v58  ;;  %v464_v5 = vsel %vm459_vm0, %v461_v29, %v463_v61  ;;  %v2765_v61 = vld [vmem:[%s2632_s29 + $0x48] sm:$0xff] }
  0x1d   : > { %v1129_v4 = vadd.f32 %v1019_v45, %v885_v60  ;;  %v709_v6 = vsel %vm704_vm1, %v706_v33, %v708_v62  ;;  %v1020_v7 = vrot.slane %v923_v63, 1  ;;  %v573_v20 = vadd.f32 %v464_v5, %v296_v50  ;;  %v2743_v45 = vld [vmem:[%s4352_s2] ss:$0 sm:$0xff] }
  0x1e   : > { %v1819_v12 = vsel %vm704_vm1, %v1817_v1, %v1818_v2  ;;  %v1264_v21 = vrot.slane %v1167_v3, 2  ;;  %v1410_v22 = vmul.f32 %v2648_v16, %v2683_v42  ;;  %v1479_v25 = vmul.f32 %v2650_v17, %v2713_v13 }
  0x1f   : > { %v1373_v23 = vadd.f32 %v1263_v52, %v1129_v4  ;;  %v1021_v24 = vsel %vm459_vm0, %v1018_v35, %v1020_v7  ;;  %v1723_v26 = vmul.f32 %v2689_v49, %v2713_v13  ;;  %v818_v27 = vadd.f32 %v709_v6, %v573_v20  ;;  %v2776_v6 = vld [vmem:[%s2632_s29 + $0x50] sm:$0xff] }
  0x20   : > { %v1265_v28 = vsel %vm704_vm1, %v1262_v46, %v1264_v21  ;;  %v297_v29 = vmul.f32 %v2634_v8, %v2653_v18  ;;  %v366_v30 = vmul.f32 %v2636_v9, %v2653_v18  ;;  %v1576_v33 = vrot.slane %v1479_v25, 1 }
  0x21   : > { %v1441_v31 = vadd.f32 %v1409_v39, %v1373_v23  ;;  %v1820_v34 = vrot.slane %v1723_v26, 2  ;;  %v2729_v35 = vmul.f32 %v2636_v9, %v2656_v19  ;;  %v886_v36 = vadd.f32 %v854_v59, %v818_v27 }
  0x22   : > { %v465_v37 = vrot.slane %v366_v30, 1  ;;  %v611_v38 = vmul.f32 %v2638_v10, %v2653_v18  ;;  %v2735_v40 = vmul.f32 %v2638_v10, %v2656_v19  ;;  %v1577_v43 = vsel %vm459_vm0, %v1574_v55, %v1576_v33 }
  0x23   : > { %v1685_v41 = vadd.f32 %v1575_v0, %v1441_v31  ;;  %v1821_v39 = vsel %vm704_vm1, %v1818_v2, %v1820_v34  ;;  %v466_v44 = vrot.slane %v2729_v35, 1  ;;  %v1130_v46 = vadd.f32 %v1021_v24, %v886_v36 }
  0x24   : > { %v710_v47 = vrot.slane %v611_v38, 2  ;;  %v711_v18 = vrot.slane %v2735_v40, 2  ;;  %v855_v48 = vmul.f32 %v2640_v11, %v2672_v32  ;;  %v924_v52 = vmul.f32 %v2644_v14, %v2672_v32 }
  0x25   : > { %v1929_v50 = vadd.f32 %v1819_v12, %v1685_v41  ;;  %v467_v51 = vsel %vm459_vm0, %v465_v37, %v466_v44  ;;  %v2753_v53 = vmul.f32 %v2644_v14, %v2683_v42  ;;  %v1374_v55 = vadd.f32 %v1265_v28, %v1130_v46 }
  0x26   : > { %v574_v56 = vadd.f32 %v467_v51, %v297_v29  ;;  %v712_v57 = vsel %vm704_vm1, %v710_v47, %v711_v18  ;;  %v1168_v59 = vmul.f32 %v2646_v15, %v2672_v32  ;;  %v1022_v62 = vrot.slane %v924_v52, 1 }
  0x27   : > { %v1968_v60 = vmul.f32 %v2743_v45, %v1929_v50  ;;  %v1023_v63 = vrot.slane %v2753_v53, 1  ;;  %v1169_v0 = vmul.f32 %v2646_v15, %v2683_v42  ;;  %v1442_v1 = vadd.f32 %v1410_v22, %v1374_v55  ;;  %v2804_v50 = vld [vmem:[%s2632_s29 + $0x58] sm:$0x3] }
  0x28   : > { %v819_v2 = vadd.f32 %v712_v57, %v574_v56  ;;  %v1266_v3 = vrot.slane %v1168_v59, 2  ;;  %v1411_v4 = vmul.f32 %v2648_v16, %v2765_v61  ;;  %v1480_v20 = vmul.f32 %v2650_v17, %v2765_v61 }
  0x29   : > { %v2773_v5 = vadd.f32 %v2758_v54, %v1968_v60  ;;  %v1024_v7 = vsel %vm459_vm0, %v1022_v62, %v1023_v63  ;;  %v1267_v12 = vrot.slane %v1169_v0, 2  ;;  %v1686_v21 = vadd.f32 %v1577_v43, %v1442_v1 }
  0x2a   : > { %v887_v23 = vadd.f32 %v855_v48, %v819_v2  ;;  %v1481_v22 = vmul.f32 %v2650_v17, %v2776_v6  ;;  %v1724_v24 = vmul.f32 %v2689_v49, %v2765_v61  ;;  %v1578_v27 = vrot.slane %v1480_v20, 1 }
  0x2b   : > { %v2039_v25 = vsub.f32 0.0, %v2773_v5  ;;  %v1268_v26 = vsel %vm704_vm1, %v1266_v3, %v1267_v12  ;;  %v1725_v28 = vmul.f32 %v2689_v49, %v2776_v6  ;;  %v1930_v29 = vadd.f32 %v1821_v39, %v1686_v21 }
  0x2c   : > { %v1131_v30 = vadd.f32 %v1024_v7, %v887_v23  ;;  %v1579_v31 = vrot.slane %v1481_v22, 1  ;;  %v1822_v33 = vrot.slane %v1724_v24, 2  ;;  %v298_v36 = vmul.f32 %v2634_v8, %v2656_v19 }
  0x2d   : > { %v2071_v34 = vmul.f32 1.442695, %v2039_v25  ;;  %v1823_v35 = vrot.slane %v1725_v28, 2  ;;  %v368_v37 = vmul.f32 %v2636_v9, %v2700_v58  ;;  %v1969_v38 = vmul.f32 %v2743_v45, %v1930_v29 }
  0x2e   : > { %v1375_v40 = vadd.f32 %v1268_v26, %v1131_v30  ;;  %v1580_v41 = vsel %vm459_vm0, %v1578_v27, %v1579_v31  ;;  %v613_v43 = vmul.f32 %v2638_v10, %v2700_v58  ;;  %v856_v47 = vmul.f32 %v2640_v11, %v2683_v42 }
  0x2f   : > { %2439 = vpow2.f32 %v2071_v34  ;;  %v1824_v39 = vsel %vm704_vm1, %v1822_v33, %v1823_v35  ;;  %v468_v46 = vrot.slane %v368_v37, 1  ;;  %v2801_v19 = vadd.f32 %v2758_v54, %v1969_v38 }
  0x30   : > { %v1443_v48 = vadd.f32 %v1411_v4, %v1375_v40  ;;  %v713_v51 = vrot.slane %v613_v43, 2  ;;  %v926_v52 = vmul.f32 %v2644_v14, %v2713_v13  ;;  %v1170_v58 = vmul.f32 %v2646_v15, %v2713_v13 }
  0x31   : > { %v469_v53 = vsel %vm459_vm0, %v466_v44, %v468_v46  ;;  %v1412_v55 = vmul.f32 %v2648_v16, %v2776_v6  ;;  %v1482_v56 = vmul.f32 %v2650_v17, %v2804_v50  ;;  %v2040_v57 = vsub.f32 0.0, %v2801_v19 }
  0x32   : > { %v1687_v59 = vadd.f32 %v1580_v41, %v1443_v48  ;;  %v575_v60 = vadd.f32 %v469_v53, %v298_v36  ;;  %v714_v62 = vsel %vm704_vm1, %v711_v18, %v713_v51  ;;  %v1025_v0 = vrot.slane %v926_v52, 1  ;;  %v2861_v53 = vld [vmem:[%s2632_s29 + $0x60] sm:$0xff] }
  0x33   : > { %v1269_v1 = vrot.slane %v1170_v58, 2  ;;  %v1581_v2 = vrot.slane %v1482_v56, 1  ;;  %v1726_v44 = vmul.f32 %v2689_v49, %v2804_v50  ;;  %v2073_v3 = vmul.f32 1.442695, %v2040_v57 }
  0x34   : > { %v1931_v4 = vadd.f32 %v1824_v39, %v1687_v59  ;;  %v820_v7 = vadd.f32 %v714_v62, %v575_v60  ;;  %v299_v20 = vmul.f32 %v2634_v8, %v2672_v32  ;;  %v1026_v21 = vsel %vm459_vm0, %v1023_v63, %v1025_v0  ;;  %v2871_v0 = vld [vmem:[%s2632_s29 + $0x68] sm:$0xff] }
  0x35   : > { %v1270_v23 = vsel %vm704_vm1, %v1267_v12, %v1269_v1  ;;  %v1582_v22 = vsel %vm459_vm0, %v1579_v31, %v1581_v2  ;;  %v1825_v24 = vrot.slane %v1726_v44, 2  ;;  %2441 = vpow2.f32 %v2073_v3 }
  0x36   : > { %v1970_v18 = vmul.f32 %v2743_v45, %v1931_v4  ;;  %v888_v25 = vadd.f32 %v856_v47, %v820_v7  ;;  %v369_v26 = vmul.f32 %v2636_v9, %v2672_v32  ;;  %v2830_v28 = vmul.f32 %v2636_v9, %v2683_v42 }
  0x37   : > { %v1826_v27 = vsel %vm704_vm1, %v1823_v35, %v1825_v24  ;;  %v614_v63 = vmul.f32 %v2638_v10, %v2672_v32  ;;  %v2836_v12 = vmul.f32 %v2638_v10, %v2683_v42  ;;  %v857_v33 = vmul.f32 %v2640_v11, %v2765_v61 }
  0x38   : > { %v2839_v29 = vadd.f32 %v2758_v54, %v1970_v18  ;;  %v1132_v30 = vadd.f32 %v1026_v21, %v888_v25  ;;  %v470_v31 = vrot.slane %v369_v26, 1  ;;  %v471_v35 = vrot.slane %v2830_v28, 1 }
  0x39   : > { %v2440_v34 = vpop.eup %2439  ;;  %v715_v36 = vrot.slane %v614_v63, 2  ;;  %v716_v37 = vrot.slane %v2836_v12, 2  ;;  %v927_v32 = vmul.f32 %v2644_v14, %v2765_v61  ;;  %v2850_v43 = vmul.f32 %v2644_v14, %v2776_v6 }
  0x3a   : > { %v2135_v38 = vadd.f32 1.0, %v2440_v34  ;;  %v2041_v40 = vsub.f32 0.0, %v2839_v29  ;;  %v1376_v41 = vadd.f32 %v1270_v23, %v1132_v30  ;;  %v472_v39 = vsel %vm459_vm0, %v470_v31, %v471_v35 }
  0x3b   : > { %v717_v46 = vsel %vm704_vm1, %v715_v36, %v716_v37  ;;  %v1027_v47 = vrot.slane %v927_v32, 1  ;;  %v1171_v48 = vmul.f32 %v2646_v15, %v2765_v61  ;;  %v576_v58 = vadd.f32 %v472_v39, %v299_v20 }
  0x3c   : > { %2443 = vrcp.f32 %v2135_v38  ;;  %v2075_v51 = vmul.f32 1.442695, %v2041_v40  ;;  %v1444_v52 = vadd.f32 %v1412_v55, %v1376_v41  ;;  %v1028_v56 = vrot.slane %v2850_v43, 1 }
  0x3d   : > { %v2866_v57 = vmul.f32 %v2646_v15, %v2776_v6  ;;  %v1271_v59 = vrot.slane %v1171_v48, 2  ;;  %v1413_v60 = vmul.f32 %v2648_v16, %v2861_v53  ;;  %v821_v1 = vadd.f32 %v717_v46, %v576_v58 }
  0x3e   : > { %2445 = vpow2.f32 %v2075_v51  ;;  %v1688_v62 = vadd.f32 %v1582_v22, %v1444_v52  ;;  %v1483_v55 = vmul.f32 %v2650_v17, %v2861_v53  ;;  %v1029_v2 = vsel %vm459_vm0, %v1027_v47, %v1028_v56 }
  0x3f   : > { %v1272_v44 = vrot.slane %v2866_v57, 2  ;;  %v1484_v3 = vmul.f32 %v2650_v17, %v2871_v0  ;;  %v1727_v4 = vmul.f32 %v2689_v49, %v2861_v53  ;;  %v2442_v7 = vpop.eup %2441  ;;  %v889_v21 = vadd.f32 %v857_v33, %v821_v1 }
  0x40   : > { %v1932_v20 = vadd.f32 %v1826_v27, %v1688_v62  ;;  %v1583_v23 = vrot.slane %v1483_v55, 1  ;;  %v2883_v22 = vmul.f32 %v2689_v49, %v2871_v0  ;;  %v2136_v24 = vadd.f32 1.0, %v2442_v7 }
  0x41   : > { %v1273_v18 = vsel %vm704_vm1, %v1271_v59, %v1272_v44  ;;  %v1584_v25 = vrot.slane %v1484_v3, 1  ;;  %v1827_v26 = vrot.slane %v1727_v4, 2  ;;  %v1133_v30 = vadd.f32 %v1029_v2, %v889_v21 }
  0x42   : > { %v1971_v63 = vmul.f32 %v2743_v45, %v1932_v20  ;;  %v1828_v31 = vrot.slane %v2883_v22, 2  ;;  %v300_v27 = vmul.f32 %v2634_v8, %v2683_v42  ;;  %2447 = vrcp.f32 %v2136_v24  ;;  %v2903_v42 = vld [vmem:[%s2632_s29 + $0x70] sm:$0x3] }
  0x43   : > { %v1585_v33 = vsel %vm459_vm0, %v1583_v23, %v1584_v25  ;;  %v371_v34 = vmul.f32 %v2636_v9, %v2713_v13  ;;  %v616_v36 = vmul.f32 %v2638_v10, %v2713_v13  ;;  %v1377_v38 = vadd.f32 %v1273_v18, %v1133_v30 }
  0x44   : > { %v2897_v32 = vadd.f32 %v2758_v54, %v1971_v63  ;;  %v1829_v40 = vsel %vm704_vm1, %v1827_v26, %v1828_v31  ;;  %v858_v41 = vmul.f32 %v2640_v11, %v2776_v6  ;;  %v929_v46 = vmul.f32 %v2644_v14, %v2804_v50 }
  0x45   : > { %v473_v43 = vrot.slane %v371_v34, 1  ;;  %v718_v39 = vrot.slane %v616_v36, 2  ;;  %v1173_v47 = vmul.f32 %v2646_v15, %v2804_v50  ;;  %v1445_v51 = vadd.f32 %v1413_v60, %v1377_v38 }
  0x46   : > { %v2444_v13 = vpop.eup %2443  ;;  %v2042_v48 = vsub.f32 0.0, %v2897_v32  ;;  %v1414_v52 = vmul.f32 %v2648_v16, %v2871_v0  ;;  %v1485_v58 = vmul.f32 %v2650_v17, %v2903_v42  ;;  %v1030_v1 = vrot.slane %v929_v46, 1 }
  0x47   : > { %v2199_v57 = vmul.f32 %v2444_v13, %v2773_v5  ;;  %v474_v59 = vsel %vm459_vm0, %v471_v35, %v473_v43  ;;  %v719_v62 = vsel %vm704_vm1, %v716_v37, %v718_v39  ;;  %v1689_v60 = vadd.f32 %v1585_v33, %v1445_v51 }
  0x48   : > { %v2446_v55 = vpop.eup %2445  ;;  %v2077_v2 = vmul.f32 1.442695, %v2042_v48  ;;  %v577_v3 = vadd.f32 %v474_v59, %v300_v27  ;;  %v1274_v4 = vrot.slane %v1173_v47, 2  ;;  %v1031_v5 = vsel %vm459_vm0, %v1028_v56, %v1030_v1  ;;  %v2975_v59 = vld [vmem:[%s2632_s29 + $0x78] sm:$0xff] }
  0x49   : > { %2232 = vst.msk [vmem:[%s2912_s12] sm:$0xff] %vm2231_vm2, %v2199_v57  ;;  %v2264_v7 = vsel %vm2231_vm2, %v2199_v57, 0.0  ;;  %v2137_v20 = vadd.f32 1.0, %v2446_v55  ;;  %v1586_v28 = vrot.slane %v1485_v58, 1  ;;  %v1933_v35 = vadd.f32 %v1829_v40, %v1689_v60 }
  0x4a   : > { %2449 = vpow2.f32 %v2077_v2  ;;  %v822_v21 = vadd.f32 %v719_v62, %v577_v3  ;;  %v1275_v12 = vsel %vm704_vm1, %v1272_v44, %v1274_v4  ;;  %v1729_v23 = vmul.f32 %v2689_v49, %v2903_v42 }
  0x4b   : > { %2451 = vrcp.f32 %v2137_v20  ;;  %v1587_v37 = vsel %vm459_vm0, %v1584_v25, %v1586_v28  ;;  %v301_v22 = vmul.f32 %v2634_v8, %v2765_v61  ;;  %v1972_v24 = vmul.f32 %v2743_v45, %v1933_v35  ;;  %v2987_v35 = vld [vmem:[%s2632_s29 + $0x80] sm:$0xff] }
  0x4c   : > { %v890_v18 = vadd.f32 %v858_v41, %v822_v21  ;;  %v372_v56 = vmul.f32 %v2636_v9, %v2765_v61  ;;  %v2941_v26 = vmul.f32 %v2636_v9, %v2776_v6  ;;  %v2448_v44 = vpop.eup %2447  ;;  %v1830_v63 = vrot.slane %v1729_v23, 2 }
  0x4d   : > { %v617_v25 = vmul.f32 %v2638_v10, %v2765_v61  ;;  %v2947_v30 = vmul.f32 %v2638_v10, %v2776_v6  ;;  %v859_v27 = vmul.f32 %v2640_v11, %v2861_v53  ;;  %v2200_v33 = vmul.f32 %v2448_v44, %v2801_v19 }
  0x4e   : > { %v2953_v34 = vadd.f32 %v2758_v54, %v1972_v24  ;;  %v1134_v36 = vadd.f32 %v1031_v5, %v890_v18  ;;  %v475_v38 = vrot.slane %v372_v56, 1  ;;  %v1831_v40 = vsel %vm704_vm1, %v1828_v31, %v1830_v63 }
  0x4f   : > { %v476_v41 = vrot.slane %v2941_v26, 1  ;;  %v720_v61 = vrot.slane %v617_v25, 2  ;;  %v721_v43 = vrot.slane %v2947_v30, 2  ;;  %2233 = vst.msk [vmem:[%s2912_s12 + $0x8] sm:$0xff] %vm2231_vm2, %v2200_v33  ;;  %v2265_v39 = vsel %vm2231_vm2, %v2200_v33, 0.0 }
  0x50   : > { %v2043_v46 = vsub.f32 0.0, %v2953_v34  ;;  %v1378_v19 = vadd.f32 %v1275_v12, %v1134_v36  ;;  %v930_v47 = vmul.f32 %v2644_v14, %v2861_v53  ;;  %v2266_v13 = vadd.f32 %v2265_v39, %v2264_v7 }
  0x51   : > { %v477_v31 = vsel %vm459_vm0, %v475_v38, %v476_v41  ;;  %v722_v48 = vsel %vm704_vm1, %v720_v61, %v721_v43  ;;  %v2972_v51 = vmul.f32 %v2644_v14, %v2871_v0  ;;  %v1174_v2 = vmul.f32 %v2646_v15, %v2861_v53 }
  0x52   : > { %v2079_v58 = vmul.f32 1.442695, %v2043_v46  ;;  %v1446_v57 = vadd.f32 %v1414_v52, %v1378_v19  ;;  %v578_v62 = vadd.f32 %v477_v31, %v301_v22  ;;  %v1032_v1 = vrot.slane %v930_v47, 1 }
  0x53   : > { %v1033_v55 = vrot.slane %v2972_v51, 1  ;;  %v1175_v60 = vmul.f32 %v2646_v15, %v2871_v0  ;;  %v1415_v3 = vmul.f32 %v2648_v16, %v2975_v59  ;;  %v1486_v52 = vmul.f32 %v2650_v17, %v2975_v59 }
  0x54   : > { %v2450_v4 = vpop.eup %2449  ;;  %2453 = vpow2.f32 %v2079_v58  ;;  %v1690_v7 = vadd.f32 %v1587_v37, %v1446_v57  ;;  %v823_v20 = vadd.f32 %v722_v48, %v578_v62  ;;  %v1276_v12 = vrot.slane %v1174_v2, 2 }
  0x55   : > { %v2452_v5 = vpop.eup %2451  ;;  %v2138_v28 = vadd.f32 1.0, %v2450_v4  ;;  %v1034_v21 = vsel %vm459_vm0, %v1032_v1, %v1033_v55  ;;  %v1277_v23 = vrot.slane %v1175_v60, 2  ;;  %v1487_v37 = vmul.f32 %v2650_v17, %v2987_v35 }
  0x56   : > { %v2201_v22 = vmul.f32 %v2452_v5, %v2839_v29  ;;  %v1934_v24 = vadd.f32 %v1831_v40, %v1690_v7  ;;  %v891_v18 = vadd.f32 %v859_v27, %v823_v20  ;;  %v1588_v44 = vrot.slane %v1486_v52, 1 }
  0x57   : > { %2455 = vrcp.f32 %v2138_v28  ;;  %v1278_v56 = vsel %vm704_vm1, %v1276_v12, %v1277_v23  ;;  %v1730_v63 = vmul.f32 %v2689_v49, %v2975_v59  ;;  %v1589_v29 = vrot.slane %v1487_v37, 1  ;;  %v3026_v28 = vld [vmem:[%s2632_s29 + $0x88] sm:$0x3] }
  0x58   : > { %2234 = vst.msk [vmem:[%s2912_s12 + $0x10] sm:$0xff] %vm2231_vm2, %v2201_v22  ;;  %v2267_v25 = vsel %vm2231_vm2, %v2201_v22, 0.0  ;;  %v1973_v33 = vmul.f32 %v2743_v45, %v1934_v24  ;;  %v1135_v36 = vadd.f32 %v1034_v21, %v891_v18  ;;  %v1731_v27 = vmul.f32 %v2689_v49, %v2987_v35 }
  0x59   : > { %v2268_v38 = vadd.f32 %v2267_v25, %v2266_v13  ;;  %v1832_v40 = vrot.slane %v1730_v63, 2  ;;  %v302_v61 = vmul.f32 %v2634_v8, %v2776_v6  ;;  %v1590_v19 = vsel %vm459_vm0, %v1588_v44, %v1589_v29 }
  0x5a   : > { %v3005_v39 = vadd.f32 %v2758_v54, %v1973_v33  ;;  %v1379_v46 = vadd.f32 %v1278_v56, %v1135_v36  ;;  %v374_v47 = vmul.f32 %v2636_v9, %v2804_v50  ;;  %v1833_v31 = vrot.slane %v1731_v27, 2 }
  0x5b   : > { %v619_v13 = vmul.f32 %v2638_v10, %v2804_v50  ;;  %v860_v48 = vmul.f32 %v2640_v11, %v2871_v0  ;;  %v932_v6 = vmul.f32 %v2644_v14, %v2903_v42  ;;  %v1176_v62 = vmul.f32 %v2646_v15, %v2903_v42 }
  0x5c   : > { %v2044_v51 = vsub.f32 0.0, %v3005_v39  ;;  %v1447_v58 = vadd.f32 %v1415_v3, %v1379_v46  ;;  %v478_v57 = vrot.slane %v374_v47, 1  ;;  %v1834_v1 = vsel %vm704_vm1, %v1832_v40, %v1833_v31 }
  0x5d   : > { %v723_v2 = vrot.slane %v619_v13, 2  ;;  %v1035_v60 = vrot.slane %v932_v6, 1  ;;  %v1416_v50 = vmul.f32 %v2648_v16, %v2987_v35  ;;  %v1279_v5 = vrot.slane %v1176_v62, 2 }
  0x5e   : > { %v2454_v4 = vpop.eup %2453  ;;  %v2081_v7 = vmul.f32 1.442695, %v2044_v51  ;;  %v1691_v20 = vadd.f32 %v1590_v19, %v1447_v58  ;;  %v479_v52 = vsel %vm459_vm0, %v476_v41, %v478_v57  ;;  %v1488_v26 = vmul.f32 %v2650_v17, %v3026_v28 }
  0x5f   : > { %v2139_v3 = vadd.f32 1.0, %v2454_v4  ;;  %v579_v21 = vadd.f32 %v479_v52, %v302_v61  ;;  %v724_v12 = vsel %vm704_vm1, %v721_v43, %v723_v2  ;;  %v1036_v22 = vsel %vm459_vm0, %v1033_v55, %v1035_v60  ;;  %v3078_v4 = vld [vmem:[%s2632_s29 + $0x90] sm:$0xff] }
  0x60   : > { %2457 = vpow2.f32 %v2081_v7  ;;  %v1935_v24 = vadd.f32 %v1834_v1, %v1691_v20  ;;  %v1280_v18 = vsel %vm704_vm1, %v1277_v23, %v1279_v5  ;;  %v1732_v56 = vmul.f32 %v2689_v49, %v3026_v28 }
  0x61   : > { %v2456_v41 = vpop.eup %2455  ;;  %2459 = vrcp.f32 %v2139_v3  ;;  %v824_v37 = vadd.f32 %v724_v12, %v579_v21  ;;  %v303_v30 = vmul.f32 %v2634_v8, %v2861_v53  ;;  %v1591_v44 = vrot.slane %v1488_v26, 1 }
  0x62   : > { %v2202_v43 = vmul.f32 %v2456_v41, %v2897_v32  ;;  %v1974_v55 = vmul.f32 %v2743_v45, %v1935_v24  ;;  %v375_v23 = vmul.f32 %v2636_v9, %v2861_v53  ;;  %v1835_v25 = vrot.slane %v1732_v56, 2 }
  0x63   : > { %v892_v63 = vadd.f32 %v860_v48, %v824_v37  ;;  %v3045_v33 = vmul.f32 %v2636_v9, %v2871_v0  ;;  %v620_v36 = vmul.f32 %v2638_v10, %v2861_v53  ;;  %v1592_v40 = vsel %vm459_vm0, %v1589_v29, %v1591_v44 }
  0x64   : > { %2235 = vst.msk [vmem:[%s2912_s12 + $0x18] sm:$0xff] %vm2231_vm2, %v2202_v43  ;;  %v2269_v27 = vsel %vm2231_vm2, %v2202_v43, 0.0  ;;  %v3053_v32 = vadd.f32 %v2758_v54, %v1974_v55  ;;  %v480_v61 = vrot.slane %v375_v23, 1  ;;  %v1836_v47 = vsel %vm704_vm1, %v1833_v31, %v1835_v25 }
  0x65   : > { %v2270_v46 = vadd.f32 %v2269_v27, %v2268_v38  ;;  %v1136_v19 = vadd.f32 %v1036_v22, %v892_v63  ;;  %v481_v13 = vrot.slane %v3045_v33, 1  ;;  %v3061_v53 = vmul.f32 %v2638_v10, %v2871_v0 }
  0x66   : > { %v2045_v48 = vsub.f32 0.0, %v3053_v32  ;;  %v725_v6 = vrot.slane %v620_v36, 2  ;;  %v861_v51 = vmul.f32 %v2640_v11, %v2975_v59  ;;  %v933_v38 = vmul.f32 %v2644_v14, %v2975_v59 }
  0x67   : > { %v1380_v58 = vadd.f32 %v1280_v18, %v1136_v19  ;;  %v482_v29 = vsel %vm459_vm0, %v480_v61, %v481_v13  ;;  %v3072_v31 = vmul.f32 %v2644_v14, %v2987_v35  ;;  %v726_v1 = vrot.slane %v3061_v53, 2  ;;  %v3087_v18 = vld [vmem:[%s2632_s29 + $0x98] sm:$0xff] }
  0x68   : > { %v2083_v57 = vmul.f32 1.442695, %v2045_v48  ;;  %v580_v62 = vadd.f32 %v482_v29, %v303_v30  ;;  %v1177_v2 = vmul.f32 %v2646_v15, %v2975_v59  ;;  %v1037_v7 = vrot.slane %v933_v38, 1 }
  0x69   : > { %v1448_v60 = vadd.f32 %v1416_v50, %v1380_v58  ;;  %v1038_v20 = vrot.slane %v3072_v31, 1  ;;  %v1178_v52 = vmul.f32 %v2646_v15, %v2987_v35  ;;  %v727_v3 = vsel %vm704_vm1, %v725_v6, %v726_v1 }
  0x6a   : > { %v2458_v5 = vpop.eup %2457  ;;  %2461 = vpow2.f32 %v2083_v57  ;;  %v1281_v21 = vrot.slane %v1177_v2, 2  ;;  %v1417_v12 = vmul.f32 %v2648_v16, %v3078_v4  ;;  %v825_v26 = vadd.f32 %v727_v3, %v580_v62 }
  0x6b   : > { %v2460_v22 = vpop.eup %2459  ;;  %v2140_v24 = vadd.f32 1.0, %v2458_v5  ;;  %v1692_v50 = vadd.f32 %v1592_v40, %v1448_v60  ;;  %v1039_v41 = vsel %vm459_vm0, %v1037_v7, %v1038_v20  ;;  %v1282_v56 = vrot.slane %v1178_v52, 2 }
  0x6c   : > { %v2203_v37 = vmul.f32 %v2460_v22, %v2953_v34  ;;  %v1489_v30 = vmul.f32 %v2650_v17, %v3078_v4  ;;  %v1490_v43 = vmul.f32 %v2650_v17, %v3087_v18  ;;  %v893_v44 = vadd.f32 %v861_v51, %v825_v26  ;;  %v3128_v26 = vld [vmem:[%s2632_s29 + $0xa0] sm:$0x3] }
  0x6d   : > { %2463 = vrcp.f32 %v2140_v24  ;;  %v1936_v55 = vadd.f32 %v1836_v47, %v1692_v50  ;;  %v1733_v23 = vmul.f32 %v2689_v49, %v3078_v4  ;;  %v1283_v25 = vsel %vm704_vm1, %v1281_v21, %v1282_v56 }
  0x6e   : > { %2236 = vst.msk [vmem:[%s2912_s12 + $0x20] sm:$0xff] %vm2231_vm2, %v2203_v37  ;;  %v2271_v63 = vsel %vm2231_vm2, %v2203_v37, 0.0  ;;  %v1593_v34 = vrot.slane %v1489_v30, 1  ;;  %v1594_v36 = vrot.slane %v1490_v43, 1  ;;  %v1137_v61 = vadd.f32 %v1039_v41, %v893_v44 }
  0x6f   : > { %v2272_v27 = vadd.f32 %v2271_v63, %v2270_v46  ;;  %v1975_v40 = vmul.f32 %v2743_v45, %v1936_v55  ;;  %v1734_v19 = vmul.f32 %v2689_v49, %v3087_v18  ;;  %v1837_v48 = vrot.slane %v1733_v23, 2 }
  0x70   : > { %v1595_v47 = vsel %vm459_vm0, %v1593_v34, %v1594_v36  ;;  %v304_v53 = vmul.f32 %v2634_v8, %v2871_v0  ;;  %v377_v6 = vmul.f32 %v2636_v9, %v2903_v42  ;;  %v1381_v58 = vadd.f32 %v1283_v25, %v1137_v61 }
  0x71   : > { %v3110_v51 = vadd.f32 %v2758_v54, %v1975_v40  ;;  %v1838_v46 = vrot.slane %v1734_v19, 2  ;;  %v622_v29 = vmul.f32 %v2638_v10, %v2903_v42  ;;  %v862_v31 = vmul.f32 %v2640_v11, %v2987_v35 }
  0x72   : > { %v483_v38 = vrot.slane %v377_v6, 1  ;;  %v935_v57 = vmul.f32 %v2644_v14, %v3026_v28  ;;  %v1179_v0 = vmul.f32 %v2646_v15, %v3026_v28  ;;  %v1449_v2 = vadd.f32 %v1417_v12, %v1381_v58 }
  0x73   : > { %v2046_v62 = vsub.f32 0.0, %v3110_v51  ;;  %v1839_v60 = vsel %vm704_vm1, %v1837_v48, %v1838_v46  ;;  %v728_v7 = vrot.slane %v622_v29, 2  ;;  %v1418_v21 = vmul.f32 %v2648_v16, %v3087_v18 }
  0x74   : > { %v2462_v52 = vpop.eup %2461  ;;  %v484_v42 = vsel %vm459_vm0, %v481_v13, %v483_v38  ;;  %v1040_v5 = vrot.slane %v935_v57, 1  ;;  %v1284_v3 = vrot.slane %v1179_v0, 2  ;;  %v1693_v50 = vadd.f32 %v1595_v47, %v1449_v2 }
  0x75   : > { %v2141_v22 = vadd.f32 1.0, %v2462_v52  ;;  %v2085_v24 = vmul.f32 1.442695, %v2046_v62  ;;  %v581_v41 = vadd.f32 %v484_v42, %v304_v53  ;;  %v729_v12 = vsel %vm704_vm1, %v726_v1, %v728_v7 }
  0x76   : > { %v1041_v37 = vsel %vm459_vm0, %v1038_v20, %v1040_v5  ;;  %v1285_v33 = vsel %vm704_vm1, %v1282_v56, %v1284_v3  ;;  %v1491_v13 = vmul.f32 %v2650_v17, %v3128_v26  ;;  %v1937_v43 = vadd.f32 %v1839_v60, %v1693_v50  ;;  %v3178_v5 = vld [vmem:[%s2632_s29 + $0xa8] sm:$0xff] }
  0x77   : > { %v2464_v30 = vpop.eup %2463  ;;  %2465 = vrcp.f32 %v2141_v22  ;;  %v826_v55 = vadd.f32 %v729_v12, %v581_v41  ;;  %v1735_v44 = vmul.f32 %v2689_v49, %v3128_v26  ;;  %v305_v1 = vmul.f32 %v2634_v8, %v2975_v59 }
  0x78   : > { %v2204_v23 = vmul.f32 %v2464_v30, %v3005_v39  ;;  %2467 = vpow2.f32 %v2085_v24  ;;  %v1596_v63 = vrot.slane %v1491_v13, 1  ;;  %v1976_v20 = vmul.f32 %v2743_v45, %v1937_v43  ;;  %v3190_v30 = vld [vmem:[%s2632_s29 + $0xb0] sm:$0xff] }
  0x79   : > { %v894_v56 = vadd.f32 %v862_v31, %v826_v55  ;;  %v1840_v25 = vrot.slane %v1735_v44, 2  ;;  %v378_v34 = vmul.f32 %v2636_v9, %v2975_v59  ;;  %v3149_v39 = vmul.f32 %v2636_v9, %v2987_v35 }
  0x7a   : > { %2237 = vst.msk [vmem:[%s2912_s12 + $0x28] sm:$0xff] %vm2231_vm2, %v2204_v23  ;;  %v2273_v40 = vsel %vm2231_vm2, %v2204_v23, 0.0  ;;  %v1597_v61 = vsel %vm459_vm0, %v1594_v36, %v1596_v63  ;;  %v623_v19 = vmul.f32 %v2638_v10, %v2975_v59  ;;  %v3154_v48 = vadd.f32 %v2758_v54, %v1976_v20 }
  0x7b   : > { %v2274_v47 = vadd.f32 %v2273_v40, %v2272_v27  ;;  %v1138_v53 = vadd.f32 %v1041_v37, %v894_v56  ;;  %v1841_v6 = vsel %vm704_vm1, %v1838_v46, %v1840_v25  ;;  %v485_v58 = vrot.slane %v378_v34, 1 }
  0x7c   : > { %v486_v29 = vrot.slane %v3149_v39, 1  ;;  %v3160_v36 = vmul.f32 %v2638_v10, %v2987_v35  ;;  %v730_v38 = vrot.slane %v623_v19, 2  ;;  %v2047_v31 = vsub.f32 0.0, %v3154_v48 }
  0x7d   : > { %v1382_v57 = vadd.f32 %v1285_v33, %v1138_v53  ;;  %v863_v59 = vmul.f32 %v2640_v11, %v3078_v4  ;;  %v936_v27 = vmul.f32 %v2644_v14, %v3078_v4  ;;  %v3173_v62 = vmul.f32 %v2644_v14, %v3087_v18 }
  0x7e   : > { %v487_v46 = vsel %vm459_vm0, %v485_v58, %v486_v29  ;;  %v731_v0 = vrot.slane %v3160_v36, 2  ;;  %v1180_v2 = vmul.f32 %v2646_v15, %v3078_v4  ;;  %v2087_v60 = vmul.f32 1.442695, %v2047_v31 }
  0x7f   : > { %v1450_v7 = vadd.f32 %v1418_v21, %v1382_v57  ;;  %v582_v52 = vadd.f32 %v487_v46, %v305_v1  ;;  %v1042_v42 = vrot.slane %v936_v27, 1  ;;  %v1043_v22 = vrot.slane %v3173_v62, 1 }
  0x80   : > { %v732_v3 = vsel %vm704_vm1, %v730_v38, %v731_v0  ;;  %v3184_v24 = vmul.f32 %v2646_v15, %v3087_v18  ;;  %v1286_v50 = vrot.slane %v1180_v2, 2  ;;  %2469 = vpow2.f32 %v2087_v60 }
  0x81   : > { %v2466_v41 = vpop.eup %2465  ;;  %v1694_v12 = vadd.f32 %v1597_v61, %v1450_v7  ;;  %v827_v37 = vadd.f32 %v732_v3, %v582_v52  ;;  %v1419_v21 = vmul.f32 %v2648_v16, %v3178_v5  ;;  %v1044_v43 = vsel %vm459_vm0, %v1042_v42, %v1043_v22 }
  0x82   : > { %v2468_v33 = vpop.eup %2467  ;;  %v2205_v13 = vmul.f32 %v2466_v41, %v3053_v32  ;;  %v1287_v55 = vrot.slane %v3184_v24, 2  ;;  %v1492_v44 = vmul.f32 %v2650_v17, %v3178_v5  ;;  %v1493_v20 = vmul.f32 %v2650_v17, %v3190_v30 }
  0x83   : > { %v2142_v23 = vadd.f32 1.0, %v2468_v33  ;;  %v1938_v63 = vadd.f32 %v1841_v6, %v1694_v12  ;;  %v895_v1 = vadd.f32 %v863_v59, %v827_v37  ;;  %v1736_v34 = vmul.f32 %v2689_v49, %v3178_v5  ;;  %v3232_v33 = vld [vmem:[%s2632_s29 + $0xb8] sm:$0x3] }
  0x84   : > { %2238 = vst.msk [vmem:[%s2912_s12 + $0x30] sm:$0xff] %vm2231_vm2, %v2205_v13  ;;  %v2275_v56 = vsel %vm2231_vm2, %v2205_v13, 0.0  ;;  %v1288_v32 = vsel %vm704_vm1, %v1286_v50, %v1287_v55  ;;  %v1598_v25 = vrot.slane %v1492_v44, 1  ;;  %v1599_v53 = vrot.slane %v1493_v20, 1 }
  0x85   : > { %v2276_v40 = vadd.f32 %v2275_v56, %v2274_v47  ;;  %2471 = vrcp.f32 %v2142_v23  ;;  %v1977_v61 = vmul.f32 %v2743_v45, %v1938_v63  ;;  %v1139_v19 = vadd.f32 %v1044_v43, %v895_v1 }
  0x86   : > { %v1737_v6 = vmul.f32 %v2689_v49, %v3190_v30  ;;  %v1842_v58 = vrot.slane %v1736_v34, 2  ;;  %v306_v36 = vmul.f32 %v2634_v8, %v2987_v35  ;;  %v380_v57 = vmul.f32 %v2636_v9, %v3026_v28 }
  0x87   : > { %v3210_v38 = vadd.f32 %v2758_v54, %v1977_v61  ;;  %v1383_v31 = vadd.f32 %v1288_v32, %v1139_v19  ;;  %v625_v47 = vmul.f32 %v2638_v10, %v3026_v28  ;;  %v1600_v59 = vsel %vm459_vm0, %v1598_v25, %v1599_v53 }
  0x88   : > { %v1843_v27 = vrot.slane %v1737_v6, 2  ;;  %v864_v46 = vmul.f32 %v2640_v11, %v3087_v18  ;;  %v938_v35 = vmul.f32 %v2644_v14, %v3128_v26  ;;  %v488_v60 = vrot.slane %v380_v57, 1 }
  0x89   : > { %v2048_v62 = vsub.f32 0.0, %v3210_v38  ;;  %v1451_v2 = vadd.f32 %v1419_v21, %v1383_v31  ;;  %v733_v7 = vrot.slane %v625_v47, 2  ;;  %v1182_v28 = vmul.f32 %v2646_v15, %v3128_v26 }
  0x8a   : > { %v1844_v52 = vsel %vm704_vm1, %v1842_v58, %v1843_v27  ;;  %v1045_v42 = vrot.slane %v938_v35, 1  ;;  %v1420_v3 = vmul.f32 %v2648_v16, %v3190_v30  ;;  %v2470_v24 = vpop.eup %2469  ;;  %v489_v12 = vsel %vm459_vm0, %v486_v29, %v488_v60 }
  0x8b   : > { %v2089_v50 = vmul.f32 1.442695, %v2048_v62  ;;  %v1695_v41 = vadd.f32 %v1600_v59, %v1451_v2  ;;  %v734_v37 = vsel %vm704_vm1, %v731_v0, %v733_v7  ;;  %v2143_v21 = vadd.f32 1.0, %v2470_v24 }
  0x8c   : > { %v583_v13 = vadd.f32 %v489_v12, %v306_v36  ;;  %v1046_v43 = vsel %vm459_vm0, %v1043_v22, %v1045_v42  ;;  %v1289_v44 = vrot.slane %v1182_v28, 2  ;;  %v1494_v63 = vmul.f32 %v2650_v17, %v3232_v33 }
  0x8d   : > { %2473 = vpow2.f32 %v2089_v50  ;;  %v1939_v23 = vadd.f32 %v1844_v52, %v1695_v41  ;;  %v1738_v1 = vmul.f32 %v2689_v49, %v3232_v33  ;;  %v307_v0 = vmul.f32 %v2634_v8, %v3078_v4  ;;  %v3288_v41 = vld [vmem:[%s2632_s29 + $0xc0] sm:$0xff] }
  0x8e   : > { %2475 = vrcp.f32 %v2143_v21  ;;  %v828_v39 = vadd.f32 %v734_v37, %v583_v13  ;;  %v1290_v29 = vsel %vm704_vm1, %v1287_v55, %v1289_v44  ;;  %v1601_v56 = vrot.slane %v1494_v63, 1 }
  0x8f   : > { %v2472_v20 = vpop.eup %2471  ;;  %v1978_v22 = vmul.f32 %v2743_v45, %v1939_v23  ;;  %v1845_v32 = vrot.slane %v1738_v1, 2  ;;  %v381_v25 = vmul.f32 %v2636_v9, %v3078_v4  ;;  %v3248_v19 = vmul.f32 %v2636_v9, %v3087_v18  ;;  %v3296_v1 = vld [vmem:[%s2632_s29 + $0xc8] sm:$0xff] }
  0x90   : > { %v2206_v34 = vmul.f32 %v2472_v20, %v3110_v51  ;;  %v896_v61 = vadd.f32 %v864_v46, %v828_v39  ;;  %v626_v55 = vmul.f32 %v2638_v10, %v3078_v4  ;;  %v1602_v45 = vsel %vm459_vm0, %v1599_v53, %v1601_v56 }
  0x91   : > { %v3253_v6 = vadd.f32 %v2758_v54, %v1978_v22  ;;  %v1846_v58 = vsel %vm704_vm1, %v1843_v27, %v1845_v32  ;;  %v490_v36 = vrot.slane %v381_v25, 1  ;;  %v491_v57 = vrot.slane %v3248_v19, 1 }
  0x92   : > { %2239 = vst.msk [vmem:[%s2912_s12 + $0x38] sm:$0xff] %vm2231_vm2, %v2206_v34  ;;  %v2277_v51 = vsel %vm2231_vm2, %v2206_v34, 0.0  ;;  %v1140_v31 = vadd.f32 %v1046_v43, %v896_v61  ;;  %v3263_v47 = vmul.f32 %v2638_v10, %v3087_v18  ;;  %v735_v59 = vrot.slane %v626_v55, 2  ;;  %v3314_v55 = vld [vmem:[%s4352_s2] ss:$0 sm:$0xff] }
  0x93   : > { %v2278_v4 = vadd.f32 %v2277_v51, %v2276_v40  ;;  %v2049_v54 = vsub.f32 0.0, %v3253_v6  ;;  %v865_v53 = vmul.f32 %v2640_v11, %v3178_v5  ;;  %v492_v46 = vsel %vm459_vm0, %v490_v36, %v491_v57 }
  0x94   : > { %v1384_v27 = vadd.f32 %v1290_v29, %v1140_v31  ;;  %v736_v35 = vrot.slane %v3263_v47, 2  ;;  %v939_v62 = vmul.f32 %v2644_v14, %v3178_v5  ;;  %v584_v60 = vadd.f32 %v492_v46, %v307_v0 }
  0x95   : > { %v2091_v2 = vmul.f32 1.442695, %v2049_v54  ;;  %v3276_v40 = vmul.f32 %v2644_v14, %v3190_v30  ;;  %v1183_v7 = vmul.f32 %v2646_v15, %v3178_v5  ;;  %v3285_v24 = vmul.f32 %v2646_v15, %v3190_v30 }
  0x96   : > { %v1452_v52 = vadd.f32 %v1420_v3, %v1384_v27  ;;  %v737_v42 = vsel %vm704_vm1, %v735_v59, %v736_v35  ;;  %v1047_v28 = vrot.slane %v939_v62, 1  ;;  %v1421_v23 = vmul.f32 %v2648_v16, %v3288_v41  ;;  %v3327_v59 = vld [vmem:[%s4353_s3] ss:$0 sm:$0xff] }
  0x97   : > { %v2474_v50 = vpop.eup %2473  ;;  %2477 = vpow2.f32 %v2091_v2  ;;  %v829_v12 = vadd.f32 %v737_v42, %v584_v60  ;;  %v1048_v37 = vrot.slane %v3276_v40, 1  ;;  %v1291_v21 = vrot.slane %v1183_v7, 2 }
  0x98   : > { %v2476_v3 = vpop.eup %2475  ;;  %v2144_v13 = vadd.f32 1.0, %v2474_v50  ;;  %v1696_v43 = vadd.f32 %v1602_v45, %v1452_v52  ;;  %v1292_v44 = vrot.slane %v3285_v24, 2  ;;  %v1495_v0 = vmul.f32 %v2650_v17, %v3288_v41 }
  0x99   : > { %v2207_v63 = vmul.f32 %v2476_v3, %v3154_v48  ;;  %v897_v39 = vadd.f32 %v865_v53, %v829_v12  ;;  %v1049_v29 = vsel %vm459_vm0, %v1047_v28, %v1048_v37  ;;  %v3304_v56 = vmul.f32 %v2650_v17, %v3296_v1 }
  0x9a   : > { %2479 = vrcp.f32 %v2144_v13  ;;  %v1940_v20 = vadd.f32 %v1846_v58, %v1696_v43  ;;  %v1293_v22 = vsel %vm704_vm1, %v1291_v21, %v1292_v44  ;;  %v1603_v25 = vrot.slane %v1495_v0, 1  ;;  %v3349_v43 = vld [vmem:[%s2632_s29 + $0xd0] sm:$0x3] }
  0x9b   : > { %2240 = vst.msk [vmem:[%s2912_s12 + $0x40] sm:$0xff] %vm2231_vm2, %v2207_v63  ;;  %v2279_v48 = vsel %vm2231_vm2, %v2207_v63, 0.0  ;;  %v1141_v32 = vadd.f32 %v1049_v29, %v897_v39  ;;  %v1739_v34 = vmul.f32 %v2689_v49, %v3288_v41  ;;  %v1604_v58 = vrot.slane %v3304_v56, 1 }
  0x9c   : > { %v2280_v61 = vadd.f32 %v2279_v48, %v2278_v4  ;;  %v1979_v45 = vmul.f32 %v3314_v55, %v1940_v20  ;;  %v1740_v36 = vmul.f32 %v2689_v49, %v3296_v1  ;;  %v308_v54 = vmul.f32 %v2634_v8, %v3087_v18 }
  0x9d   : > { %v1385_v51 = vadd.f32 %v1293_v22, %v1141_v32  ;;  %v1847_v31 = vrot.slane %v1739_v34, 2  ;;  %v383_v4 = vmul.f32 %v2636_v9, %v3128_v26  ;;  %v1605_v27 = vsel %vm459_vm0, %v1603_v25, %v1604_v58 }
  0x9e   : > { %v3330_v53 = vadd.f32 %v3327_v59, %v1979_v45  ;;  %v1848_v46 = vrot.slane %v1740_v36, 2  ;;  %v628_v62 = vmul.f32 %v2638_v10, %v3128_v26  ;;  %v866_v60 = vmul.f32 %v2640_v11, %v3190_v30 }
  0x9f   : > { %v1453_v2 = vadd.f32 %v1421_v23, %v1385_v51  ;;  %v493_v18 = vrot.slane %v383_v4, 1  ;;  %v941_v40 = vmul.f32 %v2644_v14, %v3232_v33  ;;  %v1185_v28 = vmul.f32 %v2646_v15, %v3232_v33 }
  0xa0   : > { %v2050_v7 = vsub.f32 0.0, %v3330_v53  ;;  %v1849_v52 = vsel %vm704_vm1, %v1847_v31, %v1848_v46  ;;  %v738_v42 = vrot.slane %v628_v62, 2  ;;  %v1422_v21 = vmul.f32 %v2648_v16, %v3296_v1 }
  0xa1   : > { %v2478_v24 = vpop.eup %2477  ;;  %v1697_v50 = vadd.f32 %v1605_v27, %v1453_v2  ;;  %v494_v26 = vsel %vm459_vm0, %v491_v57, %v493_v18  ;;  %v1050_v12 = vrot.slane %v941_v40, 1  ;;  %v1294_v19 = vrot.slane %v1185_v28, 2 }
  0xa2   : > { %v2145_v3 = vadd.f32 1.0, %v2478_v24  ;;  %v2093_v13 = vmul.f32 1.442695, %v2050_v7  ;;  %v585_v23 = vadd.f32 %v494_v26, %v308_v54  ;;  %v739_v63 = vsel %vm704_vm1, %v736_v35, %v738_v42  ;;  %v3401_v26 = vld [vmem:[%s2632_s29 + $0xd8] sm:$0xff] }
  0xa3   : > { %v1941_v39 = vadd.f32 %v1849_v52, %v1697_v50  ;;  %v1051_v29 = vsel %vm459_vm0, %v1048_v37, %v1050_v12  ;;  %v1497_v57 = vmul.f32 %v2650_v17, %v3349_v43  ;;  %v1741_v22 = vmul.f32 %v2689_v49, %v3349_v43 }
  0xa4   : > { %v2480_v0 = vpop.eup %2479  ;;  %2481 = vrcp.f32 %v2145_v3  ;;  %v830_v20 = vadd.f32 %v739_v63, %v585_v23  ;;  %v309_v56 = vmul.f32 %v2634_v8, %v3178_v5  ;;  %v1295_v37 = vsel %vm704_vm1, %v1292_v44, %v1294_v19 }
  0xa5   : > { %v2208_v47 = vmul.f32 %v2480_v0, %v3210_v38  ;;  %2483 = vpow2.f32 %v2093_v13  ;;  %v1980_v35 = vmul.f32 %v3314_v55, %v1941_v39  ;;  %v1606_v32 = vrot.slane %v1497_v57, 1  ;;  %v3415_v0 = vld [vmem:[%s2632_s29 + $0xe0] sm:$0xff] }
  0xa6   : > { %v898_v48 = vadd.f32 %v866_v60, %v830_v20  ;;  %v1850_v25 = vrot.slane %v1741_v22, 2  ;;  %v384_v34 = vmul.f32 %v2636_v9, %v3178_v5  ;;  %v3374_v38 = vmul.f32 %v2636_v9, %v3190_v30 }
  0xa7   : > { %2241 = vst.msk [vmem:[%s2912_s12 + $0x48] sm:$0xff] %vm2231_vm2, %v2208_v47  ;;  %v2281_v45 = vsel %vm2231_vm2, %v2208_v47, 0.0  ;;  %v3370_v36 = vadd.f32 %v3327_v59, %v1980_v35  ;;  %v629_v44 = vmul.f32 %v2638_v10, %v3178_v5  ;;  %v1607_v54 = vsel %vm459_vm0, %v1604_v58, %v1606_v32 }
  0xa8   : > { %v2282_v51 = vadd.f32 %v2281_v45, %v2280_v61  ;;  %v1142_v31 = vadd.f32 %v1051_v29, %v898_v48  ;;  %v1851_v4 = vsel %vm704_vm1, %v1848_v46, %v1850_v25  ;;  %v495_v62 = vrot.slane %v384_v34, 1 }
  0xa9   : > { %v2051_v27 = vsub.f32 0.0, %v3370_v36  ;;  %v496_v2 = vrot.slane %v3374_v38, 1  ;;  %v3384_v18 = vmul.f32 %v2638_v10, %v3190_v30  ;;  %v740_v40 = vrot.slane %v629_v44, 2 }
  0xaa   : > { %v1386_v60 = vadd.f32 %v1295_v37, %v1142_v31  ;;  %v867_v5 = vmul.f32 %v2640_v11, %v3288_v41  ;;  %v942_v61 = vmul.f32 %v2644_v14, %v3288_v41  ;;  %v3396_v52 = vmul.f32 %v2644_v14, %v3296_v1 }
  0xab   : > { %v2095_v58 = vmul.f32 1.442695, %v2051_v27  ;;  %v497_v46 = vsel %vm459_vm0, %v495_v62, %v496_v2  ;;  %v741_v7 = vrot.slane %v3384_v18, 2  ;;  %v1186_v50 = vmul.f32 %v2646_v15, %v3288_v41 }
  0xac   : > { %v1454_v42 = vadd.f32 %v1422_v21, %v1386_v60  ;;  %v586_v28 = vadd.f32 %v497_v46, %v309_v56  ;;  %v1052_v24 = vrot.slane %v942_v61, 1  ;;  %v1053_v3 = vrot.slane %v3396_v52, 1 }
  0xad   : > { %2485 = vpow2.f32 %v2095_v58  ;;  %v742_v12 = vsel %vm704_vm1, %v740_v40, %v741_v7  ;;  %v3409_v13 = vmul.f32 %v2646_v15, %v3296_v1  ;;  %v1296_v39 = vrot.slane %v1186_v50, 2 }
  0xae   : > { %v2482_v21 = vpop.eup %2481  ;;  %v1698_v23 = vadd.f32 %v1607_v54, %v1454_v42  ;;  %v831_v63 = vadd.f32 %v742_v12, %v586_v28  ;;  %v1423_v29 = vmul.f32 %v2648_v16, %v3401_v26  ;;  %v1054_v20 = vsel %vm459_vm0, %v1052_v24, %v1053_v3 }
  0xaf   : > { %v2484_v19 = vpop.eup %2483  ;;  %v2209_v57 = vmul.f32 %v2482_v21, %v3253_v6  ;;  %v1297_v22 = vrot.slane %v3409_v13, 2  ;;  %v1498_v56 = vmul.f32 %v2650_v17, %v3401_v26  ;;  %v1499_v48 = vmul.f32 %v2650_v17, %v3415_v0 }
  0xb0   : > { %v2146_v47 = vadd.f32 1.0, %v2484_v19  ;;  %v1942_v35 = vadd.f32 %v1851_v4, %v1698_v23  ;;  %v899_v37 = vadd.f32 %v867_v5, %v831_v63  ;;  %v1742_v34 = vmul.f32 %v2689_v49, %v3401_v26 }
  0xb1   : > { %2242 = vst.msk [vmem:[%s2912_s12 + $0x50] sm:$0xff] %vm2231_vm2, %v2209_v57  ;;  %v2283_v32 = vsel %vm2231_vm2, %v2209_v57, 0.0  ;;  %v1298_v6 = vsel %vm704_vm1, %v1296_v39, %v1297_v22  ;;  %v1608_v25 = vrot.slane %v1498_v56, 1  ;;  %v1609_v54 = vrot.slane %v1499_v48, 1 }
  0xb2   : > { %v2284_v45 = vadd.f32 %v2283_v32, %v2282_v51  ;;  %2487 = vrcp.f32 %v2146_v47  ;;  %v1981_v44 = vmul.f32 %v3314_v55, %v1942_v35  ;;  %v1143_v31 = vadd.f32 %v1054_v20, %v899_v37 }
  0xb3   : > { %v1743_v4 = vmul.f32 %v2689_v49, %v3415_v0  ;;  %v1852_v27 = vrot.slane %v1742_v34, 2  ;;  %v310_v62 = vmul.f32 %v2634_v8, %v3190_v30  ;;  %v386_v5 = vmul.f32 %v2636_v9, %v3232_v33 }
  0xb4   : > { %v3435_v60 = vadd.f32 %v3327_v59, %v1981_v44  ;;  %v1387_v40 = vadd.f32 %v1298_v6, %v1143_v31  ;;  %v631_v51 = vmul.f32 %v2638_v10, %v3232_v33  ;;  %v1610_v61 = vsel %vm459_vm0, %v1608_v25, %v1609_v54 }
  0xb5   : > { %v1853_v58 = vrot.slane %v1743_v4, 2  ;;  %v868_v46 = vmul.f32 %v2640_v11, %v3296_v1  ;;  %v944_v30 = vmul.f32 %v2644_v14, %v3349_v43  ;;  %v498_v28 = vrot.slane %v386_v5, 1 }
  0xb6   : > { %v2052_v52 = vsub.f32 0.0, %v3435_v60  ;;  %v1455_v42 = vadd.f32 %v1423_v29, %v1387_v40  ;;  %v743_v24 = vrot.slane %v631_v51, 2  ;;  %v1188_v33 = vmul.f32 %v2646_v15, %v3349_v43  ;;  %v3456_v29 = vld [vmem:[%s2632_s29 + $0xe8] sm:$0x3] }
  0xb7   : > { %v2486_v50 = vpop.eup %2485  ;;  %v1854_v12 = vsel %vm704_vm1, %v1852_v27, %v1853_v58  ;;  %v1055_v13 = vrot.slane %v944_v30, 1  ;;  %v1424_v21 = vmul.f32 %v2648_v16, %v3415_v0  ;;  %v499_v19 = vsel %vm459_vm0, %v496_v2, %v498_v28 }
  0xb8   : > { %v2147_v23 = vadd.f32 1.0, %v2486_v50  ;;  %v2097_v63 = vmul.f32 1.442695, %v2052_v52  ;;  %v1699_v39 = vadd.f32 %v1610_v61, %v1455_v42  ;;  %v587_v57 = vadd.f32 %v499_v19, %v310_v62  ;;  %v3513_v19 = vld [vmem:[%s2632_s29 + $0xf0] sm:$0xff] }
  0xb9   : > { %v744_v20 = vsel %vm704_vm1, %v741_v7, %v743_v24  ;;  %v1056_v56 = vsel %vm459_vm0, %v1053_v3, %v1055_v13  ;;  %v1299_v47 = vrot.slane %v1188_v33, 2  ;;  %v1500_v37 = vmul.f32 %v2650_v17, %v3456_v29 }
  0xba   : > { %2489 = vrcp.f32 %v2147_v23  ;;  %v1943_v35 = vadd.f32 %v1854_v12, %v1699_v39  ;;  %v1744_v38 = vmul.f32 %v2689_v49, %v3456_v29  ;;  %v832_v2 = vadd.f32 %v744_v20, %v587_v57 }
  0xbb   : > { %2491 = vpow2.f32 %v2097_v63  ;;  %v1300_v48 = vsel %vm704_vm1, %v1297_v22, %v1299_v47  ;;  %v311_v18 = vmul.f32 %v2634_v8, %v3288_v41  ;;  %v1611_v32 = vrot.slane %v1500_v37, 1 }
  0xbc   : > { %v2488_v7 = vpop.eup %2487  ;;  %v1982_v3 = vmul.f32 %v3314_v55, %v1943_v35  ;;  %v1855_v6 = vrot.slane %v1744_v38, 2  ;;  %v387_v25 = vmul.f32 %v2636_v9, %v3288_v41  ;;  %v900_v44 = vadd.f32 %v868_v46, %v832_v2 }
  0xbd   : > { %v2210_v34 = vmul.f32 %v2488_v7, %v3330_v53  ;;  %v3475_v31 = vmul.f32 %v2636_v9, %v3296_v1  ;;  %v632_v22 = vmul.f32 %v2638_v10, %v3288_v41  ;;  %v1612_v27 = vsel %vm459_vm0, %v1609_v54, %v1611_v32 }
  0xbe   : > { %v3480_v4 = vadd.f32 %v3327_v59, %v1982_v3  ;;  %v1856_v62 = vsel %vm704_vm1, %v1853_v58, %v1855_v6  ;;  %v500_v40 = vrot.slane %v387_v25, 1  ;;  %v1144_v5 = vadd.f32 %v1056_v56, %v900_v44 }
  0xbf   : > { %2243 = vst.msk [vmem:[%s2912_s12 + $0x58] sm:$0xff] %vm2231_vm2, %v2210_v34  ;;  %v2285_v53 = vsel %vm2231_vm2, %v2210_v34, 0.0  ;;  %v501_v51 = vrot.slane %v3475_v31, 1  ;;  %v3490_v61 = vmul.f32 %v2638_v10, %v3296_v1  ;;  %v745_v30 = vrot.slane %v632_v22, 2 }
  0xc0   : > { %v2286_v41 = vadd.f32 %v2285_v53, %v2284_v45  ;;  %v2053_v46 = vsub.f32 0.0, %v3480_v4  ;;  %v869_v54 = vmul.f32 %v2640_v11, %v3401_v26  ;;  %v1388_v58 = vadd.f32 %v1300_v48, %v1144_v5  ;;  %v3521_v48 = vld [vmem:[%s2632_s29 + $0xf8] sm:$0xff] }
  0xc1   : > { %v502_v52 = vsel %vm459_vm0, %v500_v40, %v501_v51  ;;  %v746_v42 = vrot.slane %v3490_v61, 2  ;;  %v945_v28 = vmul.f32 %v2644_v14, %v3401_v26  ;;  %v3503_v45 = vmul.f32 %v2644_v14, %v3415_v0 }
  0xc2   : > { %v2099_v24 = vmul.f32 1.442695, %v2053_v46  ;;  %v588_v50 = vadd.f32 %v502_v52, %v311_v18  ;;  %v1189_v12 = vmul.f32 %v2646_v15, %v3401_v26  ;;  %v1456_v13 = vadd.f32 %v1424_v21, %v1388_v58 }
  0xc3   : > { %v747_v33 = vsel %vm704_vm1, %v745_v30, %v746_v42  ;;  %v1057_v23 = vrot.slane %v945_v28, 1  ;;  %v3510_v63 = vmul.f32 %v2646_v15, %v3415_v0  ;;  %v1058_v20 = vrot.slane %v3503_v45, 1 }
  0xc4   : > { %v2490_v39 = vpop.eup %2489  ;;  %2493 = vpow2.f32 %v2099_v24  ;;  %v833_v57 = vadd.f32 %v747_v33, %v588_v50  ;;  %v1301_v56 = vrot.slane %v1189_v12, 2  ;;  %v1700_v35 = vadd.f32 %v1612_v27, %v1456_v13 }
  0xc5   : > { %v2492_v47 = vpop.eup %2491  ;;  %v2211_v21 = vmul.f32 %v2490_v39, %v3370_v36  ;;  %v1302_v37 = vrot.slane %v3510_v63, 2  ;;  %v1425_v38 = vmul.f32 %v2648_v16, %v3513_v19  ;;  %v1059_v7 = vsel %vm459_vm0, %v1057_v23, %v1058_v20 }
  0xc6   : > { %v2148_v2 = vadd.f32 1.0, %v2492_v47  ;;  %v901_v18 = vadd.f32 %v869_v54, %v833_v57  ;;  %v1501_v3 = vmul.f32 %v2650_v17, %v3513_v19  ;;  %v1944_v36 = vadd.f32 %v1856_v62, %v1700_v35 }
  0xc7   : > { %2244 = vst.msk [vmem:[%s2912_s12 + $0x60] sm:$0xff] %vm2231_vm2, %v2211_v21  ;;  %v2287_v32 = vsel %vm2231_vm2, %v2211_v21, 0.0  ;;  %v1303_v6 = vsel %vm704_vm1, %v1301_v56, %v1302_v37  ;;  %v1502_v25 = vmul.f32 %v2650_v17, %v3521_v48  ;;  %v1745_v53 = vmul.f32 %v2689_v49, %v3513_v19  ;;  %v3562_v21 = vld [vmem:[%s2632_s29 + $0x100] sm:$0x3] }
  0xc8   : > { %v2288_v34 = vadd.f32 %v2287_v32, %v2286_v41  ;;  %2495 = vrcp.f32 %v2148_v2  ;;  %v1145_v44 = vadd.f32 %v1059_v7, %v901_v18  ;;  %v1613_v22 = vrot.slane %v1501_v3, 1 }
  0xc9   : > { %v1983_v27 = vmul.f32 %v3314_v55, %v1944_v36  ;;  %v1614_v40 = vrot.slane %v1502_v25, 1  ;;  %v1746_v5 = vmul.f32 %v2689_v49, %v3521_v48  ;;  %v312_v62 = vmul.f32 %v2634_v8, %v3296_v1 }
  0xca   : > { %v1389_v61 = vadd.f32 %v1303_v6, %v1145_v44  ;;  %v389_v46 = vmul.f32 %v2636_v9, %v3349_v43  ;;  %v634_v41 = vmul.f32 %v2638_v10, %v3349_v43  ;;  %v1857_v58 = vrot.slane %v1745_v53, 2 }
  0xcb   : > { %v3544_v30 = vadd.f32 %v3327_v59, %v1983_v27  ;;  %v1615_v54 = vsel %vm459_vm0, %v1613_v22, %v1614_v40  ;;  %v1858_v52 = vrot.slane %v1746_v5, 2  ;;  %v870_v1 = vmul.f32 %v2640_v11, %v3415_v0 }
  0xcc   : > { %v1457_v28 = vadd.f32 %v1425_v38, %v1389_v61  ;;  %v503_v24 = vrot.slane %v389_v46, 1  ;;  %v748_v50 = vrot.slane %v634_v41, 2  ;;  %v947_v43 = vmul.f32 %v2644_v14, %v3456_v29 }
  0xcd   : > { %v2054_v45 = vsub.f32 0.0, %v3544_v30  ;;  %v1859_v12 = vsel %vm704_vm1, %v1857_v58, %v1858_v52  ;;  %v1191_v13 = vmul.f32 %v2646_v15, %v3456_v29  ;;  %v1426_v57 = vmul.f32 %v2648_v16, %v3521_v48 }
  0xce   : > { %v2494_v33 = vpop.eup %2493  ;;  %v1701_v23 = vadd.f32 %v1615_v54, %v1457_v28  ;;  %v504_v63 = vsel %vm459_vm0, %v501_v51, %v503_v24  ;;  %v749_v39 = vsel %vm704_vm1, %v746_v42, %v748_v50  ;;  %v1060_v38 = vrot.slane %v947_v43, 1 }
  0xcf   : > { %v2149_v56 = vadd.f32 1.0, %v2494_v33  ;;  %v2101_v47 = vmul.f32 1.442695, %v2054_v45  ;;  %v589_v35 = vadd.f32 %v504_v63, %v312_v62  ;;  %v1304_v18 = vrot.slane %v1191_v13, 2  ;;  %v3611_v63 = vld [vmem:[%s2632_s29 + $0x108] sm:$0xff] }
  0xd0   : > { %v1945_v2 = vadd.f32 %v1859_v12, %v1701_v23  ;;  %v1503_v7 = vmul.f32 %v2650_v17, %v3562_v21  ;;  %v1747_v31 = vmul.f32 %v2689_v49, %v3562_v21  ;;  %v1061_v42 = vsel %vm459_vm0, %v1058_v20, %v1060_v38 }
  0xd1   : > { %2497 = vrcp.f32 %v2149_v56  ;;  %v834_v51 = vadd.f32 %v749_v39, %v589_v35  ;;  %v313_v3 = vmul.f32 %v2634_v8, %v3401_v26  ;;  %v1305_v6 = vsel %vm704_vm1, %v1302_v37, %v1304_v18 }
  0xd2   : > { %v2496_v32 = vpop.eup %2495  ;;  %2499 = vpow2.f32 %v2101_v47  ;;  %v1984_v36 = vmul.f32 %v3314_v55, %v1945_v2  ;;  %v1616_v25 = vrot.slane %v1503_v7, 1  ;;  %v1860_v27 = vrot.slane %v1747_v31, 2 }
  0xd3   : > { %v2212_v44 = vmul.f32 %v2496_v32, %v3435_v60  ;;  %v902_v22 = vadd.f32 %v870_v1, %v834_v51  ;;  %v390_v53 = vmul.f32 %v2636_v9, %v3401_v26  ;;  %v3582_v61 = vmul.f32 %v2636_v9, %v3415_v0  ;;  %v3625_v51 = vld [vmem:[%s2632_s29 + $0x110] sm:$0xff] }
  0xd4   : > { %v3577_v5 = vadd.f32 %v3327_v59, %v1984_v36  ;;  %v1617_v20 = vsel %vm459_vm0, %v1614_v40, %v1616_v25  ;;  %v635_v37 = vmul.f32 %v2638_v10, %v3401_v26  ;;  %v1861_v46 = vsel %vm704_vm1, %v1858_v52, %v1860_v27 }
  0xd5   : > { %2245 = vst.msk [vmem:[%s2912_s12 + $0x68] sm:$0xff] %vm2231_vm2, %v2212_v44  ;;  %v2289_v60 = vsel %vm2231_vm2, %v2212_v44, 0.0  ;;  %v1146_v62 = vadd.f32 %v1061_v42, %v902_v22  ;;  %v505_v41 = vrot.slane %v390_v53, 1  ;;  %v506_v40 = vrot.slane %v3582_v61, 1 }
  0xd6   : > { %v2290_v54 = vadd.f32 %v2289_v60, %v2288_v34  ;;  %v2055_v58 = vsub.f32 0.0, %v3577_v5  ;;  %v3594_v28 = vmul.f32 %v2638_v10, %v3415_v0  ;;  %v750_v26 = vrot.slane %v635_v37, 2 }
  0xd7   : > { %v1390_v24 = vadd.f32 %v1305_v6, %v1146_v62  ;;  %v871_v50 = vmul.f32 %v2640_v11, %v3513_v19  ;;  %v948_v1 = vmul.f32 %v2644_v14, %v3513_v19  ;;  %v507_v34 = vsel %vm459_vm0, %v505_v41, %v506_v40 }
  0xd8   : > { %v2103_v52 = vmul.f32 1.442695, %v2055_v58  ;;  %v751_v45 = vrot.slane %v3594_v28, 2  ;;  %v3606_v12 = vmul.f32 %v2644_v14, %v3521_v48  ;;  %v590_v13 = vadd.f32 %v507_v34, %v313_v3 }
  0xd9   : > { %v1458_v43 = vadd.f32 %v1426_v57, %v1390_v24  ;;  %v1062_v33 = vrot.slane %v948_v1, 1  ;;  %v1192_v23 = vmul.f32 %v2646_v15, %v3513_v19  ;;  %v3619_v47 = vmul.f32 %v2646_v15, %v3521_v48 }
  0xda   : > { %2501 = vpow2.f32 %v2103_v52  ;;  %v752_v39 = vsel %vm704_vm1, %v750_v26, %v751_v45  ;;  %v1063_v56 = vrot.slane %v3606_v12, 1  ;;  %v1427_v18 = vmul.f32 %v2648_v16, %v3611_v63 }
  0xdb   : > { %v2498_v57 = vpop.eup %2497  ;;  %v1702_v35 = vadd.f32 %v1617_v20, %v1458_v43  ;;  %v835_v38 = vadd.f32 %v752_v39, %v590_v13  ;;  %v1306_v2 = vrot.slane %v1192_v23, 2  ;;  %v1307_v3 = vrot.slane %v3619_v47, 2 }
  0xdc   : > { %v2500_v7 = vpop.eup %2499  ;;  %v2213_v31 = vmul.f32 %v2498_v57, %v3480_v4  ;;  %v1064_v42 = vsel %vm459_vm0, %v1062_v33, %v1063_v56  ;;  %v1504_v32 = vmul.f32 %v2650_v17, %v3611_v63  ;;  %v1505_v44 = vmul.f32 %v2650_v17, %v3625_v51 }
  0xdd   : > { %v2150_v36 = vadd.f32 1.0, %v2500_v7  ;;  %v1946_v6 = vadd.f32 %v1861_v46, %v1702_v35  ;;  %v903_v25 = vadd.f32 %v871_v50, %v835_v38  ;;  %v1308_v4 = vsel %vm704_vm1, %v1306_v2, %v1307_v3 }
  0xde   : > { %2246 = vst.msk [vmem:[%s2912_s12 + $0x70] sm:$0xff] %vm2231_vm2, %v2213_v31  ;;  %v2291_v22 = vsel %vm2231_vm2, %v2213_v31, 0.0  ;;  %v1618_v27 = vrot.slane %v1504_v32, 1  ;;  %v1748_v53 = vmul.f32 %v2689_v49, %v3611_v63  ;;  %v1619_v62 = vrot.slane %v1505_v44, 1 }
  0xdf   : > { %v2292_v20 = vadd.f32 %v2291_v22, %v2290_v54  ;;  %2503 = vrcp.f32 %v2150_v36  ;;  %v1985_v37 = vmul.f32 %v3314_v55, %v1946_v6  ;;  %v1147_v60 = vadd.f32 %v1064_v42, %v903_v25 }
  0xe0   : > { %v1749_v46 = vmul.f32 %v2689_v49, %v3625_v51  ;;  %v1862_v41 = vrot.slane %v1748_v53, 2  ;;  %v314_v58 = vmul.f32 %v2634_v8, %v3415_v0  ;;  %v392_v50 = vmul.f32 %v2636_v9, %v3456_v29 }
  0xe1   : > { %v3645_v24 = vadd.f32 %v3327_v59, %v1985_v37  ;;  %v1391_v26 = vadd.f32 %v1308_v4, %v1147_v60  ;;  %v637_v54 = vmul.f32 %v2638_v10, %v3456_v29  ;;  %v1620_v1 = vsel %vm459_vm0, %v1618_v27, %v1619_v62 }
  0xe2   : > { %v1863_v52 = vrot.slane %v1749_v46, 2  ;;  %v872_v34 = vmul.f32 %v2640_v11, %v3521_v48  ;;  %v950_v0 = vmul.f32 %v2644_v14, %v3562_v21  ;;  %v508_v13 = vrot.slane %v392_v50, 1 }
  0xe3   : > { %v2056_v12 = vsub.f32 0.0, %v3645_v24  ;;  %v1459_v43 = vadd.f32 %v1427_v18, %v1391_v26  ;;  %v753_v33 = vrot.slane %v637_v54, 2  ;;  %v1194_v29 = vmul.f32 %v2646_v15, %v3562_v21  ;;  %v3666_v18 = vld [vmem:[%s2632_s29 + $0x118] sm:$0x3] }
  0xe4   : > { %v2502_v23 = vpop.eup %2501  ;;  %v1864_v39 = vsel %vm704_vm1, %v1862_v41, %v1863_v52  ;;  %v1065_v47 = vrot.slane %v950_v0, 1  ;;  %v1428_v57 = vmul.f32 %v2648_v16, %v3625_v51  ;;  %v509_v7 = vsel %vm459_vm0, %v506_v40, %v508_v13 }
  0xe5   : > { %v2151_v35 = vadd.f32 1.0, %v2502_v23  ;;  %v2105_v38 = vmul.f32 1.442695, %v2056_v12  ;;  %v1703_v2 = vadd.f32 %v1620_v1, %v1459_v43  ;;  %v591_v31 = vadd.f32 %v509_v7, %v314_v58  ;;  %v3723_v7 = vld [vmem:[%s2632_s29 + $0x120] sm:$0xff] }
  0xe6   : > { %v754_v42 = vsel %vm704_vm1, %v751_v45, %v753_v33  ;;  %v1066_v32 = vsel %vm459_vm0, %v1063_v56, %v1065_v47  ;;  %v1309_v36 = vrot.slane %v1194_v29, 2  ;;  %v1506_v25 = vmul.f32 %v2650_v17, %v3666_v18 }
  0xe7   : > { %2505 = vrcp.f32 %v2151_v35  ;;  %v1947_v6 = vadd.f32 %v1864_v39, %v1703_v2  ;;  %v1750_v61 = vmul.f32 %v2689_v49, %v3666_v18  ;;  %v836_v40 = vadd.f32 %v754_v42, %v591_v31 }
  0xe8   : > { %2507 = vpow2.f32 %v2105_v38  ;;  %v1310_v44 = vsel %vm704_vm1, %v1307_v3, %v1309_v36  ;;  %v315_v28 = vmul.f32 %v2634_v8, %v3513_v19  ;;  %v1621_v22 = vrot.slane %v1506_v25, 1 }
  0xe9   : > { %v2504_v45 = vpop.eup %2503  ;;  %v1986_v56 = vmul.f32 %v3314_v55, %v1947_v6  ;;  %v1865_v4 = vrot.slane %v1750_v61, 2  ;;  %v393_v27 = vmul.f32 %v2636_v9, %v3513_v19  ;;  %v904_v37 = vadd.f32 %v872_v34, %v836_v40 }
  0xea   : > { %v2214_v53 = vmul.f32 %v2504_v45, %v3544_v30  ;;  %v3685_v60 = vmul.f32 %v2636_v9, %v3521_v48  ;;  %v638_v3 = vmul.f32 %v2638_v10, %v3513_v19  ;;  %v1622_v41 = vsel %vm459_vm0, %v1619_v62, %v1621_v22 }
  0xeb   : > { %v3690_v46 = vadd.f32 %v3327_v59, %v1986_v56  ;;  %v1866_v58 = vsel %vm704_vm1, %v1863_v52, %v1865_v4  ;;  %v510_v26 = vrot.slane %v393_v27, 1  ;;  %v1148_v50 = vadd.f32 %v1066_v32, %v904_v37 }
  0xec   : > { %2247 = vst.msk [vmem:[%s2912_s12 + $0x78] sm:$0xff] %vm2231_vm2, %v2214_v53  ;;  %v2293_v30 = vsel %vm2231_vm2, %v2214_v53, 0.0  ;;  %v511_v54 = vrot.slane %v3685_v60, 1  ;;  %v3700_v1 = vmul.f32 %v2638_v10, %v3521_v48  ;;  %v755_v0 = vrot.slane %v638_v3, 2 }
  0xed   : > { %v2294_v19 = vadd.f32 %v2293_v30, %v2292_v20  ;;  %v2057_v34 = vsub.f32 0.0, %v3690_v46  ;;  %v873_v62 = vmul.f32 %v2640_v11, %v3611_v63  ;;  %v1392_v52 = vadd.f32 %v1310_v44, %v1148_v50  ;;  %v3731_v44 = vld [vmem:[%s2632_s29 + $0x128] sm:$0xff] }
  0xee   : > { %v512_v12 = vsel %vm459_vm0, %v510_v26, %v511_v54  ;;  %v756_v43 = vrot.slane %v3700_v1, 2  ;;  %v951_v13 = vmul.f32 %v2644_v14, %v3611_v63  ;;  %v3713_v20 = vmul.f32 %v2644_v14, %v3625_v51 }
  0xef   : > { %v2107_v33 = vmul.f32 1.442695, %v2057_v34  ;;  %v592_v23 = vadd.f32 %v512_v12, %v315_v28  ;;  %v1195_v39 = vmul.f32 %v2646_v15, %v3611_v63  ;;  %v1460_v47 = vadd.f32 %v1428_v57, %v1392_v52 }
  0xf0   : > { %v757_v29 = vsel %vm704_vm1, %v755_v0, %v756_v43  ;;  %v1067_v35 = vrot.slane %v951_v13, 1  ;;  %v3720_v38 = vmul.f32 %v2646_v15, %v3625_v51  ;;  %v1068_v42 = vrot.slane %v3713_v20, 1 }
  0xf1   : > { %v2506_v2 = vpop.eup %2505  ;;  %2509 = vpow2.f32 %v2107_v33  ;;  %v837_v31 = vadd.f32 %v757_v29, %v592_v23  ;;  %v1311_v32 = vrot.slane %v1195_v39, 2  ;;  %v1704_v6 = vadd.f32 %v1622_v41, %v1460_v47 }
  0xf2   : > { %v2508_v36 = vpop.eup %2507  ;;  %v2215_v57 = vmul.f32 %v2506_v2, %v3577_v5  ;;  %v1312_v25 = vrot.slane %v3720_v38, 2  ;;  %v1429_v61 = vmul.f32 %v2648_v16, %v3723_v7  ;;  %v1069_v45 = vsel %vm459_vm0, %v1067_v35, %v1068_v42 }
  0xf3   : > { %v2152_v40 = vadd.f32 1.0, %v2508_v36  ;;  %v905_v28 = vadd.f32 %v873_v62, %v837_v31  ;;  %v1507_v56 = vmul.f32 %v2650_v17, %v3723_v7  ;;  %v1948_v5 = vadd.f32 %v1866_v58, %v1704_v6 }
  0xf4   : > { %2248 = vst.msk [vmem:[%s2912_s12 + $0x80] sm:$0xff] %vm2231_vm2, %v2215_v57  ;;  %v2295_v22 = vsel %vm2231_vm2, %v2215_v57, 0.0  ;;  %v1313_v4 = vsel %vm704_vm1, %v1311_v32, %v1312_v25  ;;  %v1508_v27 = vmul.f32 %v2650_v17, %v3731_v44  ;;  %v1751_v30 = vmul.f32 %v2689_v49, %v3723_v7  ;;  %v3772_v57 = vld [vmem:[%s2632_s29 + $0x130] sm:$0x3] }
  0xf5   : > { %v2296_v53 = vadd.f32 %v2295_v22, %v2294_v19  ;;  %2511 = vrcp.f32 %v2152_v40  ;;  %v1149_v37 = vadd.f32 %v1069_v45, %v905_v28  ;;  %v1623_v3 = vrot.slane %v1507_v56, 1 }
  0xf6   : > { %v1987_v41 = vmul.f32 %v3314_v55, %v1948_v5  ;;  %v1624_v26 = vrot.slane %v1508_v27, 1  ;;  %v1752_v50 = vmul.f32 %v2689_v49, %v3731_v44  ;;  %v316_v58 = vmul.f32 %v2634_v8, %v3521_v48 }
  0xf7   : > { %v1393_v1 = vadd.f32 %v1313_v4, %v1149_v37  ;;  %v395_v34 = vmul.f32 %v2636_v9, %v3562_v21  ;;  %v640_v19 = vmul.f32 %v2638_v10, %v3562_v21  ;;  %v1867_v52 = vrot.slane %v1751_v30, 2 }
  0xf8   : > { %v3754_v0 = vadd.f32 %v3327_v59, %v1987_v41  ;;  %v1625_v62 = vsel %vm459_vm0, %v1623_v3, %v1624_v26  ;;  %v1868_v12 = vrot.slane %v1752_v50, 2  ;;  %v874_v48 = vmul.f32 %v2640_v11, %v3625_v51 }
  0xf9   : > { %v1461_v13 = vadd.f32 %v1429_v61, %v1393_v1  ;;  %v513_v33 = vrot.slane %v395_v34, 1  ;;  %v758_v23 = vrot.slane %v640_v19, 2  ;;  %v953_v21 = vmul.f32 %v2644_v14, %v3666_v18 }
  0xfa   : > { %v2058_v20 = vsub.f32 0.0, %v3754_v0  ;;  %v1869_v39 = vsel %vm704_vm1, %v1867_v52, %v1868_v12  ;;  %v1197_v47 = vmul.f32 %v2646_v15, %v3666_v18  ;;  %v1430_v31 = vmul.f32 %v2648_v16, %v3731_v44 }
  0xfb   : > { %v2510_v29 = vpop.eup %2509  ;;  %v1705_v35 = vadd.f32 %v1625_v62, %v1461_v13  ;;  %v514_v38 = vsel %vm459_vm0, %v511_v54, %v513_v33  ;;  %v759_v2 = vsel %vm704_vm1, %v756_v43, %v758_v23  ;;  %v1070_v61 = vrot.slane %v953_v21, 1 }
  0xfc   : > { %v2153_v32 = vadd.f32 1.0, %v2510_v29  ;;  %v2109_v36 = vmul.f32 1.442695, %v2058_v20  ;;  %v593_v6 = vadd.f32 %v514_v38, %v316_v58  ;;  %v1314_v28 = vrot.slane %v1197_v47, 2  ;;  %v3821_v38 = vld [vmem:[%s2632_s29 + $0x138] sm:$0xff] }
  0xfd   : > { %v1949_v40 = vadd.f32 %v1869_v39, %v1705_v35  ;;  %v1509_v45 = vmul.f32 %v2650_v17, %v3772_v57  ;;  %v1753_v60 = vmul.f32 %v2689_v49, %v3772_v57  ;;  %v1071_v43 = vsel %vm459_vm0, %v1068_v42, %v1070_v61 }
  0xfe   : > { %2513 = vrcp.f32 %v2153_v32  ;;  %v838_v54 = vadd.f32 %v759_v2, %v593_v6  ;;  %v317_v56 = vmul.f32 %v2634_v8, %v3611_v63  ;;  %v1315_v4 = vsel %vm704_vm1, %v1312_v25, %v1314_v28 }
  0xff   : > { %v2512_v22 = vpop.eup %2511  ;;  %2515 = vpow2.f32 %v2109_v36  ;;  %v1988_v5 = vmul.f32 %v3314_v55, %v1949_v40  ;;  %v1626_v27 = vrot.slane %v1509_v45, 1  ;;  %v1870_v41 = vrot.slane %v1753_v60, 2 }
 0x100   : > { %v2216_v37 = vmul.f32 %v2512_v22, %v3645_v24  ;;  %v906_v3 = vadd.f32 %v874_v48, %v838_v54  ;;  %v396_v30 = vmul.f32 %v2636_v9, %v3611_v63  ;;  %v3792_v1 = vmul.f32 %v2636_v9, %v3625_v51  ;;  %v3835_v54 = vld [vmem:[%s2632_s29 + $0x140] sm:$0xff] }
 0x101   : > { %v3787_v50 = vadd.f32 %v3327_v59, %v1988_v5  ;;  %v1627_v42 = vsel %vm459_vm0, %v1624_v26, %v1626_v27  ;;  %v641_v25 = vmul.f32 %v2638_v10, %v3611_v63  ;;  %v1871_v34 = vsel %vm704_vm1, %v1868_v12, %v1870_v41 }
 0x102   : > { %2249 = vst.msk [vmem:[%s2912_s12 + $0x88] sm:$0xff] %vm2231_vm2, %v2216_v37  ;;  %v2297_v24 = vsel %vm2231_vm2, %v2216_v37, 0.0  ;;  %v1150_v58 = vadd.f32 %v1071_v43, %v906_v3  ;;  %v515_v19 = vrot.slane %v396_v30, 1  ;;  %v516_v26 = vrot.slane %v3792_v1, 1 }
 0x103   : > { %v2298_v62 = vadd.f32 %v2297_v24, %v2296_v53  ;;  %v2059_v52 = vsub.f32 0.0, %v3787_v50  ;;  %v3804_v13 = vmul.f32 %v2638_v10, %v3625_v51  ;;  %v760_v63 = vrot.slane %v641_v25, 2 }
 0x104   : > { %v1394_v33 = vadd.f32 %v1315_v4, %v1150_v58  ;;  %v875_v23 = vmul.f32 %v2640_v11, %v3723_v7  ;;  %v954_v48 = vmul.f32 %v2644_v14, %v3723_v7  ;;  %v517_v53 = vsel %vm459_vm0, %v515_v19, %v516_v26 }
 0x105   : > { %v2111_v12 = vmul.f32 1.442695, %v2059_v52  ;;  %v761_v20 = vrot.slane %v3804_v13, 2  ;;  %v3816_v39 = vmul.f32 %v2644_v14, %v3731_v44  ;;  %v594_v47 = vadd.f32 %v517_v53, %v317_v56 }
 0x106   : > { %v1462_v21 = vadd.f32 %v1430_v31, %v1394_v33  ;;  %v1072_v29 = vrot.slane %v954_v48, 1  ;;  %v1198_v35 = vmul.f32 %v2646_v15, %v3723_v7  ;;  %v3829_v36 = vmul.f32 %v2646_v15, %v3731_v44 }
 0x107   : > { %2517 = vpow2.f32 %v2111_v12  ;;  %v762_v2 = vsel %vm704_vm1, %v760_v63, %v761_v20  ;;  %v1073_v32 = vrot.slane %v3816_v39, 1  ;;  %v1431_v28 = vmul.f32 %v2648_v16, %v3821_v38 }
 0x108   : > { %v2514_v31 = vpop.eup %2513  ;;  %v1706_v6 = vadd.f32 %v1627_v42, %v1462_v21  ;;  %v839_v61 = vadd.f32 %v762_v2, %v594_v47  ;;  %v1316_v40 = vrot.slane %v1198_v35, 2  ;;  %v1317_v56 = vrot.slane %v3829_v36, 2 }
 0x109   : > { %v2516_v45 = vpop.eup %2515  ;;  %v2217_v60 = vmul.f32 %v2514_v31, %v3690_v46  ;;  %v1074_v43 = vsel %vm459_vm0, %v1072_v29, %v1073_v32  ;;  %v1510_v22 = vmul.f32 %v2650_v17, %v3821_v38  ;;  %v1511_v37 = vmul.f32 %v2650_v17, %v3835_v54 }
 0x10a   : > { %v2154_v5 = vadd.f32 1.0, %v2516_v45  ;;  %v1950_v4 = vadd.f32 %v1871_v34, %v1706_v6  ;;  %v907_v27 = vadd.f32 %v875_v23, %v839_v61  ;;  %v1318_v46 = vsel %vm704_vm1, %v1316_v40, %v1317_v56  ;;  %v3876_v40 = vld [vmem:[%s2632_s29 + $0x148] sm:$0x3] }
 0x10b   : > { %2250 = vst.msk [vmem:[%s2912_s12 + $0x90] sm:$0xff] %vm2231_vm2, %v2217_v60  ;;  %v2299_v3 = vsel %vm2231_vm2, %v2217_v60, 0.0  ;;  %v1628_v41 = vrot.slane %v1510_v22, 1  ;;  %v1754_v30 = vmul.f32 %v2689_v49, %v3821_v38  ;;  %v1629_v58 = vrot.slane %v1511_v37, 1 }
 0x10c   : > { %v2300_v42 = vadd.f32 %v2299_v3, %v2298_v62  ;;  %2519 = vrcp.f32 %v2154_v5  ;;  %v1989_v25 = vmul.f32 %v3314_v55, %v1950_v4  ;;  %v1151_v24 = vadd.f32 %v1074_v43, %v907_v27 }
 0x10d   : > { %v1755_v34 = vmul.f32 %v2689_v49, %v3835_v54  ;;  %v1872_v19 = vrot.slane %v1754_v30, 2  ;;  %v318_v52 = vmul.f32 %v2634_v8, %v3625_v51  ;;  %v398_v23 = vmul.f32 %v2636_v9, %v3666_v18 }
 0x10e   : > { %v3855_v33 = vadd.f32 %v3327_v59, %v1989_v25  ;;  %v1395_v63 = vadd.f32 %v1318_v46, %v1151_v24  ;;  %v643_v62 = vmul.f32 %v2638_v10, %v3666_v18  ;;  %v1630_v55 = vsel %vm459_vm0, %v1628_v41, %v1629_v58  ;;  %v3907_v24 = vld [vmem:[%s4353_s3] ss:$0 sm:$0xff] }
 0x10f   : > { %v1873_v48 = vrot.slane %v1755_v34, 2  ;;  %v876_v12 = vmul.f32 %v2640_v11, %v3731_v44  ;;  %v956_v51 = vmul.f32 %v2644_v14, %v3772_v57  ;;  %v518_v39 = vrot.slane %v398_v23, 1 }
 0x110   : > { %v2060_v59 = vsub.f32 0.0, %v3855_v33  ;;  %v1463_v53 = vadd.f32 %v1431_v28, %v1395_v63  ;;  %v763_v21 = vrot.slane %v643_v62, 2  ;;  %v1200_v18 = vmul.f32 %v2646_v15, %v3772_v57 }
 0x111   : > { %v2518_v47 = vpop.eup %2517  ;;  %v1874_v29 = vsel %vm704_vm1, %v1872_v19, %v1873_v48  ;;  %v1075_v35 = vrot.slane %v956_v51, 1  ;;  %v1432_v2 = vmul.f32 %v2648_v16, %v3835_v54  ;;  %v519_v61 = vsel %vm459_vm0, %v516_v26, %v518_v39 }
 0x112   : > { %v2155_v36 = vadd.f32 1.0, %v2518_v47  ;;  %v2113_v31 = vmul.f32 1.442695, %v2060_v59  ;;  %v1707_v6 = vadd.f32 %v1630_v55, %v1463_v53  ;;  %v595_v28 = vadd.f32 %v519_v61, %v318_v52  ;;  %v3943_v61 = vld [vmem:[%s2632_s29 + $0x150] sm:$0xff] }
 0x113   : > { %v764_v45 = vsel %vm704_vm1, %v761_v20, %v763_v21  ;;  %v1076_v60 = vsel %vm459_vm0, %v1073_v32, %v1075_v35  ;;  %v1319_v43 = vrot.slane %v1200_v18, 2  ;;  %v1512_v5 = vmul.f32 %v2650_v17, %v3876_v40  ;;  %v3892_v32 = vld [vmem:[%s4352_s2] ss:$0 sm:$0xff] }
 0x114   : > { %2521 = vrcp.f32 %v2155_v36  ;;  %v1951_v22 = vadd.f32 %v1874_v29, %v1707_v6  ;;  %v1756_v1 = vmul.f32 %v2689_v49, %v3876_v40  ;;  %v840_v26 = vadd.f32 %v764_v45, %v595_v28 }
 0x115   : > { %2523 = vpow2.f32 %v2113_v31  ;;  %v1320_v4 = vsel %vm704_vm1, %v1317_v56, %v1319_v43  ;;  %v319_v13 = vmul.f32 %v2634_v8, %v3723_v7  ;;  %v1631_v37 = vrot.slane %v1512_v5, 1 }
 0x116   : > { %v2520_v20 = vpop.eup %2519  ;;  %v1990_v27 = vmul.f32 %v3892_v32, %v1951_v22  ;;  %v1875_v3 = vrot.slane %v1756_v1, 2  ;;  %v399_v46 = vmul.f32 %v2636_v9, %v3723_v7  ;;  %v908_v56 = vadd.f32 %v876_v12, %v840_v26 }
 0x117   : > { %v2218_v41 = vmul.f32 %v2520_v20, %v3754_v0  ;;  %v3900_v30 = vmul.f32 %v2636_v9, %v3731_v44  ;;  %v644_v25 = vmul.f32 %v2638_v10, %v3723_v7  ;;  %v1632_v19 = vsel %vm459_vm0, %v1629_v58, %v1631_v37 }
 0x118   : > { %v3910_v34 = vadd.f32 %v3907_v24, %v1990_v27  ;;  %v1876_v0 = vsel %vm704_vm1, %v1873_v48, %v1875_v3  ;;  %v520_v52 = vrot.slane %v399_v46, 1  ;;  %v1152_v23 = vadd.f32 %v1076_v60, %v908_v56 }
 0x119   : > { %2251 = vst.msk [vmem:[%s2912_s12 + $0x98] sm:$0xff] %vm2231_vm2, %v2218_v41  ;;  %v2301_v63 = vsel %vm2231_vm2, %v2218_v41, 0.0  ;;  %v521_v7 = vrot.slane %v3900_v30, 1  ;;  %v3920_v62 = vmul.f32 %v2638_v10, %v3731_v44  ;;  %v765_v51 = vrot.slane %v644_v25, 2 }
 0x11a   : > { %v2302_v55 = vadd.f32 %v2301_v63, %v2300_v42  ;;  %v2061_v12 = vsub.f32 0.0, %v3910_v34  ;;  %v877_v58 = vmul.f32 %v2640_v11, %v3821_v38  ;;  %v1396_v48 = vadd.f32 %v1320_v4, %v1152_v23  ;;  %v3951_v4 = vld [vmem:[%s2632_s29 + $0x158] sm:$0xff] }
 0x11b   : > { %v522_v59 = vsel %vm459_vm0, %v520_v52, %v521_v7  ;;  %v766_v53 = vrot.slane %v3920_v62, 2  ;;  %v957_v39 = vmul.f32 %v2644_v14, %v3821_v38  ;;  %v3933_v42 = vmul.f32 %v2644_v14, %v3835_v54 }
 0x11c   : > { %v2115_v21 = vmul.f32 1.442695, %v2061_v12  ;;  %v596_v47 = vadd.f32 %v522_v59, %v319_v13  ;;  %v1201_v29 = vmul.f32 %v2646_v15, %v3821_v38  ;;  %v1464_v35 = vadd.f32 %v1432_v2, %v1396_v48 }
 0x11d   : > { %v767_v18 = vsel %vm704_vm1, %v765_v51, %v766_v53  ;;  %v1077_v36 = vrot.slane %v957_v39, 1  ;;  %v3940_v31 = vmul.f32 %v2646_v15, %v3835_v54  ;;  %v1078_v45 = vrot.slane %v3933_v42, 1 }
 0x11e   : > { %v2522_v6 = vpop.eup %2521  ;;  %2525 = vpow2.f32 %v2115_v21  ;;  %v841_v28 = vadd.f32 %v767_v18, %v596_v47  ;;  %v1321_v60 = vrot.slane %v1201_v29, 2  ;;  %v1708_v22 = vadd.f32 %v1632_v19, %v1464_v35 }
 0x11f   : > { %v2524_v43 = vpop.eup %2523  ;;  %v2219_v2 = vmul.f32 %v2522_v6, %v3787_v50  ;;  %v1322_v5 = vrot.slane %v3940_v31, 2  ;;  %v1433_v1 = vmul.f32 %v2648_v16, %v3943_v61  ;;  %v1079_v20 = vsel %vm459_vm0, %v1077_v36, %v1078_v45 }
 0x120   : > { %v2156_v26 = vadd.f32 1.0, %v2524_v43  ;;  %v909_v13 = vadd.f32 %v877_v58, %v841_v28  ;;  %v1513_v27 = vmul.f32 %v2650_v17, %v3943_v61  ;;  %v1952_v50 = vadd.f32 %v1876_v0, %v1708_v22 }
 0x121   : > { %2252 = vst.msk [vmem:[%s2912_s12 + $0xa0] sm:$0xff] %vm2231_vm2, %v2219_v2  ;;  %v2303_v37 = vsel %vm2231_vm2, %v2219_v2, 0.0  ;;  %v1323_v3 = vsel %vm704_vm1, %v1321_v60, %v1322_v5  ;;  %v1514_v46 = vmul.f32 %v2650_v17, %v3951_v4  ;;  %v1757_v63 = vmul.f32 %v2689_v49, %v3943_v61  ;;  %v3992_v2 = vld [vmem:[%s2632_s29 + $0x160] sm:$0x3] }
 0x122   : > { %v2304_v41 = vadd.f32 %v2303_v37, %v2302_v55  ;;  %2527 = vrcp.f32 %v2156_v26  ;;  %v1153_v56 = vadd.f32 %v1079_v20, %v909_v13  ;;  %v1633_v25 = vrot.slane %v1513_v27, 1 }
 0x123   : > { %v1991_v19 = vmul.f32 %v3892_v32, %v1952_v50  ;;  %v1634_v52 = vrot.slane %v1514_v46, 1  ;;  %v1758_v23 = vmul.f32 %v2689_v49, %v3951_v4  ;;  %v320_v0 = vmul.f32 %v2634_v8, %v3731_v44 }
 0x124   : > { %v1397_v62 = vadd.f32 %v1323_v3, %v1153_v56  ;;  %v401_v12 = vmul.f32 %v2636_v9, %v3772_v57  ;;  %v646_v55 = vmul.f32 %v2638_v10, %v3772_v57  ;;  %v1877_v48 = vrot.slane %v1757_v63, 2 }
 0x125   : > { %v3974_v51 = vadd.f32 %v3907_v24, %v1991_v19  ;;  %v1635_v58 = vsel %vm459_vm0, %v1633_v25, %v1634_v52  ;;  %v1878_v59 = vrot.slane %v1758_v23, 2  ;;  %v878_v44 = vmul.f32 %v2640_v11, %v3835_v54 }
 0x126   : > { %v1465_v39 = vadd.f32 %v1433_v1, %v1397_v62  ;;  %v523_v21 = vrot.slane %v401_v12, 1  ;;  %v768_v47 = vrot.slane %v646_v55, 2  ;;  %v959_v57 = vmul.f32 %v2644_v14, %v3876_v40 }
 0x127   : > { %v2062_v42 = vsub.f32 0.0, %v3974_v51  ;;  %v1879_v29 = vsel %vm704_vm1, %v1877_v48, %v1878_v59  ;;  %v1203_v35 = vmul.f32 %v2646_v15, %v3876_v40  ;;  %v1434_v28 = vmul.f32 %v2648_v16, %v3951_v4 }
 0x128   : > { %v2526_v18 = vpop.eup %2525  ;;  %v1709_v36 = vadd.f32 %v1635_v58, %v1465_v39  ;;  %v524_v31 = vsel %vm459_vm0, %v521_v7, %v523_v21  ;;  %v769_v6 = vsel %vm704_vm1, %v766_v53, %v768_v47  ;;  %v1080_v1 = vrot.slane %v959_v57, 1 }
 0x129   : > { %v2157_v60 = vadd.f32 1.0, %v2526_v18  ;;  %v2117_v43 = vmul.f32 1.442695, %v2062_v42  ;;  %v597_v22 = vadd.f32 %v524_v31, %v320_v0  ;;  %v1324_v13 = vrot.slane %v1203_v35, 2  ;;  %v4041_v31 = vld [vmem:[%s2632_s29 + $0x168] sm:$0xff] }
 0x12a   : > { %v1953_v26 = vadd.f32 %v1879_v29, %v1709_v36  ;;  %v1515_v20 = vmul.f32 %v2650_v17, %v3992_v2  ;;  %v1759_v30 = vmul.f32 %v2689_v49, %v3992_v2  ;;  %v1081_v53 = vsel %vm459_vm0, %v1078_v45, %v1080_v1 }
 0x12b   : > { %2529 = vrcp.f32 %v2157_v60  ;;  %v842_v7 = vadd.f32 %v769_v6, %v597_v22  ;;  %v321_v27 = vmul.f32 %v2634_v8, %v3821_v38  ;;  %v1325_v3 = vsel %vm704_vm1, %v1322_v5, %v1324_v13 }
 0x12c   : > { %v2528_v37 = vpop.eup %2527  ;;  %2531 = vpow2.f32 %v2117_v43  ;;  %v1992_v50 = vmul.f32 %v3892_v32, %v1953_v26  ;;  %v1636_v46 = vrot.slane %v1515_v20, 1  ;;  %v1880_v19 = vrot.slane %v1759_v30, 2 }
 0x12d   : > { %v2220_v56 = vmul.f32 %v2528_v37, %v3855_v33  ;;  %v910_v25 = vadd.f32 %v878_v44, %v842_v7  ;;  %v402_v63 = vmul.f32 %v2636_v9, %v3821_v38  ;;  %v4012_v62 = vmul.f32 %v2636_v9, %v3835_v54  ;;  %v4055_v7 = vld [vmem:[%s2632_s29 + $0x170] sm:$0xff] }
 0x12e   : > { %v4007_v23 = vadd.f32 %v3907_v24, %v1992_v50  ;;  %v1637_v45 = vsel %vm459_vm0, %v1634_v52, %v1636_v46  ;;  %v647_v5 = vmul.f32 %v2638_v10, %v3821_v38  ;;  %v1881_v12 = vsel %vm704_vm1, %v1878_v59, %v1880_v19 }
 0x12f   : > { %2253 = vst.msk [vmem:[%s2912_s12 + $0xa8] sm:$0xff] %vm2231_vm2, %v2220_v56  ;;  %v2305_v33 = vsel %vm2231_vm2, %v2220_v56, 0.0  ;;  %v1154_v0 = vadd.f32 %v1081_v53, %v910_v25  ;;  %v525_v55 = vrot.slane %v402_v63, 1  ;;  %v526_v52 = vrot.slane %v4012_v62, 1 }
 0x130   : > { %v2306_v58 = vadd.f32 %v2305_v33, %v2304_v41  ;;  %v2063_v48 = vsub.f32 0.0, %v4007_v23  ;;  %v4024_v39 = vmul.f32 %v2638_v10, %v3835_v54  ;;  %v770_v38 = vrot.slane %v647_v5, 2 }
 0x131   : > { %v1398_v21 = vadd.f32 %v1325_v3, %v1154_v0  ;;  %v879_v47 = vmul.f32 %v2640_v11, %v3943_v61  ;;  %v960_v44 = vmul.f32 %v2644_v14, %v3943_v61  ;;  %v527_v41 = vsel %vm459_vm0, %v525_v55, %v526_v52 }
 0x132   : > { %v2119_v59 = vmul.f32 1.442695, %v2063_v48  ;;  %v771_v42 = vrot.slane %v4024_v39, 2  ;;  %v4036_v29 = vmul.f32 %v2644_v14, %v3951_v4  ;;  %v598_v35 = vadd.f32 %v527_v41, %v321_v27 }
 0x133   : > { %v1466_v57 = vadd.f32 %v1434_v28, %v1398_v21  ;;  %v1082_v18 = vrot.slane %v960_v44, 1  ;;  %v1204_v36 = vmul.f32 %v2646_v15, %v3943_v61  ;;  %v4049_v43 = vmul.f32 %v2646_v15, %v3951_v4 }
 0x134   : > { %2533 = vpow2.f32 %v2119_v59  ;;  %v772_v6 = vsel %vm704_vm1, %v770_v38, %v771_v42  ;;  %v1083_v60 = vrot.slane %v4036_v29, 1  ;;  %v1435_v13 = vmul.f32 %v2648_v16, %v4041_v31 }
 0x135   : > { %v2530_v28 = vpop.eup %2529  ;;  %v1710_v22 = vadd.f32 %v1637_v45, %v1466_v57  ;;  %v843_v1 = vadd.f32 %v772_v6, %v598_v35  ;;  %v1326_v26 = vrot.slane %v1204_v36, 2  ;;  %v1327_v27 = vrot.slane %v4049_v43, 2 }
 0x136   : > { %v2532_v20 = vpop.eup %2531  ;;  %v2221_v30 = vmul.f32 %v2530_v28, %v3910_v34  ;;  %v1084_v53 = vsel %vm459_vm0, %v1082_v18, %v1083_v60  ;;  %v1516_v37 = vmul.f32 %v2650_v17, %v4041_v31  ;;  %v1517_v56 = vmul.f32 %v2650_v17, %v4055_v7 }
 0x137   : > { %v2158_v50 = vadd.f32 1.0, %v2532_v20  ;;  %v1954_v3 = vadd.f32 %v1881_v12, %v1710_v22  ;;  %v911_v46 = vadd.f32 %v879_v47, %v843_v1  ;;  %v1328_v34 = vsel %vm704_vm1, %v1326_v26, %v1327_v27 }
 0x138   : > { %2254 = vst.msk [vmem:[%s2912_s12 + $0xb0] sm:$0xff] %vm2231_vm2, %v2221_v30  ;;  %v2307_v25 = vsel %vm2231_vm2, %v2221_v30, 0.0  ;;  %v1638_v19 = vrot.slane %v1516_v37, 1  ;;  %v1760_v63 = vmul.f32 %v2689_v49, %v4041_v31  ;;  %v1639_v0 = vrot.slane %v1517_v56, 1 }
 0x139   : > { %v2308_v45 = vadd.f32 %v2307_v25, %v2306_v58  ;;  %2535 = vrcp.f32 %v2158_v50  ;;  %v1993_v5 = vmul.f32 %v3892_v32, %v1954_v3  ;;  %v1155_v33 = vadd.f32 %v1084_v53, %v911_v46 }
 0x13a   : > { %v1761_v12 = vmul.f32 %v2689_v49, %v4055_v7  ;;  %v1882_v55 = vrot.slane %v1760_v63, 2  ;;  %v322_v48 = vmul.f32 %v2634_v8, %v3835_v54  ;;  %v404_v47 = vmul.f32 %v2636_v9, %v3876_v40 }
 0x13b   : > { %v4075_v21 = vadd.f32 %v3907_v24, %v1993_v5  ;;  %v1399_v38 = vadd.f32 %v1328_v34, %v1155_v33  ;;  %v649_v58 = vmul.f32 %v2638_v10, %v3876_v40  ;;  %v1640_v44 = vsel %vm459_vm0, %v1638_v19, %v1639_v0 }
 0x13c   : > { %v1883_v59 = vrot.slane %v1761_v12, 2  ;;  %v880_v41 = vmul.f32 %v2640_v11, %v3951_v4  ;;  %v962_v54 = vmul.f32 %v2644_v14, %v3992_v2  ;;  %v528_v35 = vrot.slane %v404_v47, 1 }
 0x13d   : > { %v2064_v29 = vsub.f32 0.0, %v4075_v21  ;;  %v1467_v57 = vadd.f32 %v1435_v13, %v1399_v38  ;;  %v773_v18 = vrot.slane %v649_v58, 2  ;;  %v1206_v40 = vmul.f32 %v2646_v15, %v3992_v2  ;;  %v4096_v13 = vld [vmem:[%s2632_s29 + $0x178] sm:$0x3] }
 0x13e   : > { %v2534_v36 = vpop.eup %2533  ;;  %v1884_v6 = vsel %vm704_vm1, %v1882_v55, %v1883_v59  ;;  %v1085_v43 = vrot.slane %v962_v54, 1  ;;  %v1436_v28 = vmul.f32 %v2648_v16, %v4055_v7  ;;  %v529_v20 = vsel %vm459_vm0, %v526_v52, %v528_v35 }
 0x13f   : > { %v2159_v22 = vadd.f32 1.0, %v2534_v36  ;;  %v2121_v1 = vmul.f32 1.442695, %v2064_v29  ;;  %v1711_v26 = vadd.f32 %v1640_v44, %v1467_v57  ;;  %v599_v30 = vadd.f32 %v529_v20, %v322_v48  ;;  %v4153_v20 = vld [vmem:[%s2632_s29 + $0x180] sm:$0xff] }
 0x140   : > { %v774_v53 = vsel %vm704_vm1, %v771_v42, %v773_v18  ;;  %v1086_v37 = vsel %vm459_vm0, %v1083_v60, %v1085_v43  ;;  %v1329_v50 = vrot.slane %v1206_v40, 2  ;;  %v1518_v46 = vmul.f32 %v2650_v17, %v4096_v13 }
 0x141   : > { %2537 = vrcp.f32 %v2159_v22  ;;  %v1955_v3 = vadd.f32 %v1884_v6, %v1711_v26  ;;  %v1762_v62 = vmul.f32 %v2689_v49, %v4096_v13  ;;  %v844_v52 = vadd.f32 %v774_v53, %v599_v30 }
 0x142   : > { %2539 = vpow2.f32 %v2121_v1  ;;  %v1330_v56 = vsel %vm704_vm1, %v1327_v27, %v1329_v50  ;;  %v323_v39 = vmul.f32 %v2634_v8, %v3943_v61  ;;  %v1641_v25 = vrot.slane %v1518_v46, 1 }
 0x143   : > { %v2536_v42 = vpop.eup %2535  ;;  %v1994_v60 = vmul.f32 %v3892_v32, %v1955_v3  ;;  %v1885_v34 = vrot.slane %v1762_v62, 2  ;;  %v405_v19 = vmul.f32 %v2636_v9, %v3943_v61  ;;  %v912_v5 = vadd.f32 %v880_v41, %v844_v52 }
 0x144   : > { %v2222_v63 = vmul.f32 %v2536_v42, %v3974_v51  ;;  %v4115_v33 = vmul.f32 %v2636_v9, %v3951_v4  ;;  %v650_v27 = vmul.f32 %v2638_v10, %v3943_v61  ;;  %v1642_v55 = vsel %vm459_vm0, %v1639_v0, %v1641_v25 }
 0x145   : > { %v4120_v12 = vadd.f32 %v3907_v24, %v1994_v60  ;;  %v1886_v48 = vsel %vm704_vm1, %v1883_v59, %v1885_v34  ;;  %v530_v38 = vrot.slane %v405_v19, 1  ;;  %v1156_v47 = vadd.f32 %v1086_v37, %v912_v5 }
 0x146   : > { %2255 = vst.msk [vmem:[%s2912_s12 + $0xb8] sm:$0xff] %vm2231_vm2, %v2222_v63  ;;  %v2309_v51 = vsel %vm2231_vm2, %v2222_v63, 0.0  ;;  %v531_v58 = vrot.slane %v4115_v33, 1  ;;  %v4130_v44 = vmul.f32 %v2638_v10, %v3951_v4  ;;  %v775_v54 = vrot.slane %v650_v27, 2 }
 0x147   : > { %v2310_v61 = vadd.f32 %v2309_v51, %v2308_v45  ;;  %v2065_v41 = vsub.f32 0.0, %v4120_v12  ;;  %v881_v0 = vmul.f32 %v2640_v11, %v4041_v31  ;;  %v1400_v59 = vadd.f32 %v1330_v56, %v1156_v47  ;;  %v4161_v56 = vld [vmem:[%s2632_s29 + $0x188] sm:$0xff] }
 0x148   : > { %v532_v29 = vsel %vm459_vm0, %v530_v38, %v531_v58  ;;  %v776_v57 = vrot.slane %v4130_v44, 2  ;;  %v963_v35 = vmul.f32 %v2644_v14, %v4041_v31  ;;  %v4143_v45 = vmul.f32 %v2644_v14, %v4055_v7 }
 0x149   : > { %v2123_v18 = vmul.f32 1.442695, %v2065_v41  ;;  %v600_v36 = vadd.f32 %v532_v29, %v323_v39  ;;  %v1207_v6 = vmul.f32 %v2646_v15, %v4041_v31  ;;  %v1468_v43 = vadd.f32 %v1436_v28, %v1400_v59 }
 0x14a   : > { %v777_v40 = vsel %vm704_vm1, %v775_v54, %v776_v57  ;;  %v1087_v22 = vrot.slane %v963_v35, 1  ;;  %v4150_v1 = vmul.f32 %v2646_v15, %v4055_v7  ;;  %v1088_v53 = vrot.slane %v4143_v45, 1 }
 0x14b   : > { %v2538_v26 = vpop.eup %2537  ;;  %2541 = vpow2.f32 %v2123_v18  ;;  %v845_v30 = vadd.f32 %v777_v40, %v600_v36  ;;  %v1331_v37 = vrot.slane %v1207_v6, 2  ;;  %v1712_v3 = vadd.f32 %v1642_v55, %v1468_v43 }
 0x14c   : > { %v2540_v50 = vpop.eup %2539  ;;  %v2223_v28 = vmul.f32 %v2538_v26, %v4007_v23  ;;  %v1332_v46 = vrot.slane %v4150_v1, 2  ;;  %v1437_v62 = vmul.f32 %v2648_v16, %v4153_v20  ;;  %v1089_v42 = vsel %vm459_vm0, %v1087_v22, %v1088_v53 }
 0x14d   : > { %v2160_v52 = vadd.f32 1.0, %v2540_v50  ;;  %v913_v39 = vadd.f32 %v881_v0, %v845_v30  ;;  %v1519_v60 = vmul.f32 %v2650_v17, %v4153_v20  ;;  %v1956_v23 = vadd.f32 %v1886_v48, %v1712_v3 }
 0x14e   : > { %2256 = vst.msk [vmem:[%s2912_s12 + $0xc0] sm:$0xff] %vm2231_vm2, %v2223_v28  ;;  %v2311_v25 = vsel %vm2231_vm2, %v2223_v28, 0.0  ;;  %v1333_v34 = vsel %vm704_vm1, %v1331_v37, %v1332_v46  ;;  %v1520_v19 = vmul.f32 %v2650_v17, %v4161_v56  ;;  %v1763_v51 = vmul.f32 %v2689_v49, %v4153_v20  ;;  %v4204_v28 = vld [vmem:[%s2632_s29 + $0x190] sm:$0x3] }
 0x14f   : > { %v4174_v63 = vadd.f32 %v2311_v25, %v2310_v61  ;;  %2543 = vrcp.f32 %v2160_v52  ;;  %v1157_v5 = vadd.f32 %v1089_v42, %v913_v39  ;;  %v1643_v27 = vrot.slane %v1519_v60, 1 }
 0x150   : > { %v1995_v55 = vmul.f32 %v3892_v32, %v1956_v23  ;;  %v1644_v38 = vrot.slane %v1520_v19, 1  ;;  %v1764_v48 = vmul.f32 %v2689_v49, %v4161_v56  ;;  %v324_v44 = vmul.f32 %v2634_v8, %v3951_v4 }
 0x151   : > { %v1401_v47 = vadd.f32 %v1333_v34, %v1157_v5  ;;  %v407_v61 = vmul.f32 %v2636_v9, %v3992_v2  ;;  %v652_v41 = vmul.f32 %v2638_v10, %v3992_v2  ;;  %v1887_v59 = vrot.slane %v1763_v51, 2 }
 0x152   : > { %v4188_v54 = vadd.f32 %v3907_v24, %v1995_v55  ;;  %v1645_v0 = vsel %vm459_vm0, %v1643_v27, %v1644_v38  ;;  %v1888_v29 = vrot.slane %v1764_v48, 2  ;;  %v965_v6 = vmul.f32 %v2644_v14, %v4096_v13 }
 0x153   : > { %v1469_v35 = vadd.f32 %v1437_v62, %v1401_v47  ;;  %v533_v18 = vrot.slane %v407_v61, 1  ;;  %v778_v36 = vrot.slane %v652_v41, 2  ;;  %v1209_v2 = vmul.f32 %v2646_v15, %v4096_v13 }
 0x154   : > { %v2066_v45 = vsub.f32 0.0, %v4188_v54  ;;  %v1889_v4 = vsel %vm704_vm1, %v1887_v59, %v1888_v29  ;;  %v882_v30 = vmul.f32 %v2640_v11, %v4055_v7  ;;  %v1090_v62 = vrot.slane %v965_v6, 1 }
 0x155   : > { %v2542_v43 = vpop.eup %2541  ;;  %v1713_v40 = vadd.f32 %v1645_v0, %v1469_v35  ;;  %v534_v22 = vsel %vm459_vm0, %v531_v58, %v533_v18  ;;  %v779_v26 = vsel %vm704_vm1, %v776_v57, %v778_v36  ;;  %v1334_v39 = vrot.slane %v1209_v2, 2  ;;  %v285_v2 = vld [vmem:[%s2632_s29 + $0x198] sm:$0xff] }
 0x156   : > { %v2161_v37 = vadd.f32 1.0, %v2542_v43  ;;  %v2125_v50 = vmul.f32 1.442695, %v2066_v45  ;;  %v601_v3 = vadd.f32 %v534_v22, %v324_v44  ;;  %v1521_v42 = vmul.f32 %v2650_v17, %v4204_v28 }
 0x157   : > { %v1957_v52 = vadd.f32 %v1889_v4, %v1713_v40  ;;  %v1765_v33 = vmul.f32 %v2689_v49, %v4204_v28  ;;  %v1438_v57 = vmul.f32 %v2648_v16, %v4161_v56  ;;  %v1091_v23 = vsel %vm459_vm0, %v1088_v53, %v1090_v62 }
 0x158   : > { %2545 = vrcp.f32 %v2161_v37  ;;  %v846_v58 = vadd.f32 %v779_v26, %v601_v3  ;;  %v1646_v34 = vrot.slane %v1521_v42, 1  ;;  %v408_v55 = vmul.f32 %v2636_v9, %v4041_v31  ;;  %v4260_v26 = vld [vmem:[%s2632_s29 + $0x1a0] sm:$0xff] }
 0x159   : > { %v2544_v60 = vpop.eup %2543  ;;  %2547 = vpow2.f32 %v2125_v50  ;;  %v1996_v25 = vmul.f32 %v3892_v32, %v1957_v52  ;;  %v1890_v27 = vrot.slane %v1765_v33, 2  ;;  %v1335_v48 = vsel %vm704_vm1, %v1332_v46, %v1334_v39 }
 0x15a   : > { %v4215_v19 = vmul.f32 %v2544_v60, %v4075_v21  ;;  %v914_v5 = vadd.f32 %v882_v30, %v846_v58  ;;  %v4227_v47 = vmul.f32 %v2636_v9, %v4055_v7  ;;  %v653_v21 = vmul.f32 %v2638_v10, %v4041_v31 }
 0x15b   : > { %v4220_v51 = vadd.f32 %v3907_v24, %v1996_v25  ;;  %v1647_v44 = vsel %vm459_vm0, %v1644_v38, %v1646_v34  ;;  %v325_v61 = vmul.f32 %v2634_v8, %v4041_v31  ;;  %v535_v1 = vrot.slane %v408_v55, 1 }
 0x15c   : > { %2257 = vst.msk [vmem:[%s2912_s12 + $0xc8] sm:$0xff] %vm2231_vm2, %v4215_v19  ;;  %v1158_v53 = vadd.f32 %v1091_v23, %v914_v5  ;;  %v1891_v41 = vsel %vm704_vm1, %v1888_v29, %v1890_v27  ;;  %v536_v0 = vrot.slane %v4227_v47, 1  ;;  %v4242_v59 = vmul.f32 %v2638_v10, %v4055_v7 }
 0x15d   : > { %v2067_v46 = vsub.f32 0.0, %v4220_v51  ;;  %v780_v18 = vrot.slane %v653_v21, 2  ;;  %v883_v38 = vmul.f32 %v2640_v11, %v4153_v20  ;;  %v966_v31 = vmul.f32 %v2644_v14, %v4153_v20 }
 0x15e   : > { %v1402_v35 = vadd.f32 %v1335_v48, %v1158_v53  ;;  %v537_v29 = vsel %vm459_vm0, %v535_v1, %v536_v0  ;;  %v781_v45 = vrot.slane %v4242_v59, 2  ;;  %v4254_v4 = vmul.f32 %v2644_v14, %v4161_v56 }
 0x15f   : > { %v2127_v36 = vmul.f32 1.442695, %v2067_v46  ;;  %v602_v43 = vadd.f32 %v537_v29, %v325_v61  ;;  %v1092_v40 = vrot.slane %v966_v31, 1  ;;  %v1210_v22 = vmul.f32 %v2646_v15, %v4153_v20 }
 0x160   : > { %v1470_v6 = vadd.f32 %v1438_v57, %v1402_v35  ;;  %v782_v30 = vsel %vm704_vm1, %v780_v18, %v781_v45  ;;  %v1093_v37 = vrot.slane %v4254_v4, 1  ;;  %v4266_v50 = vmul.f32 %v2646_v15, %v4161_v56 }
 0x161   : > { %2549 = vpow2.f32 %v2127_v36  ;;  %v847_v52 = vadd.f32 %v782_v30, %v602_v43  ;;  %v1336_v39 = vrot.slane %v1210_v22, 2  ;;  %v1522_v57 = vmul.f32 %v2650_v17, %v285_v2  ;;  %v287_v43 = vld [vmem:[%s2632_s29 + $0x1a8] sm:$0x3] }
 0x162   : > { %v2546_v3 = vpop.eup %2545  ;;  %v1714_v62 = vadd.f32 %v1647_v44, %v1470_v6  ;;  %v1094_v20 = vsel %vm459_vm0, %v1092_v40, %v1093_v37  ;;  %v1337_v58 = vrot.slane %v4266_v50, 2  ;;  %v1523_v34 = vmul.f32 %v2650_v17, %v4260_v26 }
 0x163   : > { %v2548_v42 = vpop.eup %2547  ;;  %v4269_v33 = vmul.f32 %v2546_v3, %v4120_v12  ;;  %v915_v23 = vadd.f32 %v883_v38, %v847_v52  ;;  %v1648_v27 = vrot.slane %v1522_v57, 1  ;;  %v1766_v12 = vmul.f32 %v2689_v49, %v285_v2 }
 0x164   : > { %v2162_v60 = vadd.f32 1.0, %v2548_v42  ;;  %v1958_v25 = vadd.f32 %v1891_v41, %v1714_v62  ;;  %v1338_v5 = vsel %vm704_vm1, %v1336_v39, %v1337_v58  ;;  %v1439_v21 = vmul.f32 %v2648_v16, %v285_v2 }
 0x165   : > { %2258 = vst.msk [vmem:[%s2912_s12 + $0xd0] sm:$0xff] %vm2231_vm2, %v4269_v33  ;;  %v1159_v48 = vadd.f32 %v1094_v20, %v915_v23  ;;  %v1649_v53 = vrot.slane %v1523_v34, 1  ;;  %v1767_v44 = vmul.f32 %v2689_v49, %v4260_v26  ;;  %v1892_v61 = vrot.slane %v1766_v12, 2 }
 0x166   : > { %2551 = vrcp.f32 %v2162_v60  ;;  %v1997_v55 = vmul.f32 %v3892_v32, %v1958_v25  ;;  %v410_v41 = vmul.f32 %v2636_v9, %v4096_v13  ;;  %v655_v59 = vmul.f32 %v2638_v10, %v4096_v13 }
 0x167   : > { %v1403_v46 = vadd.f32 %v1338_v5, %v1159_v48  ;;  %v1650_v35 = vsel %vm459_vm0, %v1648_v27, %v1649_v53  ;;  %v1893_v18 = vrot.slane %v1767_v44, 2  ;;  %v326_v38 = vmul.f32 %v2634_v8, %v4055_v7 }
 0x168   : > { %v4286_v1 = vadd.f32 %v3907_v24, %v1997_v55  ;;  %v968_v31 = vmul.f32 %v2644_v14, %v4204_v28  ;;  %v538_v4 = vrot.slane %v410_v41, 1  ;;  %v783_v6 = vrot.slane %v655_v59, 2 }
 0x169   : > { %v1471_v29 = vadd.f32 %v1439_v21, %v1403_v46  ;;  %v1894_v9 = vsel %vm704_vm1, %v1892_v61, %v1893_v18  ;;  %v1212_v10 = vmul.f32 %v2646_v15, %v4204_v28  ;;  %v884_v50 = vmul.f32 %v2640_v11, %v4161_v56 }
 0x16a   : > { %v2068_v36 = vsub.f32 0.0, %v4286_v1  ;;  %v1095_v40 = vrot.slane %v968_v31, 1  ;;  %v539_v8 = vsel %vm459_vm0, %v536_v0, %v538_v4  ;;  %v784_v7 = vsel %vm704_vm1, %v781_v45, %v783_v6 }
 0x16b   : > { %v2550_v2 = vpop.eup %2549  ;;  %v1715_v30 = vadd.f32 %v1650_v35, %v1471_v29  ;;  %v603_v14 = vadd.f32 %v539_v8, %v326_v38  ;;  %v1339_v62 = vrot.slane %v1212_v10, 2  ;;  %v1524_v52 = vmul.f32 %v2650_v17, %v287_v43 }
 0x16c   : > { %v2163_v13 = vadd.f32 1.0, %v2550_v2  ;;  %v2129_v22 = vmul.f32 1.442695, %v2068_v36  ;;  %v1096_v47 = vsel %vm459_vm0, %v1093_v37, %v1095_v40  ;;  %v1768_v0 = vmul.f32 %v2689_v49, %v287_v43 }
 0x16d   : > { %v1959_v3 = vadd.f32 %v1894_v9, %v1715_v30  ;;  %v848_v15 = vadd.f32 %v784_v7, %v603_v14  ;;  %v1340_v56 = vsel %vm704_vm1, %v1337_v58, %v1339_v62  ;;  %v1651_v20 = vrot.slane %v1524_v52, 1 }
 0x16e   : > { %2553 = vrcp.f32 %v2163_v13  ;;  %v1440_v57 = vmul.f32 %v2648_v16, %v4260_v26  ;;  %v1895_v25 = vrot.slane %v1768_v0, 2 }
 0x16f   : > { %2555 = vpow2.f32 %v2129_v22  ;;  %v1998_v39 = vmul.f32 %v3892_v32, %v1959_v3  ;;  %v916_v42 = vadd.f32 %v884_v50, %v848_v15  ;;  %v1652_v49 = vsel %vm459_vm0, %v1649_v53, %v1651_v20 }
 0x170   : > { %v2552_v28 = vpop.eup %2551  ;;  %v1896_v5 = vsel %vm704_vm1, %v1893_v18, %v1895_v25 }
 0x171   : > { %v2226_v45 = vmul.f32 %v2552_v28, %v4188_v54  ;;  %v2037_v11 = vadd.f32 %v3907_v24, %v1998_v39  ;;  %v1160_v17 = vadd.f32 %v1096_v47, %v916_v42 }
 0x173   : > { %2259 = vst.msk [vmem:[%s2912_s12 + $0xd8] sm:$0xff] %vm2231_vm2, %v2226_v45  ;;  %v2069_v60 = vsub.f32 0.0, %v2037_v11  ;;  %v1404_v37 = vadd.f32 %v1340_v56, %v1160_v17  ;;  %v2317_v35 = vsel %vm2231_vm2, %v2226_v45, 0.0 }
 0x175   : > { %v2131_v23 = vmul.f32 1.442695, %v2069_v60  ;;  %v1472_v54 = vadd.f32 %v1440_v57, %v1404_v37 }
 0x177   : > { %2557 = vpow2.f32 %v2131_v23  ;;  %v1716_v12 = vadd.f32 %v1652_v49, %v1472_v54 }
 0x178   : > { %v2554_v34 = vpop.eup %2553 }
 0x179   : > { %v2556_v58 = vpop.eup %2555  ;;  %v2227_v27 = vmul.f32 %v2554_v34, %v4220_v51  ;;  %v1960_v16 = vadd.f32 %v1896_v5, %v1716_v12  ;;  %v2313_v51 = vsel %vm2231_vm2, %v4215_v19, 0.0 }
 0x17a   : > { %v2164_v55 = vadd.f32 1.0, %v2556_v58  ;;  %v2314_v59 = vadd.f32 %v2313_v51, %v4174_v63 }
 0x17b   : > { %2260 = vst.msk [vmem:[%s2912_s12 + $0xe0] sm:$0xff] %vm2231_vm2, %v2227_v27  ;;  %v1999_v26 = vmul.f32 %v3892_v32, %v1960_v16  ;;  %v2315_v32 = vsel %vm2231_vm2, %v4269_v33, 0.0  ;;  %v2319_v19 = vsel %vm2231_vm2, %v2227_v27, 0.0 }
 0x17c   : > { %2559 = vrcp.f32 %v2164_v55 }
 0x17d   : > { %v2038_v48 = vadd.f32 %v3907_v24, %v1999_v26  ;;  %v2316_v24 = vadd.f32 %v2315_v32, %v2314_v59 }
 0x17f   : > { %v2070_v21 = vsub.f32 0.0, %v2038_v48  ;;  %v2318_v36 = vadd.f32 %v2317_v35, %v2316_v24 }
 0x181   : > { %v2558_v53 = vpop.eup %2557  ;;  %v2133_v61 = vmul.f32 1.442695, %v2070_v21  ;;  %v2320_v63 = vadd.f32 %v2319_v19, %v2318_v36 }
 0x182   : > { %v2165_v44 = vadd.f32 1.0, %v2558_v53 }
 0x184   : > { %2561 = vrcp.f32 %v2165_v44 }
 0x185   : > { %2563 = vpow2.f32 %v2133_v61 }
 0x186   : > { %v2560_v46 = vpop.eup %2559 }
 0x187   : > { %v2228_v41 = vmul.f32 %v2560_v46, %v4286_v1 }
 0x189   : > { %2261 = vst.msk [vmem:[%s2912_s12 + $0xe8] sm:$0xff] %vm2231_vm2, %v2228_v41  ;;  %v2321_v1 = vsel %vm2231_vm2, %v2228_v41, 0.0 }
 0x18a   : > { %v2322_v4 = vadd.f32 %v2321_v1, %v2320_v63 }
 0x18e   : > { %v2562_v18 = vpop.eup %2561 }
 0x18f   : > { %v2564_v38 = vpop.eup %2563  ;;  %v2229_v31 = vmul.f32 %v2562_v18, %v2037_v11 }
 0x190   : > { %v2166_v29 = vadd.f32 1.0, %v2564_v38 }
 0x191   : > { %2262 = vst.msk [vmem:[%s2912_s12 + $0xf0] sm:$0xff] %vm2231_vm2, %v2229_v31  ;;  %v2323_v33 = vsel %vm2231_vm2, %v2229_v31, 0.0 }
 0x192   : > { %2565 = vrcp.f32 %v2166_v29  ;;  %v2324_v2 = vadd.f32 %v2323_v33, %v2322_v4 }
 0x19c   : > { %v2566_v6 = vpop.eup %2565 }
 0x19d   : > { %v2230_v9 = vmul.f32 %v2566_v6, %v2038_v48 }
 0x19f   : > { %2263 = vst.msk [vmem:[%s2912_s12 + $0xf8] sm:$0xff] %vm2231_vm2, %v2230_v9  ;;  %v2325_v43 = vsel %vm2231_vm2, %v2230_v9, 0.0 }
 0x1a0   : > { %v2326_v40 = vadd.f32 %v2325_v43, %v2324_v2 }
 0x1a2   : > { %v2327_v10 = vrot.slane %v2326_v40, 4 }
 0x1a4   : > { %v2328_v13 = vadd.f32 %v2327_v10, %v2326_v40 }
 0x1a6   : > { %v2329_v22 = vrot.slane %v2328_v13, 2 }
 0x1a8   : > { %v2330_v30 = vadd.f32 %v2329_v22, %v2328_v13 }
 0x1aa   : > { %v2331_v8 = vrot.slane %v2330_v30, 1 }
 0x1ac   : > { %v2332_v14 = vadd.f32 %v2331_v8, %v2330_v30 }
 0x1ae   : > { %v2334_v7 = vmul.f32 0.00390625, %v2332_v14 }
 0x1b0   : > { %2336 = vst.msk [vmem:[%s233_s25] sm:$0x1] %vm2335_vm3, %v2334_v7 }
 0x1b1 PF: > { %s16_s18 = sadd.s32 1, %s2577_s18  }
 0x1b2   : > { %p13_p4 = scmp.ge.s32.totalorder %s16_s18, 4  }
 0x1b4   :  { %15 = sbr.rel (!%p13_p4) target bundleno = 1 (0x1), region = 78 }

</bundles_post_ra>
